<compile_context>
chip_gen: v6e
topology: v6e:2x2x1
jax: 0.10.0
libtpu: 0.0.40
codegen_flags: <defaults>
</compile_context>

<pallas_src>
import functools

import jax
import jax.numpy as jnp
from jax.experimental import pallas as pl
from jax.experimental.pallas import tpu as pltpu

ACT_DTYPE = jnp.bfloat16  # HBM dtype for activations / conv weights (f32 accumulation)


# ----------------------------- Pallas kernels -----------------------------

def _matmul_bias_kernel(x_ref, w_ref, b_ref, o_ref, *, relu):
    """Fused (im2col-)conv/linear: y = act(x @ w + b).  BN already folded into w, b."""
    y = jnp.dot(x_ref[...], w_ref[...], preferred_element_type=jnp.float32)
    y = y + b_ref[...].astype(jnp.float32)
    if relu:
        y = jnp.maximum(y, 0.0)
    o_ref[...] = y.astype(o_ref.dtype)


def _matmul_bias_res_kernel(x_ref, w_ref, b_ref, r_ref, o_ref, *, relu):
    """Fused conv + folded-BN + residual add + ReLU (bottleneck epilogue)."""
    y = jnp.dot(x_ref[...], w_ref[...], preferred_element_type=jnp.float32)
    y = y + b_ref[...].astype(jnp.float32) + r_ref[...].astype(jnp.float32)
    if relu:
        y = jnp.maximum(y, 0.0)
    o_ref[...] = y.astype(o_ref.dtype)


def _head_kernel(x_ref, w1_ref, b1_ref, w2_ref, b2_ref, o_ref):
    """Fused classifier head: global avg-pool -> fc1 -> ReLU -> Dropout(id) -> fc2.

    Output last dim is pre-padded to 128 lanes (lane-dense store); wrapper slices.
    """
    _, s, _ = x_ref.shape
    x = x_ref[...].astype(jnp.float32).sum(axis=1) * (1.0 / s)        # [B, C] avg-pool
    h = jnp.dot(x.astype(w1_ref.dtype), w1_ref[...],
                preferred_element_type=jnp.float32)
    h = jnp.maximum(h + b1_ref[...].astype(jnp.float32), 0.0)         # ReLU
    # TODO(synk): Dropout(0.5) is an inference-mode identity (no RNG mask applied).
    y = jnp.dot(h.astype(w2_ref.dtype), w2_ref[...],
                preferred_element_type=jnp.float32)
    o_ref[...] = (y + b2_ref[...].astype(jnp.float32)).astype(o_ref.dtype)


# ----------------------------- Pallas wrappers -----------------------------

def _pick_row_tile(m):
    """Largest convenient row tile (multiple of 8) that evenly divides m."""
    if m >= 256:
        for tm in (128, 256):
            if m % tm == 0:
                return tm
    for tm in (128, 64, 32, 16, 8):
        if m % tm == 0:
            return tm
    return m  # tiny remainder: single full block (legal: equals full dim)


def pallas_matmul_bias(x, w, b, *, relu=False, residual=None):
    """y = act(x @ w + b [+ residual]).  x:[M,K], w:[K,N], b:[N], residual:[M,N]."""
    m, k = x.shape
    n = w.shape[1]
    tm = _pick_row_tile(m)
    grid = (m // tm,)
    b2d = b.reshape(1, n)
    x_spec = pl.BlockSpec((tm, k), lambda i: (i, 0))
    w_spec = pl.BlockSpec((k, n), lambda i: (0, 0))
    b_spec = pl.BlockSpec((1, n), lambda i: (0, 0))
    o_spec = pl.BlockSpec((tm, n), lambda i: (i, 0))
    cp = pltpu.CompilerParams(dimension_semantics=("parallel",))
    if residual is None:
        return pl.pallas_call(
            functools.partial(_matmul_bias_kernel, relu=relu),
            out_shape=jax.ShapeDtypeStruct((m, n), ACT_DTYPE),
            grid=grid,
            in_specs=[x_spec, w_spec, b_spec],
            out_specs=o_spec,
            compiler_params=cp,
        )(x, w, b2d)
    r_spec = pl.BlockSpec((tm, n), lambda i: (i, 0))
    return pl.pallas_call(
        functools.partial(_matmul_bias_res_kernel, relu=relu),
        out_shape=jax.ShapeDtypeStruct((m, n), ACT_DTYPE),
        grid=grid,
        in_specs=[x_spec, w_spec, b_spec, r_spec],
        out_specs=o_spec,
        compiler_params=cp,
    )(x, w, b2d, residual)


def conv_bn_act(x, w, b, *, stride=1, padding=0, relu=True, residual=None):
    """Conv2d (no bias) with folded BatchNorm (+ optional residual, ReLU).  NHWC.

    x: [B,H,W,Cin]; w: [KH,KW,Cin,Cout] (BN scale folded in); b: [Cout] (BN shift).
    """
    bsz, _, _, cin = x.shape
    kh, kw, _, cout = w.shape
    if padding:
        x = jnp.pad(x, ((0, 0), (padding, padding), (padding, padding), (0, 0)))
    hp, wp = x.shape[1], x.shape[2]
    ho = (hp - kh) // stride + 1
    wo = (wp - kw) // stride + 1
    if kh == 1 and kw == 1:
        xs = x if stride == 1 else x[:, ::stride, ::stride, :]
        patches = xs.reshape(bsz * ho * wo, cin)
        wm = w.reshape(cin, cout)
    else:
        # TODO(synk): im2col patch extraction stays in XLA (shifted strided views);
        # a fully in-kernel shifted-accumulate conv would avoid this copy at scale.
        cols = []
        for ky in range(kh):
            for kx in range(kw):
                cols.append(x[:, ky:ky + (ho - 1) * stride + 1:stride,
                              kx:kx + (wo - 1) * stride + 1:stride, :])
        patches = jnp.concatenate(cols, axis=-1).reshape(bsz * ho * wo, kh * kw * cin)
        wm = w.reshape(kh * kw * cin, cout)
    res = None if residual is None else residual.reshape(bsz * ho * wo, cout)
    y = pallas_matmul_bias(patches, wm, b, relu=relu, residual=res)
    return y.reshape(bsz, ho, wo, cout)


def maxpool2d_3x3_s2_p1(x):
    # TODO(synk): max-pool kept in XLA (lax.reduce_window); no Pallas kernel is worth
    # an extra launch at this size.
    return jax.lax.reduce_window(
        x, jnp.array(-jnp.inf, x.dtype), jax.lax.max,
        window_dimensions=(1, 3, 3, 1), window_strides=(1, 2, 2, 1),
        padding=((0, 0), (1, 1), (1, 1), (0, 0)))


def pallas_head(x, w1, b1, w2p, b2p, num_classes):
    """Fused avgpool + Linear + ReLU + Dropout(id) + Linear; classes padded to 128."""
    bsz, hf, wf, c = x.shape
    s = hf * wf
    xs = x.reshape(bsz, s, c)
    h1 = w1.shape[1]
    np_ = w2p.shape[1]
    out = pl.pallas_call(
        _head_kernel,
        out_shape=jax.ShapeDtypeStruct((bsz, np_), jnp.float32),
        grid=(1,),
        in_specs=[
            pl.BlockSpec((bsz, s, c), lambda i: (0, 0, 0)),
            pl.BlockSpec((c, h1), lambda i: (0, 0)),
            pl.BlockSpec((1, h1), lambda i: (0, 0)),
            pl.BlockSpec((h1, np_), lambda i: (0, 0)),
            pl.BlockSpec((1, np_), lambda i: (0, 0)),
        ],
        out_specs=pl.BlockSpec((bsz, np_), lambda i: (0, 0)),
    )(xs, w1, b1.reshape(1, h1), w2p, b2p.reshape(1, np_))
    return out[:, :num_classes]


# ----------------------------- ResNet definition -----------------------------

class ResNetConfig:
    in_chans = 3
    img = 32
    stem_out = 32                      # scaled from 64
    stage_widths = (16, 32, 64, 128)   # scaled from (64, 128, 256, 512)
    stage_blocks = (1, 2, 1, 1)        # scaled from ResNet-152's (3, 8, 36, 3)
    stage_strides = (1, 2, 2, 2)
    expansion = 4
    head_hidden = 128                  # scaled from 512
    num_classes = 10                   # scaled from 1000
    lanes = 128


def init_params(key, cfg: ResNetConfig):
    keys = iter(jax.random.split(key, 256))

    def _conv_bn(cin, cout, kh, kw):
        # Conv weight + BatchNorm folded with (random) running stats -> inference BN.
        fan_in = cin * kh * kw
        w = jax.random.normal(next(keys), (kh, kw, cin, cout), jnp.float32)
        w = w * (2.0 / fan_in) ** 0.5
        gamma = 1.0 + 0.1 * jax.random.normal(next(keys), (cout,), jnp.float32)
        beta = 0.1 * jax.random.normal(next(keys), (cout,), jnp.float32)
        mean = 0.1 * jax.random.normal(next(keys), (cout,), jnp.float32)
        var = 1.0 + 0.1 * jnp.abs(jax.random.normal(next(keys), (cout,), jnp.float32))
        scale = gamma * jax.lax.rsqrt(var + 1e-5)
        shift = beta - mean * scale
        return (w * scale[None, None, None, :]).astype(ACT_DTYPE), shift.astype(jnp.float32)

    params = {}
    params["stem_w"], params["stem_b"] = _conv_bn(cfg.in_chans, cfg.stem_out, 7, 7)

    stages = []
    in_ch = cfg.stem_out
    for width, blocks, stride in zip(cfg.stage_widths, cfg.stage_blocks, cfg.stage_strides):
        out_ch = width * cfg.expansion
        stage = []
        for bi in range(blocks):
            s = stride if bi == 0 else 1
            blk = {}
            blk["w1"], blk["b1"] = _conv_bn(in_ch, width, 1, 1)
            blk["w2"], blk["b2"] = _conv_bn(width, width, 3, 3)
            blk["w3"], blk["b3"] = _conv_bn(width, out_ch, 1, 1)
            if s != 1 or in_ch != out_ch:
                blk["wd"], blk["bd"] = _conv_bn(in_ch, out_ch, 1, 1)
            stage.append(blk)
            in_ch = out_ch
        stages.append(stage)
    params["stages"] = stages

    c = in_ch
    h1 = cfg.head_hidden
    ncls_pad = max(cfg.lanes, ((cfg.num_classes + cfg.lanes - 1) // cfg.lanes) * cfg.lanes)
    params["fc1_w"] = (jax.random.normal(next(keys), (c, h1), jnp.float32)
                       * (2.0 / c) ** 0.5).astype(ACT_DTYPE)
    params["fc1_b"] = 0.01 * jax.random.normal(next(keys), (h1,), jnp.float32)
    fc2 = jax.random.normal(next(keys), (h1, cfg.num_classes), jnp.float32) * (1.0 / h1) ** 0.5
    params["fc2_w"] = (jnp.zeros((h1, ncls_pad), jnp.float32)
                       .at[:, :cfg.num_classes].set(fc2)).astype(ACT_DTYPE)
    params["fc2_b"] = (jnp.zeros((ncls_pad,), jnp.float32)
                       .at[:cfg.num_classes]
                       .set(0.01 * jax.random.normal(next(keys), (cfg.num_classes,), jnp.float32)))
    return params


def bottleneck(x, blk, stride):
    identity = x
    out = conv_bn_act(x, blk["w1"], blk["b1"], stride=1, padding=0, relu=True)        # 1x1
    out = conv_bn_act(out, blk["w2"], blk["b2"], stride=stride, padding=1, relu=True)  # 3x3
    if "wd" in blk:  # projection shortcut (1x1 conv + BN, no ReLU)
        identity = conv_bn_act(x, blk["wd"], blk["bd"], stride=stride, padding=0, relu=False)
    # conv3 + BN + residual add + ReLU fused into a single Pallas call.
    return conv_bn_act(out, blk["w3"], blk["b3"], stride=1, padding=0, relu=True,
                       residual=identity)


def resnet_forward(x_nchw, params, cfg: ResNetConfig):
    """x: [B, C, H, W] (NCHW like PyTorch) -> logits [B, num_classes]."""
    x = jnp.transpose(x_nchw, (0, 2, 3, 1)).astype(ACT_DTYPE)      # NHWC once at entry
    x = conv_bn_act(x, params["stem_w"], params["stem_b"], stride=2, padding=3, relu=True)
    x = maxpool2d_3x3_s2_p1(x)
    for stage, stride in zip(params["stages"], cfg.stage_strides):
        for bi, blk in enumerate(stage):
            x = bottleneck(x, blk, stride if bi == 0 else 1)
    return pallas_head(x, params["fc1_w"], params["fc1_b"],
                       params["fc2_w"], params["fc2_b"], cfg.num_classes)


# --------------------------------- main ---------------------------------

if __name__ == "__main__":
    cfg = ResNetConfig()
    key = jax.random.PRNGKey(0)
    k_param, k_input = jax.random.split(key)

    params = init_params(k_param, cfg)
    x = jax.random.normal(k_input, (2, cfg.in_chans, cfg.img, cfg.img), dtype=jnp.float32)

    fwd = jax.jit(functools.partial(resnet_forward, cfg=cfg))
    logits = fwd(x, params)
    logits = jax.block_until_ready(logits)

    assert logits.shape == (2, cfg.num_classes)
    assert bool(jnp.all(jnp.isfinite(logits)))
    print("KERNEL_OK")
</pallas_src>

<mosaic_0001>
module attributes {stable_mosaic.version = 11 : i64} {
  func.func @_matmul_bias_kernel(%arg0: i32, %arg1: memref<128x147xbf16, #tpu.memory_space<vmem>>, %arg2: memref<147x32xbf16, #tpu.memory_space<vmem>>, %arg3: memref<1x32xf32, #tpu.memory_space<vmem>>, %arg4: memref<128x32xbf16, #tpu.memory_space<vmem>>) attributes {dimension_semantics = [#tpu.dimension_semantics<parallel>], iteration_bounds = array<i64: 4>, scalar_prefetch = 0 : i64, scratch_operands = 0 : i64, tpu.core_type = #tpu.core_type<tc>, window_params = [{transform_indices = @transform_0, window_bounds = array<i64: 128, 147>}, {pipeline_mode = #tpu.pipeline_mode<synchronous>, transform_indices = @transform_1, window_bounds = array<i64: 147, 32>}, {pipeline_mode = #tpu.pipeline_mode<synchronous>, transform_indices = @transform_2, window_bounds = array<i64: 1, 32>}, {transform_indices = @transform_3, window_bounds = array<i64: 128, 32>}]} {
    %c0 = arith.constant 0 : index
    %c0_0 = arith.constant 0 : index
    %0 = vector.load %arg1[%c0, %c0_0] : memref<128x147xbf16, #tpu.memory_space<vmem>>, vector<128x147xbf16>
    %c0_1 = arith.constant 0 : index
    %c0_2 = arith.constant 0 : index
    %1 = vector.load %arg2[%c0_1, %c0_2] : memref<147x32xbf16, #tpu.memory_space<vmem>>, vector<147x32xbf16>
    %cst = arith.constant dense<0.000000e+00> : vector<128x32xf32>
    %2 = tpu.matmul %0, %1, %cst {dimension_numbers = #tpu.dot_dimension_numbers<[1], [0], [0], [1], [0, 0, 1, 1], [], []>} : vector<128x147xbf16>, vector<147x32xbf16>, vector<128x32xf32> -> vector<128x32xf32>
    %c0_3 = arith.constant 0 : index
    %c0_4 = arith.constant 0 : index
    %3 = vector.load %arg3[%c0_3, %c0_4] : memref<1x32xf32, #tpu.memory_space<vmem>>, vector<1x32xf32>
    %4 = vector.broadcast %3 : vector<1x32xf32> to vector<128x32xf32>
    %5 = arith.addf %2, %4 : vector<128x32xf32>
    %cst_5 = arith.constant 0.000000e+00 : f32
    %6 = vector.broadcast %cst_5 : f32 to vector<128x32xf32>
    %7 = arith.maximumf %5, %6 : vector<128x32xf32>
    %8 = arith.truncf %7 : vector<128x32xf32> to vector<128x32xbf16>
    %c0_6 = arith.constant 0 : index
    %c0_7 = arith.constant 0 : index
    %9 = vector.load %arg4[%c0_6, %c0_7] : memref<128x32xbf16, #tpu.memory_space<vmem>>, vector<128x32xbf16>
    tpu.vector_store %arg4[%c0_6, %c0_7], %8 {strides = array<i32>} : memref<128x32xbf16, #tpu.memory_space<vmem>>, vector<128x32xbf16>,
    return
  }
  func.func @transform_0(%arg0: i32) -> (i32, i32) {
    %c0_i32 = arith.constant 0 : i32
    %c0_i32_0 = arith.constant 0 : i32
    return %arg0, %c0_i32 : i32, i32
  }
  func.func @transform_1(%arg0: i32) -> (i32, i32) {
    %c0_i32 = arith.constant 0 : i32
    %c0_i32_0 = arith.constant 0 : i32
    %c0_i32_1 = arith.constant 0 : i32
    return %c0_i32, %c0_i32_0 : i32, i32
  }
  func.func @transform_2(%arg0: i32) -> (i32, i32) {
    %c0_i32 = arith.constant 0 : i32
    %c0_i32_0 = arith.constant 0 : i32
    %c0_i32_1 = arith.constant 0 : i32
    return %c0_i32, %c0_i32_0 : i32, i32
  }
  func.func @transform_3(%arg0: i32) -> (i32, i32) {
    %c0_i32 = arith.constant 0 : i32
    %c0_i32_0 = arith.constant 0 : i32
    return %arg0, %c0_i32 : i32, i32
  }
}

module attributes {stable_mosaic.version = 11 : i64} {
  func.func @_matmul_bias_kernel(%arg0: i32, %arg1: memref<128x32xbf16, #tpu.memory_space<vmem>>, %arg2: memref<32x16xbf16, #tpu.memory_space<vmem>>, %arg3: memref<1x16xf32, #tpu.memory_space<vmem>>, %arg4: memref<128x16xbf16, #tpu.memory_space<vmem>>) attributes {dimension_semantics = [#tpu.dimension_semantics<parallel>], iteration_bounds = array<i64: 1>, scalar_prefetch = 0 : i64, scratch_operands = 0 : i64, tpu.core_type = #tpu.core_type<tc>, window_params = [{transform_indices = @transform_0, window_bounds = array<i64: 128, 32>}, {pipeline_mode = #tpu.pipeline_mode<synchronous>, transform_indices = @transform_1, window_bounds = array<i64: 32, 16>}, {pipeline_mode = #tpu.pipeline_mode<synchronous>, transform_indices = @transform_2, window_bounds = array<i64: 1, 16>}, {transform_indices = @transform_3, window_bounds = array<i64: 128, 16>}]} {
    %c0 = arith.constant 0 : index
    %c0_0 = arith.constant 0 : index
    %0 = vector.load %arg1[%c0, %c0_0] : memref<128x32xbf16, #tpu.memory_space<vmem>>, vector<128x32xbf16>
    %c0_1 = arith.constant 0 : index
    %c0_2 = arith.constant 0 : index
    %1 = vector.load %arg2[%c0_1, %c0_2] : memref<32x16xbf16, #tpu.memory_space<vmem>>, vector<32x16xbf16>
    %cst = arith.constant dense<0.000000e+00> : vector<128x16xf32>
    %2 = tpu.matmul %0, %1, %cst {dimension_numbers = #tpu.dot_dimension_numbers<[1], [0], [0], [1], [0, 0, 1, 1], [], []>} : vector<128x32xbf16>, vector<32x16xbf16>, vector<128x16xf32> -> vector<128x16xf32>
    %c0_3 = arith.constant 0 : index
    %c0_4 = arith.constant 0 : index
    %3 = vector.load %arg3[%c0_3, %c0_4] : memref<1x16xf32, #tpu.memory_space<vmem>>, vector<1x16xf32>
    %4 = vector.broadcast %3 : vector<1x16xf32> to vector<128x16xf32>
    %5 = arith.addf %2, %4 : vector<128x16xf32>
    %cst_5 = arith.constant 0.000000e+00 : f32
    %6 = vector.broadcast %cst_5 : f32 to vector<128x16xf32>
    %7 = arith.maximumf %5, %6 : vector<128x16xf32>
    %8 = arith.truncf %7 : vector<128x16xf32> to vector<128x16xbf16>
    %c0_6 = arith.constant 0 : index
    %c0_7 = arith.constant 0 : index
    %9 = vector.load %arg4[%c0_6, %c0_7] : memref<128x16xbf16, #tpu.memory_space<vmem>>, vector<128x16xbf16>
    tpu.vector_store %arg4[%c0_6, %c0_7], %8 {strides = array<i32>} : memref<128x16xbf16, #tpu.memory_space<vmem>>, vector<128x16xbf16>,
    return
  }
  func.func @transform_0(%arg0: i32) -> (i32, i32) {
    %c0_i32 = arith.constant 0 : i32
    %c0_i32_0 = arith.constant 0 : i32
    return %arg0, %c0_i32 : i32, i32
  }
  func.func @transform_1(%arg0: i32) -> (i32, i32) {
    %c0_i32 = arith.constant 0 : i32
    %c0_i32_0 = arith.constant 0 : i32
    %c0_i32_1 = arith.constant 0 : i32
    return %c0_i32, %c0_i32_0 : i32, i32
  }
  func.func @transform_2(%arg0: i32) -> (i32, i32) {
    %c0_i32 = arith.constant 0 : i32
    %c0_i32_0 = arith.constant 0 : i32
    %c0_i32_1 = arith.constant 0 : i32
    return %c0_i32, %c0_i32_0 : i32, i32
  }
  func.func @transform_3(%arg0: i32) -> (i32, i32) {
    %c0_i32 = arith.constant 0 : i32
    %c0_i32_0 = arith.constant 0 : i32
    return %arg0, %c0_i32 : i32, i32
  }
}

module attributes {stable_mosaic.version = 11 : i64} {
  func.func @_matmul_bias_kernel(%arg0: i32, %arg1: memref<128x144xbf16, #tpu.memory_space<vmem>>, %arg2: memref<144x16xbf16, #tpu.memory_space<vmem>>, %arg3: memref<1x16xf32, #tpu.memory_space<vmem>>, %arg4: memref<128x16xbf16, #tpu.memory_space<vmem>>) attributes {dimension_semantics = [#tpu.dimension_semantics<parallel>], iteration_bounds = array<i64: 1>, scalar_prefetch = 0 : i64, scratch_operands = 0 : i64, tpu.core_type = #tpu.core_type<tc>, window_params = [{transform_indices = @transform_0, window_bounds = array<i64: 128, 144>}, {pipeline_mode = #tpu.pipeline_mode<synchronous>, transform_indices = @transform_1, window_bounds = array<i64: 144, 16>}, {pipeline_mode = #tpu.pipeline_mode<synchronous>, transform_indices = @transform_2, window_bounds = array<i64: 1, 16>}, {transform_indices = @transform_3, window_bounds = array<i64: 128, 16>}]} {
    %c0 = arith.constant 0 : index
    %c0_0 = arith.constant 0 : index
    %0 = vector.load %arg1[%c0, %c0_0] : memref<128x144xbf16, #tpu.memory_space<vmem>>, vector<128x144xbf16>
    %c0_1 = arith.constant 0 : index
    %c0_2 = arith.constant 0 : index
    %1 = vector.load %arg2[%c0_1, %c0_2] : memref<144x16xbf16, #tpu.memory_space<vmem>>, vector<144x16xbf16>
    %cst = arith.constant dense<0.000000e+00> : vector<128x16xf32>
    %2 = tpu.matmul %0, %1, %cst {dimension_numbers = #tpu.dot_dimension_numbers<[1], [0], [0], [1], [0, 0, 1, 1], [], []>} : vector<128x144xbf16>, vector<144x16xbf16>, vector<128x16xf32> -> vector<128x16xf32>
    %c0_3 = arith.constant 0 : index
    %c0_4 = arith.constant 0 : index
    %3 = vector.load %arg3[%c0_3, %c0_4] : memref<1x16xf32, #tpu.memory_space<vmem>>, vector<1x16xf32>
    %4 = vector.broadcast %3 : vector<1x16xf32> to vector<128x16xf32>
    %5 = arith.addf %2, %4 : vector<128x16xf32>
    %cst_5 = arith.constant 0.000000e+00 : f32
    %6 = vector.broadcast %cst_5 : f32 to vector<128x16xf32>
    %7 = arith.maximumf %5, %6 : vector<128x16xf32>
    %8 = arith.truncf %7 : vector<128x16xf32> to vector<128x16xbf16>
    %c0_6 = arith.constant 0 : index
    %c0_7 = arith.constant 0 : index
    %9 = vector.load %arg4[%c0_6, %c0_7] : memref<128x16xbf16, #tpu.memory_space<vmem>>, vector<128x16xbf16>
    tpu.vector_store %arg4[%c0_6, %c0_7], %8 {strides = array<i32>} : memref<128x16xbf16, #tpu.memory_space<vmem>>, vector<128x16xbf16>,
    return
  }
  func.func @transform_0(%arg0: i32) -> (i32, i32) {
    %c0_i32 = arith.constant 0 : i32
    %c0_i32_0 = arith.constant 0 : i32
    return %arg0, %c0_i32 : i32, i32
  }
  func.func @transform_1(%arg0: i32) -> (i32, i32) {
    %c0_i32 = arith.constant 0 : i32
    %c0_i32_0 = arith.constant 0 : i32
    %c0_i32_1 = arith.constant 0 : i32
    return %c0_i32, %c0_i32_0 : i32, i32
  }
  func.func @transform_2(%arg0: i32) -> (i32, i32) {
    %c0_i32 = arith.constant 0 : i32
    %c0_i32_0 = arith.constant 0 : i32
    %c0_i32_1 = arith.constant 0 : i32
    return %c0_i32, %c0_i32_0 : i32, i32
  }
  func.func @transform_3(%arg0: i32) -> (i32, i32) {
    %c0_i32 = arith.constant 0 : i32
    %c0_i32_0 = arith.constant 0 : i32
    return %arg0, %c0_i32 : i32, i32
  }
}

module attributes {stable_mosaic.version = 11 : i64} {
  func.func @_matmul_bias_kernel(%arg0: i32, %arg1: memref<128x32xbf16, #tpu.memory_space<vmem>>, %arg2: memref<32x64xbf16, #tpu.memory_space<vmem>>, %arg3: memref<1x64xf32, #tpu.memory_space<vmem>>, %arg4: memref<128x64xbf16, #tpu.memory_space<vmem>>) attributes {dimension_semantics = [#tpu.dimension_semantics<parallel>], iteration_bounds = array<i64: 1>, scalar_prefetch = 0 : i64, scratch_operands = 0 : i64, tpu.core_type = #tpu.core_type<tc>, window_params = [{transform_indices = @transform_0, window_bounds = array<i64: 128, 32>}, {pipeline_mode = #tpu.pipeline_mode<synchronous>, transform_indices = @transform_1, window_bounds = array<i64: 32, 64>}, {pipeline_mode = #tpu.pipeline_mode<synchronous>, transform_indices = @transform_2, window_bounds = array<i64: 1, 64>}, {transform_indices = @transform_3, window_bounds = array<i64: 128, 64>}]} {
    %c0 = arith.constant 0 : index
    %c0_0 = arith.constant 0 : index
    %0 = vector.load %arg1[%c0, %c0_0] : memref<128x32xbf16, #tpu.memory_space<vmem>>, vector<128x32xbf16>
    %c0_1 = arith.constant 0 : index
    %c0_2 = arith.constant 0 : index
    %1 = vector.load %arg2[%c0_1, %c0_2] : memref<32x64xbf16, #tpu.memory_space<vmem>>, vector<32x64xbf16>
    %cst = arith.constant dense<0.000000e+00> : vector<128x64xf32>
    %2 = tpu.matmul %0, %1, %cst {dimension_numbers = #tpu.dot_dimension_numbers<[1], [0], [0], [1], [0, 0, 1, 1], [], []>} : vector<128x32xbf16>, vector<32x64xbf16>, vector<128x64xf32> -> vector<128x64xf32>
    %c0_3 = arith.constant 0 : index
    %c0_4 = arith.constant 0 : index
    %3 = vector.load %arg3[%c0_3, %c0_4] : memref<1x64xf32, #tpu.memory_space<vmem>>, vector<1x64xf32>
    %4 = vector.broadcast %3 : vector<1x64xf32> to vector<128x64xf32>
    %5 = arith.addf %2, %4 : vector<128x64xf32>
    %6 = arith.truncf %5 : vector<128x64xf32> to vector<128x64xbf16>
    %c0_5 = arith.constant 0 : index
    %c0_6 = arith.constant 0 : index
    %7 = vector.load %arg4[%c0_5, %c0_6] : memref<128x64xbf16, #tpu.memory_space<vmem>>, vector<128x64xbf16>
    tpu.vector_store %arg4[%c0_5, %c0_6], %6 {strides = array<i32>} : memref<128x64xbf16, #tpu.memory_space<vmem>>, vector<128x64xbf16>,
    return
  }
  func.func @transform_0(%arg0: i32) -> (i32, i32) {
    %c0_i32 = arith.constant 0 : i32
    %c0_i32_0 = arith.constant 0 : i32
    return %arg0, %c0_i32 : i32, i32
  }
  func.func @transform_1(%arg0: i32) -> (i32, i32) {
    %c0_i32 = arith.constant 0 : i32
    %c0_i32_0 = arith.constant 0 : i32
    %c0_i32_1 = arith.constant 0 : i32
    return %c0_i32, %c0_i32_0 : i32, i32
  }
  func.func @transform_2(%arg0: i32) -> (i32, i32) {
    %c0_i32 = arith.constant 0 : i32
    %c0_i32_0 = arith.constant 0 : i32
    %c0_i32_1 = arith.constant 0 : i32
    return %c0_i32, %c0_i32_0 : i32, i32
  }
  func.func @transform_3(%arg0: i32) -> (i32, i32) {
    %c0_i32 = arith.constant 0 : i32
    %c0_i32_0 = arith.constant 0 : i32
    return %arg0, %c0_i32 : i32, i32
  }
}

module attributes {stable_mosaic.version = 11 : i64} {
  func.func @_matmul_bias_res_kernel(%arg0: i32, %arg1: memref<128x16xbf16, #tpu.memory_space<vmem>>, %arg2: memref<16x64xbf16, #tpu.memory_space<vmem>>, %arg3: memref<1x64xf32, #tpu.memory_space<vmem>>, %arg4: memref<128x64xbf16, #tpu.memory_space<vmem>>, %arg5: memref<128x64xbf16, #tpu.memory_space<vmem>>) attributes {dimension_semantics = [#tpu.dimension_semantics<parallel>], iteration_bounds = array<i64: 1>, scalar_prefetch = 0 : i64, scratch_operands = 0 : i64, tpu.core_type = #tpu.core_type<tc>, window_params = [{transform_indices = @transform_0, window_bounds = array<i64: 128, 16>}, {pipeline_mode = #tpu.pipeline_mode<synchronous>, transform_indices = @transform_1, window_bounds = array<i64: 16, 64>}, {pipeline_mode = #tpu.pipeline_mode<synchronous>, transform_indices = @transform_2, window_bounds = array<i64: 1, 64>}, {transform_indices = @transform_3, window_bounds = array<i64: 128, 64>}, {transform_indices = @transform_4, window_bounds = array<i64: 128, 64>}]} {
    %c0 = arith.constant 0 : index
    %c0_0 = arith.constant 0 : index
    %0 = vector.load %arg1[%c0, %c0_0] : memref<128x16xbf16, #tpu.memory_space<vmem>>, vector<128x16xbf16>
    %c0_1 = arith.constant 0 : index
    %c0_2 = arith.constant 0 : index
    %1 = vector.load %arg2[%c0_1, %c0_2] : memref<16x64xbf16, #tpu.memory_space<vmem>>, vector<16x64xbf16>
    %cst = arith.constant dense<0.000000e+00> : vector<128x64xf32>
    %2 = tpu.matmul %0, %1, %cst {dimension_numbers = #tpu.dot_dimension_numbers<[1], [0], [0], [1], [0, 0, 1, 1], [], []>} : vector<128x16xbf16>, vector<16x64xbf16>, vector<128x64xf32> -> vector<128x64xf32>
    %c0_3 = arith.constant 0 : index
    %c0_4 = arith.constant 0 : index
    %3 = vector.load %arg3[%c0_3, %c0_4] : memref<1x64xf32, #tpu.memory_space<vmem>>, vector<1x64xf32>
    %4 = vector.broadcast %3 : vector<1x64xf32> to vector<128x64xf32>
    %5 = arith.addf %2, %4 : vector<128x64xf32>
    %c0_5 = arith.constant 0 : index
    %c0_6 = arith.constant 0 : index
    %6 = vector.load %arg4[%c0_5, %c0_6] : memref<128x64xbf16, #tpu.memory_space<vmem>>, vector<128x64xbf16>
    %7 = arith.extf %6 : vector<128x64xbf16> to vector<128x64xf32>
    %8 = arith.addf %5, %7 : vector<128x64xf32>
    %cst_7 = arith.constant 0.000000e+00 : f32
    %9 = vector.broadcast %cst_7 : f32 to vector<128x64xf32>
    %10 = arith.maximumf %8, %9 : vector<128x64xf32>
    %11 = arith.truncf %10 : vector<128x64xf32> to vector<128x64xbf16>
    %c0_8 = arith.constant 0 : index
    %c0_9 = arith.constant 0 : index
    %12 = vector.load %arg5[%c0_8, %c0_9] : memref<128x64xbf16, #tpu.memory_space<vmem>>, vector<128x64xbf16>
    tpu.vector_store %arg5[%c0_8, %c0_9], %11 {strides = array<i32>} : memref<128x64xbf16, #tpu.memory_space<vmem>>, vector<128x64xbf16>,
    return
  }
  func.func @transform_0(%arg0: i32) -> (i32, i32) {
    %c0_i32 = arith.constant 0 : i32
    %c0_i32_0 = arith.constant 0 : i32
    return %arg0, %c0_i32 : i32, i32
  }
  func.func @transform_1(%arg0: i32) -> (i32, i32) {
    %c0_i32 = arith.constant 0 : i32
    %c0_i32_0 = arith.constant 0 : i32
    %c0_i32_1 = arith.constant 0 : i32
    return %c0_i32, %c0_i32_0 : i32, i32
  }
  func.func @transform_2(%arg0: i32) -> (i32, i32) {
    %c0_i32 = arith.constant 0 : i32
    %c0_i32_0 = arith.constant 0 : i32
    %c0_i32_1 = arith.constant 0 : i32
    return %c0_i32, %c0_i32_0 : i32, i32
  }
  func.func @transform_3(%arg0: i32) -> (i32, i32) {
    %c0_i32 = arith.constant 0 : i32
    %c0_i32_0 = arith.constant 0 : i32
    return %arg0, %c0_i32 : i32, i32
  }
  func.func @transform_4(%arg0: i32) -> (i32, i32) {
    %c0_i32 = arith.constant 0 : i32
    %c0_i32_0 = arith.constant 0 : i32
    return %arg0, %c0_i32 : i32, i32
  }
}

module attributes {stable_mosaic.version = 11 : i64} {
  func.func @_matmul_bias_kernel(%arg0: i32, %arg1: memref<128x64xbf16, #tpu.memory_space<vmem>>, %arg2: memref<64x32xbf16, #tpu.memory_space<vmem>>, %arg3: memref<1x32xf32, #tpu.memory_space<vmem>>, %arg4: memref<128x32xbf16, #tpu.memory_space<vmem>>) attributes {dimension_semantics = [#tpu.dimension_semantics<parallel>], iteration_bounds = array<i64: 1>, scalar_prefetch = 0 : i64, scratch_operands = 0 : i64, tpu.core_type = #tpu.core_type<tc>, window_params = [{transform_indices = @transform_0, window_bounds = array<i64: 128, 64>}, {pipeline_mode = #tpu.pipeline_mode<synchronous>, transform_indices = @transform_1, window_bounds = array<i64: 64, 32>}, {pipeline_mode = #tpu.pipeline_mode<synchronous>, transform_indices = @transform_2, window_bounds = array<i64: 1, 32>}, {transform_indices = @transform_3, window_bounds = array<i64: 128, 32>}]} {
    %c0 = arith.constant 0 : index
    %c0_0 = arith.constant 0 : index
    %0 = vector.load %arg1[%c0, %c0_0] : memref<128x64xbf16, #tpu.memory_space<vmem>>, vector<128x64xbf16>
    %c0_1 = arith.constant 0 : index
    %c0_2 = arith.constant 0 : index
    %1 = vector.load %arg2[%c0_1, %c0_2] : memref<64x32xbf16, #tpu.memory_space<vmem>>, vector<64x32xbf16>
    %cst = arith.constant dense<0.000000e+00> : vector<128x32xf32>
    %2 = tpu.matmul %0, %1, %cst {dimension_numbers = #tpu.dot_dimension_numbers<[1], [0], [0], [1], [0, 0, 1, 1], [], []>} : vector<128x64xbf16>, vector<64x32xbf16>, vector<128x32xf32> -> vector<128x32xf32>
    %c0_3 = arith.constant 0 : index
    %c0_4 = arith.constant 0 : index
    %3 = vector.load %arg3[%c0_3, %c0_4] : memref<1x32xf32, #tpu.memory_space<vmem>>, vector<1x32xf32>
    %4 = vector.broadcast %3 : vector<1x32xf32> to vector<128x32xf32>
    %5 = arith.addf %2, %4 : vector<128x32xf32>
    %cst_5 = arith.constant 0.000000e+00 : f32
    %6 = vector.broadcast %cst_5 : f32 to vector<128x32xf32>
    %7 = arith.maximumf %5, %6 : vector<128x32xf32>
    %8 = arith.truncf %7 : vector<128x32xf32> to vector<128x32xbf16>
    %c0_6 = arith.constant 0 : index
    %c0_7 = arith.constant 0 : index
    %9 = vector.load %arg4[%c0_6, %c0_7] : memref<128x32xbf16, #tpu.memory_space<vmem>>, vector<128x32xbf16>
    tpu.vector_store %arg4[%c0_6, %c0_7], %8 {strides = array<i32>} : memref<128x32xbf16, #tpu.memory_space<vmem>>, vector<128x32xbf16>,
    return
  }
  func.func @transform_0(%arg0: i32) -> (i32, i32) {
    %c0_i32 = arith.constant 0 : i32
    %c0_i32_0 = arith.constant 0 : i32
    return %arg0, %c0_i32 : i32, i32
  }
  func.func @transform_1(%arg0: i32) -> (i32, i32) {
    %c0_i32 = arith.constant 0 : i32
    %c0_i32_0 = arith.constant 0 : i32
    %c0_i32_1 = arith.constant 0 : i32
    return %c0_i32, %c0_i32_0 : i32, i32
  }
  func.func @transform_2(%arg0: i32) -> (i32, i32) {
    %c0_i32 = arith.constant 0 : i32
    %c0_i32_0 = arith.constant 0 : i32
    %c0_i32_1 = arith.constant 0 : i32
    return %c0_i32, %c0_i32_0 : i32, i32
  }
  func.func @transform_3(%arg0: i32) -> (i32, i32) {
    %c0_i32 = arith.constant 0 : i32
    %c0_i32_0 = arith.constant 0 : i32
    return %arg0, %c0_i32 : i32, i32
  }
}

module attributes {stable_mosaic.version = 11 : i64} {
  func.func @_matmul_bias_res_kernel(%arg0: i32, %arg1: memref<32x32xbf16, #tpu.memory_space<vmem>>, %arg2: memref<32x128xbf16, #tpu.memory_space<vmem>>, %arg3: memref<1x128xf32, #tpu.memory_space<vmem>>, %arg4: memref<32x128xbf16, #tpu.memory_space<vmem>>, %arg5: memref<32x128xbf16, #tpu.memory_space<vmem>>) attributes {dimension_semantics = [#tpu.dimension_semantics<parallel>], iteration_bounds = array<i64: 1>, scalar_prefetch = 0 : i64, scratch_operands = 0 : i64, tpu.core_type = #tpu.core_type<tc>, window_params = [{transform_indices = @transform_0, window_bounds = array<i64: 32, 32>}, {pipeline_mode = #tpu.pipeline_mode<synchronous>, transform_indices = @transform_1, window_bounds = array<i64: 32, 128>}, {pipeline_mode = #tpu.pipeline_mode<synchronous>, transform_indices = @transform_2, window_bounds = array<i64: 1, 128>}, {transform_indices = @transform_3, window_bounds = array<i64: 32, 128>}, {transform_indices = @transform_4, window_bounds = array<i64: 32, 128>}]} {
    %c0 = arith.constant 0 : index
    %c0_0 = arith.constant 0 : index
    %0 = vector.load %arg1[%c0, %c0_0] : memref<32x32xbf16, #tpu.memory_space<vmem>>, vector<32x32xbf16>
    %c0_1 = arith.constant 0 : index
    %c0_2 = arith.constant 0 : index
    %1 = vector.load %arg2[%c0_1, %c0_2] : memref<32x128xbf16, #tpu.memory_space<vmem>>, vector<32x128xbf16>
    %cst = arith.constant dense<0.000000e+00> : vector<32x128xf32>
    %2 = tpu.matmul %0, %1, %cst {dimension_numbers = #tpu.dot_dimension_numbers<[1], [0], [0], [1], [0, 0, 1, 1], [], []>} : vector<32x32xbf16>, vector<32x128xbf16>, vector<32x128xf32> -> vector<32x128xf32>
    %c0_3 = arith.constant 0 : index
    %c0_4 = arith.constant 0 : index
    %3 = vector.load %arg3[%c0_3, %c0_4] : memref<1x128xf32, #tpu.memory_space<vmem>>, vector<1x128xf32>
    %4 = vector.broadcast %3 : vector<1x128xf32> to vector<32x128xf32>
    %5 = arith.addf %2, %4 : vector<32x128xf32>
    %c0_5 = arith.constant 0 : index
    %c0_6 = arith.constant 0 : index
    %6 = vector.load %arg4[%c0_5, %c0_6] : memref<32x128xbf16, #tpu.memory_space<vmem>>, vector<32x128xbf16>
    %7 = arith.extf %6 : vector<32x128xbf16> to vector<32x128xf32>
    %8 = arith.addf %5, %7 : vector<32x128xf32>
    %cst_7 = arith.constant 0.000000e+00 : f32
    %9 = vector.broadcast %cst_7 : f32 to vector<32x128xf32>
    %10 = arith.maximumf %8, %9 : vector<32x128xf32>
    %11 = arith.truncf %10 : vector<32x128xf32> to vector<32x128xbf16>
    %c0_8 = arith.constant 0 : index
    %c0_9 = arith.constant 0 : index
    %12 = vector.load %arg5[%c0_8, %c0_9] : memref<32x128xbf16, #tpu.memory_space<vmem>>, vector<32x128xbf16>
    tpu.vector_store %arg5[%c0_8, %c0_9], %11 {strides = array<i32>} : memref<32x128xbf16, #tpu.memory_space<vmem>>, vector<32x128xbf16>,
    return
  }
  func.func @transform_0(%arg0: i32) -> (i32, i32) {
    %c0_i32 = arith.constant 0 : i32
    %c0_i32_0 = arith.constant 0 : i32
    return %arg0, %c0_i32 : i32, i32
  }
  func.func @transform_1(%arg0: i32) -> (i32, i32) {
    %c0_i32 = arith.constant 0 : i32
    %c0_i32_0 = arith.constant 0 : i32
    %c0_i32_1 = arith.constant 0 : i32
    return %c0_i32, %c0_i32_0 : i32, i32
  }
  func.func @transform_2(%arg0: i32) -> (i32, i32) {
    %c0_i32 = arith.constant 0 : i32
    %c0_i32_0 = arith.constant 0 : i32
    %c0_i32_1 = arith.constant 0 : i32
    return %c0_i32, %c0_i32_0 : i32, i32
  }
  func.func @transform_3(%arg0: i32) -> (i32, i32) {
    %c0_i32 = arith.constant 0 : i32
    %c0_i32_0 = arith.constant 0 : i32
    return %arg0, %c0_i32 : i32, i32
  }
  func.func @transform_4(%arg0: i32) -> (i32, i32) {
    %c0_i32 = arith.constant 0 : i32
    %c0_i32_0 = arith.constant 0 : i32
    return %arg0, %c0_i32 : i32, i32
  }
}

module attributes {stable_mosaic.version = 11 : i64} {
  func.func @_matmul_bias_kernel(%arg0: i32, %arg1: memref<32x288xbf16, #tpu.memory_space<vmem>>, %arg2: memref<288x32xbf16, #tpu.memory_space<vmem>>, %arg3: memref<1x32xf32, #tpu.memory_space<vmem>>, %arg4: memref<32x32xbf16, #tpu.memory_space<vmem>>) attributes {dimension_semantics = [#tpu.dimension_semantics<parallel>], iteration_bounds = array<i64: 1>, scalar_prefetch = 0 : i64, scratch_operands = 0 : i64, tpu.core_type = #tpu.core_type<tc>, window_params = [{transform_indices = @transform_0, window_bounds = array<i64: 32, 288>}, {pipeline_mode = #tpu.pipeline_mode<synchronous>, transform_indices = @transform_1, window_bounds = array<i64: 288, 32>}, {pipeline_mode = #tpu.pipeline_mode<synchronous>, transform_indices = @transform_2, window_bounds = array<i64: 1, 32>}, {transform_indices = @transform_3, window_bounds = array<i64: 32, 32>}]} {
    %c0 = arith.constant 0 : index
    %c0_0 = arith.constant 0 : index
    %0 = vector.load %arg1[%c0, %c0_0] : memref<32x288xbf16, #tpu.memory_space<vmem>>, vector<32x288xbf16>
    %c0_1 = arith.constant 0 : index
    %c0_2 = arith.constant 0 : index
    %1 = vector.load %arg2[%c0_1, %c0_2] : memref<288x32xbf16, #tpu.memory_space<vmem>>, vector<288x32xbf16>
    %cst = arith.constant dense<0.000000e+00> : vector<32x32xf32>
    %2 = tpu.matmul %0, %1, %cst {dimension_numbers = #tpu.dot_dimension_numbers<[1], [0], [0], [1], [0, 0, 1, 1], [], []>} : vector<32x288xbf16>, vector<288x32xbf16>, vector<32x32xf32> -> vector<32x32xf32>
    %c0_3 = arith.constant 0 : index
    %c0_4 = arith.constant 0 : index
    %3 = vector.load %arg3[%c0_3, %c0_4] : memref<1x32xf32, #tpu.memory_space<vmem>>, vector<1x32xf32>
    %4 = vector.broadcast %3 : vector<1x32xf32> to vector<32x32xf32>
    %5 = arith.addf %2, %4 : vector<32x32xf32>
    %cst_5 = arith.constant 0.000000e+00 : f32
    %6 = vector.broadcast %cst_5 : f32 to vector<32x32xf32>
    %7 = arith.maximumf %5, %6 : vector<32x32xf32>
    %8 = arith.truncf %7 : vector<32x32xf32> to vector<32x32xbf16>
    %c0_6 = arith.constant 0 : index
    %c0_7 = arith.constant 0 : index
    %9 = vector.load %arg4[%c0_6, %c0_7] : memref<32x32xbf16, #tpu.memory_space<vmem>>, vector<32x32xbf16>
    tpu.vector_store %arg4[%c0_6, %c0_7], %8 {strides = array<i32>} : memref<32x32xbf16, #tpu.memory_space<vmem>>, vector<32x32xbf16>,
    return
  }
  func.func @transform_0(%arg0: i32) -> (i32, i32) {
    %c0_i32 = arith.constant 0 : i32
    %c0_i32_0 = arith.constant 0 : i32
    return %arg0, %c0_i32 : i32, i32
  }
  func.func @transform_1(%arg0: i32) -> (i32, i32) {
    %c0_i32 = arith.constant 0 : i32
    %c0_i32_0 = arith.constant 0 : i32
    %c0_i32_1 = arith.constant 0 : i32
    return %c0_i32, %c0_i32_0 : i32, i32
  }
  func.func @transform_2(%arg0: i32) -> (i32, i32) {
    %c0_i32 = arith.constant 0 : i32
    %c0_i32_0 = arith.constant 0 : i32
    %c0_i32_1 = arith.constant 0 : i32
    return %c0_i32, %c0_i32_0 : i32, i32
  }
  func.func @transform_3(%arg0: i32) -> (i32, i32) {
    %c0_i32 = arith.constant 0 : i32
    %c0_i32_0 = arith.constant 0 : i32
    return %arg0, %c0_i32 : i32, i32
  }
}

module attributes {stable_mosaic.version = 11 : i64} {
  func.func @_matmul_bias_kernel(%arg0: i32, %arg1: memref<32x64xbf16, #tpu.memory_space<vmem>>, %arg2: memref<64x128xbf16, #tpu.memory_space<vmem>>, %arg3: memref<1x128xf32, #tpu.memory_space<vmem>>, %arg4: memref<32x128xbf16, #tpu.memory_space<vmem>>) attributes {dimension_semantics = [#tpu.dimension_semantics<parallel>], iteration_bounds = array<i64: 1>, scalar_prefetch = 0 : i64, scratch_operands = 0 : i64, tpu.core_type = #tpu.core_type<tc>, window_params = [{transform_indices = @transform_0, window_bounds = array<i64: 32, 64>}, {pipeline_mode = #tpu.pipeline_mode<synchronous>, transform_indices = @transform_1, window_bounds = array<i64: 64, 128>}, {pipeline_mode = #tpu.pipeline_mode<synchronous>, transform_indices = @transform_2, window_bounds = array<i64: 1, 128>}, {transform_indices = @transform_3, window_bounds = array<i64: 32, 128>}]} {
    %c0 = arith.constant 0 : index
    %c0_0 = arith.constant 0 : index
    %0 = vector.load %arg1[%c0, %c0_0] : memref<32x64xbf16, #tpu.memory_space<vmem>>, vector<32x64xbf16>
    %c0_1 = arith.constant 0 : index
    %c0_2 = arith.constant 0 : index
    %1 = vector.load %arg2[%c0_1, %c0_2] : memref<64x128xbf16, #tpu.memory_space<vmem>>, vector<64x128xbf16>
    %cst = arith.constant dense<0.000000e+00> : vector<32x128xf32>
    %2 = tpu.matmul %0, %1, %cst {dimension_numbers = #tpu.dot_dimension_numbers<[1], [0], [0], [1], [0, 0, 1, 1], [], []>} : vector<32x64xbf16>, vector<64x128xbf16>, vector<32x128xf32> -> vector<32x128xf32>
    %c0_3 = arith.constant 0 : index
    %c0_4 = arith.constant 0 : index
    %3 = vector.load %arg3[%c0_3, %c0_4] : memref<1x128xf32, #tpu.memory_space<vmem>>, vector<1x128xf32>
    %4 = vector.broadcast %3 : vector<1x128xf32> to vector<32x128xf32>
    %5 = arith.addf %2, %4 : vector<32x128xf32>
    %6 = arith.truncf %5 : vector<32x128xf32> to vector<32x128xbf16>
    %c0_5 = arith.constant 0 : index
    %c0_6 = arith.constant 0 : index
    %7 = vector.load %arg4[%c0_5, %c0_6] : memref<32x128xbf16, #tpu.memory_space<vmem>>, vector<32x128xbf16>
    tpu.vector_store %arg4[%c0_5, %c0_6], %6 {strides = array<i32>} : memref<32x128xbf16, #tpu.memory_space<vmem>>, vector<32x128xbf16>,
    return
  }
  func.func @transform_0(%arg0: i32) -> (i32, i32) {
    %c0_i32 = arith.constant 0 : i32
    %c0_i32_0 = arith.constant 0 : i32
    return %arg0, %c0_i32 : i32, i32
  }
  func.func @transform_1(%arg0: i32) -> (i32, i32) {
    %c0_i32 = arith.constant 0 : i32
    %c0_i32_0 = arith.constant 0 : i32
    %c0_i32_1 = arith.constant 0 : i32
    return %c0_i32, %c0_i32_0 : i32, i32
  }
  func.func @transform_2(%arg0: i32) -> (i32, i32) {
    %c0_i32 = arith.constant 0 : i32
    %c0_i32_0 = arith.constant 0 : i32
    %c0_i32_1 = arith.constant 0 : i32
    return %c0_i32, %c0_i32_0 : i32, i32
  }
  func.func @transform_3(%arg0: i32) -> (i32, i32) {
    %c0_i32 = arith.constant 0 : i32
    %c0_i32_0 = arith.constant 0 : i32
    return %arg0, %c0_i32 : i32, i32
  }
}

module attributes {stable_mosaic.version = 11 : i64} {
  func.func @_matmul_bias_kernel(%arg0: i32, %arg1: memref<32x128xbf16, #tpu.memory_space<vmem>>, %arg2: memref<128x32xbf16, #tpu.memory_space<vmem>>, %arg3: memref<1x32xf32, #tpu.memory_space<vmem>>, %arg4: memref<32x32xbf16, #tpu.memory_space<vmem>>) attributes {dimension_semantics = [#tpu.dimension_semantics<parallel>], iteration_bounds = array<i64: 1>, scalar_prefetch = 0 : i64, scratch_operands = 0 : i64, tpu.core_type = #tpu.core_type<tc>, window_params = [{transform_indices = @transform_0, window_bounds = array<i64: 32, 128>}, {pipeline_mode = #tpu.pipeline_mode<synchronous>, transform_indices = @transform_1, window_bounds = array<i64: 128, 32>}, {pipeline_mode = #tpu.pipeline_mode<synchronous>, transform_indices = @transform_2, window_bounds = array<i64: 1, 32>}, {transform_indices = @transform_3, window_bounds = array<i64: 32, 32>}]} {
    %c0 = arith.constant 0 : index
    %c0_0 = arith.constant 0 : index
    %0 = vector.load %arg1[%c0, %c0_0] : memref<32x128xbf16, #tpu.memory_space<vmem>>, vector<32x128xbf16>
    %c0_1 = arith.constant 0 : index
    %c0_2 = arith.constant 0 : index
    %1 = vector.load %arg2[%c0_1, %c0_2] : memref<128x32xbf16, #tpu.memory_space<vmem>>, vector<128x32xbf16>
    %cst = arith.constant dense<0.000000e+00> : vector<32x32xf32>
    %2 = tpu.matmul %0, %1, %cst {dimension_numbers = #tpu.dot_dimension_numbers<[1], [0], [0], [1], [0, 0, 1, 1], [], []>} : vector<32x128xbf16>, vector<128x32xbf16>, vector<32x32xf32> -> vector<32x32xf32>
    %c0_3 = arith.constant 0 : index
    %c0_4 = arith.constant 0 : index
    %3 = vector.load %arg3[%c0_3, %c0_4] : memref<1x32xf32, #tpu.memory_space<vmem>>, vector<1x32xf32>
    %4 = vector.broadcast %3 : vector<1x32xf32> to vector<32x32xf32>
    %5 = arith.addf %2, %4 : vector<32x32xf32>
    %cst_5 = arith.constant 0.000000e+00 : f32
    %6 = vector.broadcast %cst_5 : f32 to vector<32x32xf32>
    %7 = arith.maximumf %5, %6 : vector<32x32xf32>
    %8 = arith.truncf %7 : vector<32x32xf32> to vector<32x32xbf16>
    %c0_6 = arith.constant 0 : index
    %c0_7 = arith.constant 0 : index
    %9 = vector.load %arg4[%c0_6, %c0_7] : memref<32x32xbf16, #tpu.memory_space<vmem>>, vector<32x32xbf16>
    tpu.vector_store %arg4[%c0_6, %c0_7], %8 {strides = array<i32>} : memref<32x32xbf16, #tpu.memory_space<vmem>>, vector<32x32xbf16>,
    return
  }
  func.func @transform_0(%arg0: i32) -> (i32, i32) {
    %c0_i32 = arith.constant 0 : i32
    %c0_i32_0 = arith.constant 0 : i32
    return %arg0, %c0_i32 : i32, i32
  }
  func.func @transform_1(%arg0: i32) -> (i32, i32) {
    %c0_i32 = arith.constant 0 : i32
    %c0_i32_0 = arith.constant 0 : i32
    %c0_i32_1 = arith.constant 0 : i32
    return %c0_i32, %c0_i32_0 : i32, i32
  }
  func.func @transform_2(%arg0: i32) -> (i32, i32) {
    %c0_i32 = arith.constant 0 : i32
    %c0_i32_0 = arith.constant 0 : i32
    %c0_i32_1 = arith.constant 0 : i32
    return %c0_i32, %c0_i32_0 : i32, i32
  }
  func.func @transform_3(%arg0: i32) -> (i32, i32) {
    %c0_i32 = arith.constant 0 : i32
    %c0_i32_0 = arith.constant 0 : i32
    return %arg0, %c0_i32 : i32, i32
  }
}

module attributes {stable_mosaic.version = 11 : i64} {
  func.func @_matmul_bias_kernel(%arg0: i32, %arg1: memref<32x128xbf16, #tpu.memory_space<vmem>>, %arg2: memref<128x64xbf16, #tpu.memory_space<vmem>>, %arg3: memref<1x64xf32, #tpu.memory_space<vmem>>, %arg4: memref<32x64xbf16, #tpu.memory_space<vmem>>) attributes {dimension_semantics = [#tpu.dimension_semantics<parallel>], iteration_bounds = array<i64: 1>, scalar_prefetch = 0 : i64, scratch_operands = 0 : i64, tpu.core_type = #tpu.core_type<tc>, window_params = [{transform_indices = @transform_0, window_bounds = array<i64: 32, 128>}, {pipeline_mode = #tpu.pipeline_mode<synchronous>, transform_indices = @transform_1, window_bounds = array<i64: 128, 64>}, {pipeline_mode = #tpu.pipeline_mode<synchronous>, transform_indices = @transform_2, window_bounds = array<i64: 1, 64>}, {transform_indices = @transform_3, window_bounds = array<i64: 32, 64>}]} {
    %c0 = arith.constant 0 : index
    %c0_0 = arith.constant 0 : index
    %0 = vector.load %arg1[%c0, %c0_0] : memref<32x128xbf16, #tpu.memory_space<vmem>>, vector<32x128xbf16>
    %c0_1 = arith.constant 0 : index
    %c0_2 = arith.constant 0 : index
    %1 = vector.load %arg2[%c0_1, %c0_2] : memref<128x64xbf16, #tpu.memory_space<vmem>>, vector<128x64xbf16>
    %cst = arith.constant dense<0.000000e+00> : vector<32x64xf32>
    %2 = tpu.matmul %0, %1, %cst {dimension_numbers = #tpu.dot_dimension_numbers<[1], [0], [0], [1], [0, 0, 1, 1], [], []>} : vector<32x128xbf16>, vector<128x64xbf16>, vector<32x64xf32> -> vector<32x64xf32>
    %c0_3 = arith.constant 0 : index
    %c0_4 = arith.constant 0 : index
    %3 = vector.load %arg3[%c0_3, %c0_4] : memref<1x64xf32, #tpu.memory_space<vmem>>, vector<1x64xf32>
    %4 = vector.broadcast %3 : vector<1x64xf32> to vector<32x64xf32>
    %5 = arith.addf %2, %4 : vector<32x64xf32>
    %cst_5 = arith.constant 0.000000e+00 : f32
    %6 = vector.broadcast %cst_5 : f32 to vector<32x64xf32>
    %7 = arith.maximumf %5, %6 : vector<32x64xf32>
    %8 = arith.truncf %7 : vector<32x64xf32> to vector<32x64xbf16>
    %c0_6 = arith.constant 0 : index
    %c0_7 = arith.constant 0 : index
    %9 = vector.load %arg4[%c0_6, %c0_7] : memref<32x64xbf16, #tpu.memory_space<vmem>>, vector<32x64xbf16>
    tpu.vector_store %arg4[%c0_6, %c0_7], %8 {strides = array<i32>} : memref<32x64xbf16, #tpu.memory_space<vmem>>, vector<32x64xbf16>,
    return
  }
  func.func @transform_0(%arg0: i32) -> (i32, i32) {
    %c0_i32 = arith.constant 0 : i32
    %c0_i32_0 = arith.constant 0 : i32
    return %arg0, %c0_i32 : i32, i32
  }
  func.func @transform_1(%arg0: i32) -> (i32, i32) {
    %c0_i32 = arith.constant 0 : i32
    %c0_i32_0 = arith.constant 0 : i32
    %c0_i32_1 = arith.constant 0 : i32
    return %c0_i32, %c0_i32_0 : i32, i32
  }
  func.func @transform_2(%arg0: i32) -> (i32, i32) {
    %c0_i32 = arith.constant 0 : i32
    %c0_i32_0 = arith.constant 0 : i32
    %c0_i32_1 = arith.constant 0 : i32
    return %c0_i32, %c0_i32_0 : i32, i32
  }
  func.func @transform_3(%arg0: i32) -> (i32, i32) {
    %c0_i32 = arith.constant 0 : i32
    %c0_i32_0 = arith.constant 0 : i32
    return %arg0, %c0_i32 : i32, i32
  }
}

module attributes {stable_mosaic.version = 11 : i64} {
  func.func @_matmul_bias_kernel(%arg0: i32, %arg1: memref<8x576xbf16, #tpu.memory_space<vmem>>, %arg2: memref<576x64xbf16, #tpu.memory_space<vmem>>, %arg3: memref<1x64xf32, #tpu.memory_space<vmem>>, %arg4: memref<8x64xbf16, #tpu.memory_space<vmem>>) attributes {dimension_semantics = [#tpu.dimension_semantics<parallel>], iteration_bounds = array<i64: 1>, scalar_prefetch = 0 : i64, scratch_operands = 0 : i64, tpu.core_type = #tpu.core_type<tc>, window_params = [{transform_indices = @transform_0, window_bounds = array<i64: 8, 576>}, {pipeline_mode = #tpu.pipeline_mode<synchronous>, transform_indices = @transform_1, window_bounds = array<i64: 576, 64>}, {pipeline_mode = #tpu.pipeline_mode<synchronous>, transform_indices = @transform_2, window_bounds = array<i64: 1, 64>}, {transform_indices = @transform_3, window_bounds = array<i64: 8, 64>}]} {
    %c0 = arith.constant 0 : index
    %c0_0 = arith.constant 0 : index
    %0 = vector.load %arg1[%c0, %c0_0] : memref<8x576xbf16, #tpu.memory_space<vmem>>, vector<8x576xbf16>
    %c0_1 = arith.constant 0 : index
    %c0_2 = arith.constant 0 : index
    %1 = vector.load %arg2[%c0_1, %c0_2] : memref<576x64xbf16, #tpu.memory_space<vmem>>, vector<576x64xbf16>
    %cst = arith.constant dense<0.000000e+00> : vector<8x64xf32>
    %2 = tpu.matmul %0, %1, %cst {dimension_numbers = #tpu.dot_dimension_numbers<[1], [0], [0], [1], [0, 0, 1, 1], [], []>} : vector<8x576xbf16>, vector<576x64xbf16>, vector<8x64xf32> -> vector<8x64xf32>
    %c0_3 = arith.constant 0 : index
    %c0_4 = arith.constant 0 : index
    %3 = vector.load %arg3[%c0_3, %c0_4] : memref<1x64xf32, #tpu.memory_space<vmem>>, vector<1x64xf32>
    %4 = vector.broadcast %3 : vector<1x64xf32> to vector<8x64xf32>
    %5 = arith.addf %2, %4 : vector<8x64xf32>
    %cst_5 = arith.constant 0.000000e+00 : f32
    %6 = vector.broadcast %cst_5 : f32 to vector<8x64xf32>
    %7 = arith.maximumf %5, %6 : vector<8x64xf32>
    %8 = arith.truncf %7 : vector<8x64xf32> to vector<8x64xbf16>
    %c0_6 = arith.constant 0 : index
    %c0_7 = arith.constant 0 : index
    %9 = vector.load %arg4[%c0_6, %c0_7] : memref<8x64xbf16, #tpu.memory_space<vmem>>, vector<8x64xbf16>
    tpu.vector_store %arg4[%c0_6, %c0_7], %8 {strides = array<i32>} : memref<8x64xbf16, #tpu.memory_space<vmem>>, vector<8x64xbf16>,
    return
  }
  func.func @transform_0(%arg0: i32) -> (i32, i32) {
    %c0_i32 = arith.constant 0 : i32
    %c0_i32_0 = arith.constant 0 : i32
    return %arg0, %c0_i32 : i32, i32
  }
  func.func @transform_1(%arg0: i32) -> (i32, i32) {
    %c0_i32 = arith.constant 0 : i32
    %c0_i32_0 = arith.constant 0 : i32
    %c0_i32_1 = arith.constant 0 : i32
    return %c0_i32, %c0_i32_0 : i32, i32
  }
  func.func @transform_2(%arg0: i32) -> (i32, i32) {
    %c0_i32 = arith.constant 0 : i32
    %c0_i32_0 = arith.constant 0 : i32
    %c0_i32_1 = arith.constant 0 : i32
    return %c0_i32, %c0_i32_0 : i32, i32
  }
  func.func @transform_3(%arg0: i32) -> (i32, i32) {
    %c0_i32 = arith.constant 0 : i32
    %c0_i32_0 = arith.constant 0 : i32
    return %arg0, %c0_i32 : i32, i32
  }
}

module attributes {stable_mosaic.version = 11 : i64} {
  func.func @_matmul_bias_kernel(%arg0: i32, %arg1: memref<8x128xbf16, #tpu.memory_space<vmem>>, %arg2: memref<128x256xbf16, #tpu.memory_space<vmem>>, %arg3: memref<1x256xf32, #tpu.memory_space<vmem>>, %arg4: memref<8x256xbf16, #tpu.memory_space<vmem>>) attributes {dimension_semantics = [#tpu.dimension_semantics<parallel>], iteration_bounds = array<i64: 1>, scalar_prefetch = 0 : i64, scratch_operands = 0 : i64, tpu.core_type = #tpu.core_type<tc>, window_params = [{transform_indices = @transform_0, window_bounds = array<i64: 8, 128>}, {pipeline_mode = #tpu.pipeline_mode<synchronous>, transform_indices = @transform_1, window_bounds = array<i64: 128, 256>}, {pipeline_mode = #tpu.pipeline_mode<synchronous>, transform_indices = @transform_2, window_bounds = array<i64: 1, 256>}, {transform_indices = @transform_3, window_bounds = array<i64: 8, 256>}]} {
    %c0 = arith.constant 0 : index
    %c0_0 = arith.constant 0 : index
    %0 = vector.load %arg1[%c0, %c0_0] : memref<8x128xbf16, #tpu.memory_space<vmem>>, vector<8x128xbf16>
    %c0_1 = arith.constant 0 : index
    %c0_2 = arith.constant 0 : index
    %1 = vector.load %arg2[%c0_1, %c0_2] : memref<128x256xbf16, #tpu.memory_space<vmem>>, vector<128x256xbf16>
    %cst = arith.constant dense<0.000000e+00> : vector<8x256xf32>
    %2 = tpu.matmul %0, %1, %cst {dimension_numbers = #tpu.dot_dimension_numbers<[1], [0], [0], [1], [0, 0, 1, 1], [], []>} : vector<8x128xbf16>, vector<128x256xbf16>, vector<8x256xf32> -> vector<8x256xf32>
    %c0_3 = arith.constant 0 : index
    %c0_4 = arith.constant 0 : index
    %3 = vector.load %arg3[%c0_3, %c0_4] : memref<1x256xf32, #tpu.memory_space<vmem>>, vector<1x256xf32>
    %4 = vector.broadcast %3 : vector<1x256xf32> to vector<8x256xf32>
    %5 = arith.addf %2, %4 : vector<8x256xf32>
    %6 = arith.truncf %5 : vector<8x256xf32> to vector<8x256xbf16>
    %c0_5 = arith.constant 0 : index
    %c0_6 = arith.constant 0 : index
    %7 = vector.load %arg4[%c0_5, %c0_6] : memref<8x256xbf16, #tpu.memory_space<vmem>>, vector<8x256xbf16>
    tpu.vector_store %arg4[%c0_5, %c0_6], %6 {strides = array<i32>} : memref<8x256xbf16, #tpu.memory_space<vmem>>, vector<8x256xbf16>,
    return
  }
  func.func @transform_0(%arg0: i32) -> (i32, i32) {
    %c0_i32 = arith.constant 0 : i32
    %c0_i32_0 = arith.constant 0 : i32
    return %arg0, %c0_i32 : i32, i32
  }
  func.func @transform_1(%arg0: i32) -> (i32, i32) {
    %c0_i32 = arith.constant 0 : i32
    %c0_i32_0 = arith.constant 0 : i32
    %c0_i32_1 = arith.constant 0 : i32
    return %c0_i32, %c0_i32_0 : i32, i32
  }
  func.func @transform_2(%arg0: i32) -> (i32, i32) {
    %c0_i32 = arith.constant 0 : i32
    %c0_i32_0 = arith.constant 0 : i32
    %c0_i32_1 = arith.constant 0 : i32
    return %c0_i32, %c0_i32_0 : i32, i32
  }
  func.func @transform_3(%arg0: i32) -> (i32, i32) {
    %c0_i32 = arith.constant 0 : i32
    %c0_i32_0 = arith.constant 0 : i32
    return %arg0, %c0_i32 : i32, i32
  }
}

module attributes {stable_mosaic.version = 11 : i64} {
  func.func @_matmul_bias_kernel(%arg0: i32, %arg1: memref<8x256xbf16, #tpu.memory_space<vmem>>, %arg2: memref<256x128xbf16, #tpu.memory_space<vmem>>, %arg3: memref<1x128xf32, #tpu.memory_space<vmem>>, %arg4: memref<8x128xbf16, #tpu.memory_space<vmem>>) attributes {dimension_semantics = [#tpu.dimension_semantics<parallel>], iteration_bounds = array<i64: 1>, scalar_prefetch = 0 : i64, scratch_operands = 0 : i64, tpu.core_type = #tpu.core_type<tc>, window_params = [{transform_indices = @transform_0, window_bounds = array<i64: 8, 256>}, {pipeline_mode = #tpu.pipeline_mode<synchronous>, transform_indices = @transform_1, window_bounds = array<i64: 256, 128>}, {pipeline_mode = #tpu.pipeline_mode<synchronous>, transform_indices = @transform_2, window_bounds = array<i64: 1, 128>}, {transform_indices = @transform_3, window_bounds = array<i64: 8, 128>}]} {
    %c0 = arith.constant 0 : index
    %c0_0 = arith.constant 0 : index
    %0 = vector.load %arg1[%c0, %c0_0] : memref<8x256xbf16, #tpu.memory_space<vmem>>, vector<8x256xbf16>
    %c0_1 = arith.constant 0 : index
    %c0_2 = arith.constant 0 : index
    %1 = vector.load %arg2[%c0_1, %c0_2] : memref<256x128xbf16, #tpu.memory_space<vmem>>, vector<256x128xbf16>
    %cst = arith.constant dense<0.000000e+00> : vector<8x128xf32>
    %2 = tpu.matmul %0, %1, %cst {dimension_numbers = #tpu.dot_dimension_numbers<[1], [0], [0], [1], [0, 0, 1, 1], [], []>} : vector<8x256xbf16>, vector<256x128xbf16>, vector<8x128xf32> -> vector<8x128xf32>
    %c0_3 = arith.constant 0 : index
    %c0_4 = arith.constant 0 : index
    %3 = vector.load %arg3[%c0_3, %c0_4] : memref<1x128xf32, #tpu.memory_space<vmem>>, vector<1x128xf32>
    %4 = vector.broadcast %3 : vector<1x128xf32> to vector<8x128xf32>
    %5 = arith.addf %2, %4 : vector<8x128xf32>
    %cst_5 = arith.constant 0.000000e+00 : f32
    %6 = vector.broadcast %cst_5 : f32 to vector<8x128xf32>
    %7 = arith.maximumf %5, %6 : vector<8x128xf32>
    %8 = arith.truncf %7 : vector<8x128xf32> to vector<8x128xbf16>
    %c0_6 = arith.constant 0 : index
    %c0_7 = arith.constant 0 : index
    %9 = vector.load %arg4[%c0_6, %c0_7] : memref<8x128xbf16, #tpu.memory_space<vmem>>, vector<8x128xbf16>
    tpu.vector_store %arg4[%c0_6, %c0_7], %8 {strides = array<i32>} : memref<8x128xbf16, #tpu.memory_space<vmem>>, vector<8x128xbf16>,
    return
  }
  func.func @transform_0(%arg0: i32) -> (i32, i32) {
    %c0_i32 = arith.constant 0 : i32
    %c0_i32_0 = arith.constant 0 : i32
    return %arg0, %c0_i32 : i32, i32
  }
  func.func @transform_1(%arg0: i32) -> (i32, i32) {
    %c0_i32 = arith.constant 0 : i32
    %c0_i32_0 = arith.constant 0 : i32
    %c0_i32_1 = arith.constant 0 : i32
    return %c0_i32, %c0_i32_0 : i32, i32
  }
  func.func @transform_2(%arg0: i32) -> (i32, i32) {
    %c0_i32 = arith.constant 0 : i32
    %c0_i32_0 = arith.constant 0 : i32
    %c0_i32_1 = arith.constant 0 : i32
    return %c0_i32, %c0_i32_0 : i32, i32
  }
  func.func @transform_3(%arg0: i32) -> (i32, i32) {
    %c0_i32 = arith.constant 0 : i32
    %c0_i32_0 = arith.constant 0 : i32
    return %arg0, %c0_i32 : i32, i32
  }
}

module attributes {stable_mosaic.version = 11 : i64} {
  func.func @_matmul_bias_res_kernel(%arg0: i32, %arg1: memref<8x64xbf16, #tpu.memory_space<vmem>>, %arg2: memref<64x256xbf16, #tpu.memory_space<vmem>>, %arg3: memref<1x256xf32, #tpu.memory_space<vmem>>, %arg4: memref<8x256xbf16, #tpu.memory_space<vmem>>, %arg5: memref<8x256xbf16, #tpu.memory_space<vmem>>) attributes {dimension_semantics = [#tpu.dimension_semantics<parallel>], iteration_bounds = array<i64: 1>, scalar_prefetch = 0 : i64, scratch_operands = 0 : i64, tpu.core_type = #tpu.core_type<tc>, window_params = [{transform_indices = @transform_0, window_bounds = array<i64: 8, 64>}, {pipeline_mode = #tpu.pipeline_mode<synchronous>, transform_indices = @transform_1, window_bounds = array<i64: 64, 256>}, {pipeline_mode = #tpu.pipeline_mode<synchronous>, transform_indices = @transform_2, window_bounds = array<i64: 1, 256>}, {transform_indices = @transform_3, window_bounds = array<i64: 8, 256>}, {transform_indices = @transform_4, window_bounds = array<i64: 8, 256>}]} {
    %c0 = arith.constant 0 : index
    %c0_0 = arith.constant 0 : index
    %0 = vector.load %arg1[%c0, %c0_0] : memref<8x64xbf16, #tpu.memory_space<vmem>>, vector<8x64xbf16>
    %c0_1 = arith.constant 0 : index
    %c0_2 = arith.constant 0 : index
    %1 = vector.load %arg2[%c0_1, %c0_2] : memref<64x256xbf16, #tpu.memory_space<vmem>>, vector<64x256xbf16>
    %cst = arith.constant dense<0.000000e+00> : vector<8x256xf32>
    %2 = tpu.matmul %0, %1, %cst {dimension_numbers = #tpu.dot_dimension_numbers<[1], [0], [0], [1], [0, 0, 1, 1], [], []>} : vector<8x64xbf16>, vector<64x256xbf16>, vector<8x256xf32> -> vector<8x256xf32>
    %c0_3 = arith.constant 0 : index
    %c0_4 = arith.constant 0 : index
    %3 = vector.load %arg3[%c0_3, %c0_4] : memref<1x256xf32, #tpu.memory_space<vmem>>, vector<1x256xf32>
    %4 = vector.broadcast %3 : vector<1x256xf32> to vector<8x256xf32>
    %5 = arith.addf %2, %4 : vector<8x256xf32>
    %c0_5 = arith.constant 0 : index
    %c0_6 = arith.constant 0 : index
    %6 = vector.load %arg4[%c0_5, %c0_6] : memref<8x256xbf16, #tpu.memory_space<vmem>>, vector<8x256xbf16>
    %7 = arith.extf %6 : vector<8x256xbf16> to vector<8x256xf32>
    %8 = arith.addf %5, %7 : vector<8x256xf32>
    %cst_7 = arith.constant 0.000000e+00 : f32
    %9 = vector.broadcast %cst_7 : f32 to vector<8x256xf32>
    %10 = arith.maximumf %8, %9 : vector<8x256xf32>
    %11 = arith.truncf %10 : vector<8x256xf32> to vector<8x256xbf16>
    %c0_8 = arith.constant 0 : index
    %c0_9 = arith.constant 0 : index
    %12 = vector.load %arg5[%c0_8, %c0_9] : memref<8x256xbf16, #tpu.memory_space<vmem>>, vector<8x256xbf16>
    tpu.vector_store %arg5[%c0_8, %c0_9], %11 {strides = array<i32>} : memref<8x256xbf16, #tpu.memory_space<vmem>>, vector<8x256xbf16>,
    return
  }
  func.func @transform_0(%arg0: i32) -> (i32, i32) {
    %c0_i32 = arith.constant 0 : i32
    %c0_i32_0 = arith.constant 0 : i32
    return %arg0, %c0_i32 : i32, i32
  }
  func.func @transform_1(%arg0: i32) -> (i32, i32) {
    %c0_i32 = arith.constant 0 : i32
    %c0_i32_0 = arith.constant 0 : i32
    %c0_i32_1 = arith.constant 0 : i32
    return %c0_i32, %c0_i32_0 : i32, i32
  }
  func.func @transform_2(%arg0: i32) -> (i32, i32) {
    %c0_i32 = arith.constant 0 : i32
    %c0_i32_0 = arith.constant 0 : i32
    %c0_i32_1 = arith.constant 0 : i32
    return %c0_i32, %c0_i32_0 : i32, i32
  }
  func.func @transform_3(%arg0: i32) -> (i32, i32) {
    %c0_i32 = arith.constant 0 : i32
    %c0_i32_0 = arith.constant 0 : i32
    return %arg0, %c0_i32 : i32, i32
  }
  func.func @transform_4(%arg0: i32) -> (i32, i32) {
    %c0_i32 = arith.constant 0 : i32
    %c0_i32_0 = arith.constant 0 : i32
    return %arg0, %c0_i32 : i32, i32
  }
}

module attributes {stable_mosaic.version = 11 : i64} {
  func.func @_matmul_bias_kernel(%arg0: i32, %arg1: memref<2x1152xbf16, #tpu.memory_space<vmem>>, %arg2: memref<1152x128xbf16, #tpu.memory_space<vmem>>, %arg3: memref<1x128xf32, #tpu.memory_space<vmem>>, %arg4: memref<2x128xbf16, #tpu.memory_space<vmem>>) attributes {dimension_semantics = [#tpu.dimension_semantics<parallel>], iteration_bounds = array<i64: 1>, scalar_prefetch = 0 : i64, scratch_operands = 0 : i64, tpu.core_type = #tpu.core_type<tc>, window_params = [{transform_indices = @transform_0, window_bounds = array<i64: 2, 1152>}, {pipeline_mode = #tpu.pipeline_mode<synchronous>, transform_indices = @transform_1, window_bounds = array<i64: 1152, 128>}, {pipeline_mode = #tpu.pipeline_mode<synchronous>, transform_indices = @transform_2, window_bounds = array<i64: 1, 128>}, {transform_indices = @transform_3, window_bounds = array<i64: 2, 128>}]} {
    %c0 = arith.constant 0 : index
    %c0_0 = arith.constant 0 : index
    %0 = vector.load %arg1[%c0, %c0_0] : memref<2x1152xbf16, #tpu.memory_space<vmem>>, vector<2x1152xbf16>
    %c0_1 = arith.constant 0 : index
    %c0_2 = arith.constant 0 : index
    %1 = vector.load %arg2[%c0_1, %c0_2] : memref<1152x128xbf16, #tpu.memory_space<vmem>>, vector<1152x128xbf16>
    %cst = arith.constant dense<0.000000e+00> : vector<2x128xf32>
    %2 = tpu.matmul %0, %1, %cst {dimension_numbers = #tpu.dot_dimension_numbers<[1], [0], [0], [1], [0, 0, 1, 1], [], []>} : vector<2x1152xbf16>, vector<1152x128xbf16>, vector<2x128xf32> -> vector<2x128xf32>
    %c0_3 = arith.constant 0 : index
    %c0_4 = arith.constant 0 : index
    %3 = vector.load %arg3[%c0_3, %c0_4] : memref<1x128xf32, #tpu.memory_space<vmem>>, vector<1x128xf32>
    %4 = vector.broadcast %3 : vector<1x128xf32> to vector<2x128xf32>
    %5 = arith.addf %2, %4 : vector<2x128xf32>
    %cst_5 = arith.constant 0.000000e+00 : f32
    %6 = vector.broadcast %cst_5 : f32 to vector<2x128xf32>
    %7 = arith.maximumf %5, %6 : vector<2x128xf32>
    %8 = arith.truncf %7 : vector<2x128xf32> to vector<2x128xbf16>
    %c0_6 = arith.constant 0 : index
    %c0_7 = arith.constant 0 : index
    %9 = vector.load %arg4[%c0_6, %c0_7] : memref<2x128xbf16, #tpu.memory_space<vmem>>, vector<2x128xbf16>
    tpu.vector_store %arg4[%c0_6, %c0_7], %8 {strides = array<i32>} : memref<2x128xbf16, #tpu.memory_space<vmem>>, vector<2x128xbf16>,
    return
  }
  func.func @transform_0(%arg0: i32) -> (i32, i32) {
    %c0_i32 = arith.constant 0 : i32
    %c0_i32_0 = arith.constant 0 : i32
    return %arg0, %c0_i32 : i32, i32
  }
  func.func @transform_1(%arg0: i32) -> (i32, i32) {
    %c0_i32 = arith.constant 0 : i32
    %c0_i32_0 = arith.constant 0 : i32
    %c0_i32_1 = arith.constant 0 : i32
    return %c0_i32, %c0_i32_0 : i32, i32
  }
  func.func @transform_2(%arg0: i32) -> (i32, i32) {
    %c0_i32 = arith.constant 0 : i32
    %c0_i32_0 = arith.constant 0 : i32
    %c0_i32_1 = arith.constant 0 : i32
    return %c0_i32, %c0_i32_0 : i32, i32
  }
  func.func @transform_3(%arg0: i32) -> (i32, i32) {
    %c0_i32 = arith.constant 0 : i32
    %c0_i32_0 = arith.constant 0 : i32
    return %arg0, %c0_i32 : i32, i32
  }
}

module attributes {stable_mosaic.version = 11 : i64} {
  func.func @_matmul_bias_res_kernel(%arg0: i32, %arg1: memref<2x128xbf16, #tpu.memory_space<vmem>>, %arg2: memref<128x512xbf16, #tpu.memory_space<vmem>>, %arg3: memref<1x512xf32, #tpu.memory_space<vmem>>, %arg4: memref<2x512xbf16, #tpu.memory_space<vmem>>, %arg5: memref<2x512xbf16, #tpu.memory_space<vmem>>) attributes {dimension_semantics = [#tpu.dimension_semantics<parallel>], iteration_bounds = array<i64: 1>, scalar_prefetch = 0 : i64, scratch_operands = 0 : i64, tpu.core_type = #tpu.core_type<tc>, window_params = [{transform_indices = @transform_0, window_bounds = array<i64: 2, 128>}, {pipeline_mode = #tpu.pipeline_mode<synchronous>, transform_indices = @transform_1, window_bounds = array<i64: 128, 512>}, {pipeline_mode = #tpu.pipeline_mode<synchronous>, transform_indices = @transform_2, window_bounds = array<i64: 1, 512>}, {transform_indices = @transform_3, window_bounds = array<i64: 2, 512>}, {transform_indices = @transform_4, window_bounds = array<i64: 2, 512>}]} {
    %c0 = arith.constant 0 : index
    %c0_0 = arith.constant 0 : index
    %0 = vector.load %arg1[%c0, %c0_0] : memref<2x128xbf16, #tpu.memory_space<vmem>>, vector<2x128xbf16>
    %c0_1 = arith.constant 0 : index
    %c0_2 = arith.constant 0 : index
    %1 = vector.load %arg2[%c0_1, %c0_2] : memref<128x512xbf16, #tpu.memory_space<vmem>>, vector<128x512xbf16>
    %cst = arith.constant dense<0.000000e+00> : vector<2x512xf32>
    %2 = tpu.matmul %0, %1, %cst {dimension_numbers = #tpu.dot_dimension_numbers<[1], [0], [0], [1], [0, 0, 1, 1], [], []>} : vector<2x128xbf16>, vector<128x512xbf16>, vector<2x512xf32> -> vector<2x512xf32>
    %c0_3 = arith.constant 0 : index
    %c0_4 = arith.constant 0 : index
    %3 = vector.load %arg3[%c0_3, %c0_4] : memref<1x512xf32, #tpu.memory_space<vmem>>, vector<1x512xf32>
    %4 = vector.broadcast %3 : vector<1x512xf32> to vector<2x512xf32>
    %5 = arith.addf %2, %4 : vector<2x512xf32>
    %c0_5 = arith.constant 0 : index
    %c0_6 = arith.constant 0 : index
    %6 = vector.load %arg4[%c0_5, %c0_6] : memref<2x512xbf16, #tpu.memory_space<vmem>>, vector<2x512xbf16>
    %7 = arith.extf %6 : vector<2x512xbf16> to vector<2x512xf32>
    %8 = arith.addf %5, %7 : vector<2x512xf32>
    %cst_7 = arith.constant 0.000000e+00 : f32
    %9 = vector.broadcast %cst_7 : f32 to vector<2x512xf32>
    %10 = arith.maximumf %8, %9 : vector<2x512xf32>
    %11 = arith.truncf %10 : vector<2x512xf32> to vector<2x512xbf16>
    %c0_8 = arith.constant 0 : index
    %c0_9 = arith.constant 0 : index
    %12 = vector.load %arg5[%c0_8, %c0_9] : memref<2x512xbf16, #tpu.memory_space<vmem>>, vector<2x512xbf16>
    tpu.vector_store %arg5[%c0_8, %c0_9], %11 {strides = array<i32>} : memref<2x512xbf16, #tpu.memory_space<vmem>>, vector<2x512xbf16>,
    return
  }
  func.func @transform_0(%arg0: i32) -> (i32, i32) {
    %c0_i32 = arith.constant 0 : i32
    %c0_i32_0 = arith.constant 0 : i32
    return %arg0, %c0_i32 : i32, i32
  }
  func.func @transform_1(%arg0: i32) -> (i32, i32) {
    %c0_i32 = arith.constant 0 : i32
    %c0_i32_0 = arith.constant 0 : i32
    %c0_i32_1 = arith.constant 0 : i32
    return %c0_i32, %c0_i32_0 : i32, i32
  }
  func.func @transform_2(%arg0: i32) -> (i32, i32) {
    %c0_i32 = arith.constant 0 : i32
    %c0_i32_0 = arith.constant 0 : i32
    %c0_i32_1 = arith.constant 0 : i32
    return %c0_i32, %c0_i32_0 : i32, i32
  }
  func.func @transform_3(%arg0: i32) -> (i32, i32) {
    %c0_i32 = arith.constant 0 : i32
    %c0_i32_0 = arith.constant 0 : i32
    return %arg0, %c0_i32 : i32, i32
  }
  func.func @transform_4(%arg0: i32) -> (i32, i32) {
    %c0_i32 = arith.constant 0 : i32
    %c0_i32_0 = arith.constant 0 : i32
    return %arg0, %c0_i32 : i32, i32
  }
}

module attributes {stable_mosaic.version = 11 : i64} {
  func.func @_matmul_bias_kernel(%arg0: i32, %arg1: memref<2x256xbf16, #tpu.memory_space<vmem>>, %arg2: memref<256x512xbf16, #tpu.memory_space<vmem>>, %arg3: memref<1x512xf32, #tpu.memory_space<vmem>>, %arg4: memref<2x512xbf16, #tpu.memory_space<vmem>>) attributes {dimension_semantics = [#tpu.dimension_semantics<parallel>], iteration_bounds = array<i64: 1>, scalar_prefetch = 0 : i64, scratch_operands = 0 : i64, tpu.core_type = #tpu.core_type<tc>, window_params = [{transform_indices = @transform_0, window_bounds = array<i64: 2, 256>}, {pipeline_mode = #tpu.pipeline_mode<synchronous>, transform_indices = @transform_1, window_bounds = array<i64: 256, 512>}, {pipeline_mode = #tpu.pipeline_mode<synchronous>, transform_indices = @transform_2, window_bounds = array<i64: 1, 512>}, {transform_indices = @transform_3, window_bounds = array<i64: 2, 512>}]} {
    %c0 = arith.constant 0 : index
    %c0_0 = arith.constant 0 : index
    %0 = vector.load %arg1[%c0, %c0_0] : memref<2x256xbf16, #tpu.memory_space<vmem>>, vector<2x256xbf16>
    %c0_1 = arith.constant 0 : index
    %c0_2 = arith.constant 0 : index
    %1 = vector.load %arg2[%c0_1, %c0_2] : memref<256x512xbf16, #tpu.memory_space<vmem>>, vector<256x512xbf16>
    %cst = arith.constant dense<0.000000e+00> : vector<2x512xf32>
    %2 = tpu.matmul %0, %1, %cst {dimension_numbers = #tpu.dot_dimension_numbers<[1], [0], [0], [1], [0, 0, 1, 1], [], []>} : vector<2x256xbf16>, vector<256x512xbf16>, vector<2x512xf32> -> vector<2x512xf32>
    %c0_3 = arith.constant 0 : index
    %c0_4 = arith.constant 0 : index
    %3 = vector.load %arg3[%c0_3, %c0_4] : memref<1x512xf32, #tpu.memory_space<vmem>>, vector<1x512xf32>
    %4 = vector.broadcast %3 : vector<1x512xf32> to vector<2x512xf32>
    %5 = arith.addf %2, %4 : vector<2x512xf32>
    %6 = arith.truncf %5 : vector<2x512xf32> to vector<2x512xbf16>
    %c0_5 = arith.constant 0 : index
    %c0_6 = arith.constant 0 : index
    %7 = vector.load %arg4[%c0_5, %c0_6] : memref<2x512xbf16, #tpu.memory_space<vmem>>, vector<2x512xbf16>
    tpu.vector_store %arg4[%c0_5, %c0_6], %6 {strides = array<i32>} : memref<2x512xbf16, #tpu.memory_space<vmem>>, vector<2x512xbf16>,
    return
  }
  func.func @transform_0(%arg0: i32) -> (i32, i32) {
    %c0_i32 = arith.constant 0 : i32
    %c0_i32_0 = arith.constant 0 : i32
    return %arg0, %c0_i32 : i32, i32
  }
  func.func @transform_1(%arg0: i32) -> (i32, i32) {
    %c0_i32 = arith.constant 0 : i32
    %c0_i32_0 = arith.constant 0 : i32
    %c0_i32_1 = arith.constant 0 : i32
    return %c0_i32, %c0_i32_0 : i32, i32
  }
  func.func @transform_2(%arg0: i32) -> (i32, i32) {
    %c0_i32 = arith.constant 0 : i32
    %c0_i32_0 = arith.constant 0 : i32
    %c0_i32_1 = arith.constant 0 : i32
    return %c0_i32, %c0_i32_0 : i32, i32
  }
  func.func @transform_3(%arg0: i32) -> (i32, i32) {
    %c0_i32 = arith.constant 0 : i32
    %c0_i32_0 = arith.constant 0 : i32
    return %arg0, %c0_i32 : i32, i32
  }
}

module attributes {stable_mosaic.version = 11 : i64} {
  func.func @_head_kernel(%arg0: i32, %arg1: memref<2x1x512xbf16, #tpu.memory_space<vmem>>, %arg2: memref<512x128xbf16, #tpu.memory_space<vmem>>, %arg3: memref<1x128xf32, #tpu.memory_space<vmem>>, %arg4: memref<128x128xbf16, #tpu.memory_space<vmem>>, %arg5: memref<1x128xf32, #tpu.memory_space<vmem>>, %arg6: memref<2x128xf32, #tpu.memory_space<vmem>>) attributes {dimension_semantics = [#tpu.dimension_semantics<arbitrary>], iteration_bounds = array<i64: 1>, scalar_prefetch = 0 : i64, scratch_operands = 0 : i64, tpu.core_type = #tpu.core_type<tc>, window_params = [{pipeline_mode = #tpu.pipeline_mode<synchronous>, transform_indices = @transform_0, window_bounds = array<i64: 2, 1, 512>}, {pipeline_mode = #tpu.pipeline_mode<synchronous>, transform_indices = @transform_1, window_bounds = array<i64: 512, 128>}, {pipeline_mode = #tpu.pipeline_mode<synchronous>, transform_indices = @transform_2, window_bounds = array<i64: 1, 128>}, {pipeline_mode = #tpu.pipeline_mode<synchronous>, transform_indices = @transform_3, window_bounds = array<i64: 128, 128>}, {pipeline_mode = #tpu.pipeline_mode<synchronous>, transform_indices = @transform_4, window_bounds = array<i64: 1, 128>}, {pipeline_mode = #tpu.pipeline_mode<synchronous>, transform_indices = @transform_5, window_bounds = array<i64: 2, 128>}]} {
    %c0 = arith.constant 0 : index
    %c0_0 = arith.constant 0 : index
    %c0_1 = arith.constant 0 : index
    %0 = vector.load %arg1[%c0, %c0_0, %c0_1] : memref<2x1x512xbf16, #tpu.memory_space<vmem>>, vector<2x1x512xbf16>
    %1 = arith.extf %0 : vector<2x1x512xbf16> to vector<2x1x512xf32>
    %cst = arith.constant dense<0.000000e+00> : vector<2x512xf32>
    %2 = vector.multi_reduction <add>, %1, %cst [1] : vector<2x1x512xf32> to vector<2x512xf32>
    %cst_2 = arith.constant 1.000000e+00 : f32
    %3 = vector.broadcast %cst_2 : f32 to vector<2x512xf32>
    %4 = arith.mulf %2, %3 : vector<2x512xf32>
    %5 = arith.truncf %4 : vector<2x512xf32> to vector<2x512xbf16>
    %c0_3 = arith.constant 0 : index
    %c0_4 = arith.constant 0 : index
    %6 = vector.load %arg2[%c0_3, %c0_4] : memref<512x128xbf16, #tpu.memory_space<vmem>>, vector<512x128xbf16>
    %cst_5 = arith.constant dense<0.000000e+00> : vector<2x128xf32>
    %7 = tpu.matmul %5, %6, %cst_5 {dimension_numbers = #tpu.dot_dimension_numbers<[1], [0], [0], [1], [0, 0, 1, 1], [], []>} : vector<2x512xbf16>, vector<512x128xbf16>, vector<2x128xf32> -> vector<2x128xf32>
    %c0_6 = arith.constant 0 : index
    %c0_7 = arith.constant 0 : index
    %8 = vector.load %arg3[%c0_6, %c0_7] : memref<1x128xf32, #tpu.memory_space<vmem>>, vector<1x128xf32>
    %9 = vector.broadcast %8 : vector<1x128xf32> to vector<2x128xf32>
    %10 = arith.addf %7, %9 : vector<2x128xf32>
    %cst_8 = arith.constant 0.000000e+00 : f32
    %11 = vector.broadcast %cst_8 : f32 to vector<2x128xf32>
    %12 = arith.maximumf %10, %11 : vector<2x128xf32>
    %13 = arith.truncf %12 : vector<2x128xf32> to vector<2x128xbf16>
    %c0_9 = arith.constant 0 : index
    %c0_10 = arith.constant 0 : index
    %14 = vector.load %arg4[%c0_9, %c0_10] : memref<128x128xbf16, #tpu.memory_space<vmem>>, vector<128x128xbf16>
    %cst_11 = arith.constant dense<0.000000e+00> : vector<2x128xf32>
    %15 = tpu.matmul %13, %14, %cst_11 {dimension_numbers = #tpu.dot_dimension_numbers<[1], [0], [0], [1], [0, 0, 1, 1], [], []>} : vector<2x128xbf16>, vector<128x128xbf16>, vector<2x128xf32> -> vector<2x128xf32>
    %c0_12 = arith.constant 0 : index
    %c0_13 = arith.constant 0 : index
    %16 = vector.load %arg5[%c0_12, %c0_13] : memref<1x128xf32, #tpu.memory_space<vmem>>, vector<1x128xf32>
    %17 = vector.broadcast %16 : vector<1x128xf32> to vector<2x128xf32>
    %18 = arith.addf %15, %17 : vector<2x128xf32>
    %c0_14 = arith.constant 0 : index
    %c0_15 = arith.constant 0 : index
    %19 = vector.load %arg6[%c0_14, %c0_15] : memref<2x128xf32, #tpu.memory_space<vmem>>, vector<2x128xf32>
    tpu.vector_store %arg6[%c0_14, %c0_15], %18 {strides = array<i32>} : memref<2x128xf32, #tpu.memory_space<vmem>>, vector<2x128xf32>,
    return
  }
  func.func @transform_0(%arg0: i32) -> (i32, i32, i32) {
    %c0_i32 = arith.constant 0 : i32
    %c0_i32_0 = arith.constant 0 : i32
    %c0_i32_1 = arith.constant 0 : i32
    %c0_i32_2 = arith.constant 0 : i32
    return %c0_i32, %c0_i32_0, %c0_i32_1 : i32, i32, i32
  }
  func.func @transform_1(%arg0: i32) -> (i32, i32) {
    %c0_i32 = arith.constant 0 : i32
    %c0_i32_0 = arith.constant 0 : i32
    %c0_i32_1 = arith.constant 0 : i32
    return %c0_i32, %c0_i32_0 : i32, i32
  }
  func.func @transform_2(%arg0: i32) -> (i32, i32) {
    %c0_i32 = arith.constant 0 : i32
    %c0_i32_0 = arith.constant 0 : i32
    %c0_i32_1 = arith.constant 0 : i32
    return %c0_i32, %c0_i32_0 : i32, i32
  }
  func.func @transform_3(%arg0: i32) -> (i32, i32) {
    %c0_i32 = arith.constant 0 : i32
    %c0_i32_0 = arith.constant 0 : i32
    %c0_i32_1 = arith.constant 0 : i32
    return %c0_i32, %c0_i32_0 : i32, i32
  }
  func.func @transform_4(%arg0: i32) -> (i32, i32) {
    %c0_i32 = arith.constant 0 : i32
    %c0_i32_0 = arith.constant 0 : i32
    %c0_i32_1 = arith.constant 0 : i32
    return %c0_i32, %c0_i32_0 : i32, i32
  }
  func.func @transform_5(%arg0: i32) -> (i32, i32) {
    %c0_i32 = arith.constant 0 : i32
    %c0_i32_0 = arith.constant 0 : i32
    %c0_i32_1 = arith.constant 0 : i32
    return %c0_i32, %c0_i32_0 : i32, i32
  }
}

</mosaic_0001>

<bundles_post_ra>
// kernel: resnet_forward.21
= control target key start
LH: loop header
LB: loop body
LE: loop exit
PB: predicated region body
PF: predicated region fallthrough
CT: control target
= control target key end

     0   :  { %s805_s12 = smov 0   ;;  %s937_s0 = inlined_call_operand.vmem [shape: bf16[512,147], index: 0, kind: input, shape index: {}]   ;;  %s938_s1 = inlined_call_operand.vmem [shape: bf16[147,32], index: 1, kind: input, shape index: {}]   ;;  %s939_s2 = inlined_call_operand.vmem [shape: f32[1,32], index: 2, kind: input, shape index: {}]   ;;  %s940_s3 = inlined_call_operand.vmem [shape: bf16[512,32], index: 3, kind: output, shape index: {}]  }
   0x1 LB: > { %s631_s13 = sadd.s32 4294967295, %s781_s12   ;;  %p635_p0 = scmp.ge.s32.totalorder %s781_s12, 1  ;;  %s781_s12 = sphi %s805_s12, %s13_s12  }
   0x2   : > { %p139_p1 = scmp.lt.s32.totalorder %s781_s12, 5 }
   0x4   : > { %p140_p2 = pnand %p635_p0, %p139_p1 }
   0x5   : > { %s636_s20 = sshll.u32 (!%p140_p2), %s631_s13, 4 }
   0x6   : > { %143 = sbr.rel (%p140_p2) target bundleno = 280 (0x118), region = 32  ;;  %p165_p3 = scmp.lt.s32.totalorder (!%p140_p2), %s636_s20, 63 }
   0xb   : > { %v741_v0 = vld [vmem:[%s938_s1 + $0x38] sm:$0xff]   ;;  %v783_v1 = vmov 0   ;;  %v742_v2 = vld [vmem:[%s938_s1 + $0x30] sm:$0xff]   ;;  %v743_v3 = vld [vmem:[%s938_s1 + $0x28] sm:$0xff]   ;;  %s942_s20 = smov (!%p165_p3, %s636_s20), 63  ;;  %vm349_vm0 = vcmask 154624  }
   0xc   : > { %381 = vmatprep.subr.bf16.mxu0 %v783_v1  ;;  %711 = vmatprep.subr.bf16.mxu1 %v783_v1  ;;  %v744_v4 = vld [vmem:[%s938_s1 + $0x20] sm:$0xff]   ;;  %s694_s23 = sshll.u32 %s942_s20, 3  ;;  %v745_v5 = vld [vmem:[%s938_s1 + $0x18] sm:$0xff]   ;;  %v746_v8 = vld [vmem:[%s938_s1 + $0x10] sm:$0xff]   ;;  %vm374_vm1 = vcmask 1040384   ;;  %vm375_vm2 = vcmask 1041408  }
   0xd   : > { %382 = vmatpush1.bf16.msra.mxu0 %v741_v0  ;;  %721 = vmatpush1.bf16.msra.mxu1 %v741_v0  ;;  %s831_s26 = scalar_lea.vmem %s937_s0, %s694_s23  ;;  %v747_v9 = vld [vmem:[%s938_s1 + $0x8] sm:$0xff]   ;;  %v784_v10 = vmov 65535   ;;  %v748_v12 = vld [vmem:[%s938_s1] sm:$0xff]   ;;  %s640_s15 = sshll.u32 %s942_s20, 2  ;;  %vm558_vm3 = vcmask 257024  }
   0xe   : > { %383 = vmatprep.subr.bf16.mxu0 %v783_v1  ;;  %712 = vmatprep.subr.bf16.mxu1 %v783_v1  ;;  %v753_v6 = vld [vmem:[%s831_s26 + $0x4] ss:$8 sps:$4 sm:$0xff]   ;;  %v376_v11 = vsel %vm374_vm1, 4294967295, %v784_v10  ;;  %v749_v13 = vld [vmem:[%s938_s1 + $0x48] ss:$0 sps:$4 sm:$0x33]   ;;  %s886_s18 = scalar_lea.vmem %s940_s3, %s640_s15 }
   0xf   : > { %v756_v7 = vld [vmem:[%s831_s26 + $0x44] ss:$8 sps:$4 sm:$0xff]   ;;  %668 = vmatprep.mubr.msk.bf16.mxu0 %vm349_vm0, %v753_v6  ;;  %v377_v14 = vsel %vm375_vm2, %v376_v11, 0  ;;  %v751_v17 = vld [vmem:[%s831_s26] ss:$8 sps:$4 sm:$0xff]  }
  0x10   : > { %672 = vmatprep.mubr.msk.bf16.mxu1 %vm349_vm0, %v756_v7  ;;  %v379_v15 = vand.u32 %v749_v13, %v377_v14  ;;  %v750_v16 = vld [vmem:[%s938_s1 + $0x40] sm:$0xff]   ;;  %v757_v19 = vld [vmem:[%s831_s26 + $0x14] ss:$8 sps:$4 sm:$0xff]   ;;  %v761_v21 = vld [vmem:[%s831_s26 + $0x10] ss:$8 sps:$4 sm:$0xff]  }
  0x11   : > { %384 = vmatpush1.bf16.msra.mxu0 %v742_v2  ;;  %722 = vmatpush1.bf16.msra.mxu1 %v742_v2  ;;  %v754_v18 = vld [vmem:[%s831_s26 + $0x40] ss:$8 sps:$4 sm:$0xff]   ;;  %v759_v20 = vld [vmem:[%s831_s26 + $0x54] ss:$8 sps:$4 sm:$0xff]   ;;  %v762_v22 = vld [vmem:[%s831_s26 + $0x50] ss:$8 sps:$4 sm:$0xff]  }
  0x12   : > { %385 = vmatprep.subr.bf16.mxu0 %v783_v1  ;;  %713 = vmatprep.subr.bf16.mxu1 %v783_v1  ;;  %v763_v23 = vld [vmem:[%s831_s26 + $0x24] ss:$8 sps:$4 sm:$0xff]   ;;  %v767_v25 = vld [vmem:[%s831_s26 + $0x20] ss:$8 sps:$4 sm:$0xff]   ;;  %v769_v27 = vld [vmem:[%s831_s26 + $0x34] ss:$8 sps:$4 sm:$0xff]  }
  0x13   : > { %v765_v24 = vld [vmem:[%s831_s26 + $0x64] ss:$8 sps:$4 sm:$0xff]   ;;  %v768_v26 = vld [vmem:[%s831_s26 + $0x60] ss:$8 sps:$4 sm:$0xff]   ;;  %v771_v28 = vld [vmem:[%s831_s26 + $0x74] ss:$8 sps:$4 sm:$0xff]  }
  0x14   : > { %v773_v29 = vld [vmem:[%s831_s26 + $0x30] ss:$8 sps:$4 sm:$0xff]   ;;  %v878_v31 = vld [vmem:[%s939_s2] ss:$0 sm:$0xff] }
  0x15   : > { %386 = vmatpush1.bf16.msra.mxu0 %v743_v3  ;;  %723 = vmatpush1.bf16.msra.mxu1 %v743_v3  ;;  %v774_v30 = vld [vmem:[%s831_s26 + $0x70] ss:$8 sps:$4 sm:$0xff]  }
  0x16   : > { %387 = vmatprep.subr.bf16.mxu0 %v783_v1  ;;  %714 = vmatprep.subr.bf16.mxu1 %v783_v1 }
  0x19   : > { %388 = vmatpush1.bf16.msra.mxu0 %v744_v4  ;;  %724 = vmatpush1.bf16.msra.mxu1 %v744_v4 }
  0x1a   : > { %389 = vmatprep.subr.bf16.mxu0 %v783_v1  ;;  %715 = vmatprep.subr.bf16.mxu1 %v783_v1 }
  0x1d   : > { %390 = vmatpush1.bf16.msra.mxu0 %v745_v5  ;;  %725 = vmatpush1.bf16.msra.mxu1 %v745_v5 }
  0x1e   : > { %391 = vmatprep.subr.bf16.mxu0 %v783_v1  ;;  %716 = vmatprep.subr.bf16.mxu1 %v783_v1 }
  0x21   : > { %392 = vmatpush1.bf16.msra.mxu0 %v746_v8  ;;  %726 = vmatpush1.bf16.msra.mxu1 %v746_v8 }
  0x22   : > { %393 = vmatprep.subr.bf16.mxu0 %v783_v1  ;;  %717 = vmatprep.subr.bf16.mxu1 %v783_v1 }
  0x25   : > { %394 = vmatpush1.bf16.msra.mxu0 %v747_v9  ;;  %727 = vmatpush1.bf16.msra.mxu1 %v747_v9 }
  0x26   : > { %395 = vmatprep.subr.bf16.mxu0 %v783_v1  ;;  %718 = vmatprep.subr.bf16.mxu1 %v783_v1 }
  0x29   : > { %396 = vmatpush1.bf16.msra.mxu0 %v748_v12  ;;  %728 = vmatpush1.bf16.msra.mxu1 %v748_v12 }
  0x2a   : > { %409 = vmatprep.subr.bf16.mxu0 %v783_v1  ;;  %719 = vmatprep.subr.bf16.mxu1 %v783_v1 }
  0x2d   : > { %410 = vmatpush2.bf16.msra.mxu0 %v379_v15  ;;  %729 = vmatpush2.bf16.msra.mxu1 %v379_v15 }
  0x2e   : > { %411 = vmatprep.subr.bf16.mxu0 %v783_v1  ;;  %720 = vmatprep.subr.bf16.mxu1 %v783_v1 }
  0x31   : > { %412 = vmatpush2.bf16.msra.mxu0 %v750_v16  ;;  %730 = vmatpush2.bf16.msra.mxu1 %v750_v16 }
  0x34   : > { %414 = vmatmul.mubr.bf16.vlgmr.msra.gmra.mxu0 %v751_v17  ;;  %446 = vmatmul.mubr.bf16.vlgmr.msra.gmra.mxu1 %v754_v18 }
  0x35   : > { %669 = vmatprep.mubr.msk.bf16.mxu0 %vm349_vm0, %v757_v19  ;;  %673 = vmatprep.mubr.msk.bf16.mxu1 %vm349_vm0, %v759_v20 }
  0x3c   : > { %422 = vmatmul.mubr.bf16.gmra.mxu0 %v761_v21  ;;  %454 = vmatmul.mubr.bf16.gmra.mxu1 %v762_v22 }
  0x3d   : > { %670 = vmatprep.mubr.msk.bf16.mxu0 %vm349_vm0, %v763_v23  ;;  %674 = vmatprep.mubr.msk.bf16.mxu1 %vm349_vm0, %v765_v24 }
  0x44   : > { %430 = vmatmul.mubr.bf16.gmra.mxu0 %v767_v25  ;;  %462 = vmatmul.mubr.bf16.gmra.mxu1 %v768_v26 }
  0x45   : > { %671 = vmatprep.mubr.msk.bf16.mxu0 %vm349_vm0, %v769_v27  ;;  %675 = vmatprep.mubr.msk.bf16.mxu1 %vm349_vm0, %v771_v28 }
  0x4c   : > { %438 = vmatmul.mubr.bf16.gmra.mxu0 %v773_v29  ;;  %470 = vmatmul.mubr.bf16.gmra.mxu1 %v774_v30 }
  0xf4   : > { %v415_v32 = vpop.f32.mrf.mxu0  ;;  %v447_v33 = vpop.f32.mrf.mxu1 }
  0xf5   : > { %v416_v34 = vadd.f32 %v878_v31, %v415_v32  ;;  %v448_v35 = vadd.f32 %v878_v31, %v447_v33 }
  0xf6   : > { %v417_v36 = vpop.f32.mrf.mxu0  ;;  %v449_v37 = vpop.f32.mrf.mxu1 }
  0xf7   : > { %v478_v38 = vmax.f32 %v416_v34, 0.0  ;;  %v486_v39 = vmax.f32 %v448_v35, 0.0 }
  0xf8   : > { %v418_v40 = vpop.f32.mrf.mxu0  ;;  %v450_v41 = vpop.f32.mrf.mxu1 }
  0xf9   : > { %v695_v42 = vpack.c.bf16 %v478_v38, %v478_v38  ;;  %v703_v43 = vpack.c.bf16 %v486_v39, %v486_v39  ;;  %v419_v44 = vadd.f32 %v878_v31, %v418_v40  ;;  %v451_v45 = vadd.f32 %v878_v31, %v450_v41 }
  0xfa   : > { %v420_v46 = vpop.f32.mrf.mxu0  ;;  %v452_v47 = vpop.f32.mrf.mxu1 }
  0xfb   : > { %559 = vst.msk [vmem:[%s886_s18] sm:$0xf] %vm558_vm3, %v695_v42  ;;  %567 = vst.msk [vmem:[%s886_s18 + $0x20] sm:$0xf] %vm558_vm3, %v703_v43  ;;  %v479_v48 = vmax.f32 %v419_v44, 0.0  ;;  %v487_v49 = vmax.f32 %v451_v45, 0.0 }
  0xfc   : > { %v423_v50 = vpop.f32.mrf.mxu0  ;;  %v455_v51 = vpop.f32.mrf.mxu1 }
  0xfd   : > { %v696_v52 = vpack.c.bf16 %v479_v48, %v479_v48  ;;  %v704_v53 = vpack.c.bf16 %v487_v49, %v487_v49  ;;  %v424_v54 = vadd.f32 %v878_v31, %v423_v50  ;;  %v456_v55 = vadd.f32 %v878_v31, %v455_v51 }
  0xfe   : > { %v425_v56 = vpop.f32.mrf.mxu0  ;;  %v457_v57 = vpop.f32.mrf.mxu1 }
  0xff   : > { %560 = vst.msk [vmem:[%s886_s18 + $0x4] sm:$0xf] %vm558_vm3, %v696_v52  ;;  %568 = vst.msk [vmem:[%s886_s18 + $0x24] sm:$0xf] %vm558_vm3, %v704_v53  ;;  %v480_v58 = vmax.f32 %v424_v54, 0.0  ;;  %v488_v59 = vmax.f32 %v456_v55, 0.0 }
 0x100   : > { %v426_v60 = vpop.f32.mrf.mxu0  ;;  %v458_v61 = vpop.f32.mrf.mxu1 }
 0x101   : > { %v697_v62 = vpack.c.bf16 %v480_v58, %v480_v58  ;;  %v705_v63 = vpack.c.bf16 %v488_v59, %v488_v59  ;;  %v427_v0 = vadd.f32 %v878_v31, %v426_v60  ;;  %v459_v1 = vadd.f32 %v878_v31, %v458_v61 }
 0x102   : > { %v428_v2 = vpop.f32.mrf.mxu0  ;;  %v460_v3 = vpop.f32.mrf.mxu1 }
 0x103   : > { %561 = vst.msk [vmem:[%s886_s18 + $0x8] sm:$0xf] %vm558_vm3, %v697_v62  ;;  %569 = vst.msk [vmem:[%s886_s18 + $0x28] sm:$0xf] %vm558_vm3, %v705_v63  ;;  %v481_v4 = vmax.f32 %v427_v0, 0.0  ;;  %v489_v5 = vmax.f32 %v459_v1, 0.0 }
 0x104   : > { %v431_v6 = vpop.f32.mrf.mxu0  ;;  %v463_v7 = vpop.f32.mrf.mxu1 }
 0x105   : > { %v698_v8 = vpack.c.bf16 %v481_v4, %v481_v4  ;;  %v706_v9 = vpack.c.bf16 %v489_v5, %v489_v5  ;;  %v432_v10 = vadd.f32 %v878_v31, %v431_v6  ;;  %v464_v11 = vadd.f32 %v878_v31, %v463_v7 }
 0x106   : > { %v433_v12 = vpop.f32.mrf.mxu0  ;;  %v465_v13 = vpop.f32.mrf.mxu1 }
 0x107   : > { %562 = vst.msk [vmem:[%s886_s18 + $0xc] sm:$0xf] %vm558_vm3, %v698_v8  ;;  %570 = vst.msk [vmem:[%s886_s18 + $0x2c] sm:$0xf] %vm558_vm3, %v706_v9  ;;  %v482_v14 = vmax.f32 %v432_v10, 0.0  ;;  %v490_v15 = vmax.f32 %v464_v11, 0.0 }
 0x108   : > { %v434_v16 = vpop.f32.mrf.mxu0  ;;  %v466_v17 = vpop.f32.mrf.mxu1 }
 0x109   : > { %v699_v18 = vpack.c.bf16 %v482_v14, %v482_v14  ;;  %v707_v19 = vpack.c.bf16 %v490_v15, %v490_v15  ;;  %v435_v20 = vadd.f32 %v878_v31, %v434_v16  ;;  %v467_v21 = vadd.f32 %v878_v31, %v466_v17 }
 0x10a   : > { %v436_v22 = vpop.f32.mrf.mxu0  ;;  %v468_v23 = vpop.f32.mrf.mxu1 }
 0x10b   : > { %563 = vst.msk [vmem:[%s886_s18 + $0x10] sm:$0xf] %vm558_vm3, %v699_v18  ;;  %571 = vst.msk [vmem:[%s886_s18 + $0x30] sm:$0xf] %vm558_vm3, %v707_v19  ;;  %v483_v24 = vmax.f32 %v435_v20, 0.0  ;;  %v491_v25 = vmax.f32 %v467_v21, 0.0 }
 0x10c   : > { %v439_v26 = vpop.f32.mrf.mxu0  ;;  %v471_v27 = vpop.f32.mrf.mxu1 }
 0x10d   : > { %v700_v28 = vpack.c.bf16 %v483_v24, %v483_v24  ;;  %v708_v29 = vpack.c.bf16 %v491_v25, %v491_v25  ;;  %v440_v30 = vadd.f32 %v878_v31, %v439_v26  ;;  %v472_v32 = vadd.f32 %v878_v31, %v471_v27 }
 0x10e   : > { %v441_v33 = vpop.f32.mrf.mxu0  ;;  %v473_v34 = vpop.f32.mrf.mxu1 }
 0x10f   : > { %564 = vst.msk [vmem:[%s886_s18 + $0x14] sm:$0xf] %vm558_vm3, %v700_v28  ;;  %572 = vst.msk [vmem:[%s886_s18 + $0x34] sm:$0xf] %vm558_vm3, %v708_v29  ;;  %v484_v35 = vmax.f32 %v440_v30, 0.0  ;;  %v492_v36 = vmax.f32 %v472_v32, 0.0 }
 0x110   : > { %v442_v37 = vpop.f32.mrf.mxu0  ;;  %v474_v38 = vpop.f32.mrf.mxu1 }
 0x111   : > { %v701_v39 = vpack.c.bf16 %v484_v35, %v484_v35  ;;  %v709_v40 = vpack.c.bf16 %v492_v36, %v492_v36  ;;  %v443_v41 = vadd.f32 %v878_v31, %v442_v37  ;;  %v475_v42 = vadd.f32 %v878_v31, %v474_v38 }
 0x112   : > { %v444_v43 = vpop.f32.mrf.mxu0  ;;  %v476_v44 = vpop.f32.mrf.mxu1 }
 0x113   : > { %565 = vst.msk [vmem:[%s886_s18 + $0x18] sm:$0xf] %vm558_vm3, %v701_v39  ;;  %573 = vst.msk [vmem:[%s886_s18 + $0x38] sm:$0xf] %vm558_vm3, %v709_v40  ;;  %v485_v45 = vmax.f32 %v443_v41, 0.0  ;;  %v493_v46 = vmax.f32 %v475_v42, 0.0 }
 0x115   : > { %v702_v47 = vpack.c.bf16 %v485_v45, %v485_v45  ;;  %v710_v48 = vpack.c.bf16 %v493_v46, %v493_v46 }
 0x117   : > { %566 = vst.msk [vmem:[%s886_s18 + $0x1c] sm:$0xf] %vm558_vm3, %v702_v47  ;;  %574 = vst.msk [vmem:[%s886_s18 + $0x3c] sm:$0xf] %vm558_vm3, %v710_v48 }
 0x118 PF: > { %s13_s12 = sadd.s32 1, %s781_s12  }
 0x119   : > { %p10_p4 = scmp.ge.s32.totalorder %s13_s12, 6  }
 0x11b   :  { %12 = sbr.rel (!%p10_p4) target bundleno = 1 (0x1), region = 62 }

// kernel: resnet_forward.22
= control target key start
LH: loop header
LB: loop body
LE: loop exit
PB: predicated region body
PF: predicated region fallthrough
CT: control target
= control target key end

     0   :  { %vm94_vm0 = vcmask 261120   ;;  %vm296_vm1 = vcmask 125952   ;;  %s555_s1 = inlined_call_operand.vmem [shape: bf16[32,16], index: 1, kind: input, shape index: {}]   ;;  %s556_s0 = inlined_call_operand.vmem [shape: bf16[128,32], index: 0, kind: input, shape index: {}]   ;;  %s557_s2 = inlined_call_operand.vmem [shape: f32[1,16], index: 2, kind: input, shape index: {}]   ;;  %s558_s3 = inlined_call_operand.vmem [shape: bf16[128,16], index: 3, kind: output, shape index: {}]  }
   0x1   :  { %v402_v0 = vld [vmem:[%s555_s1 + $0x8] sm:$0xff]   ;;  %v403_v1 = vld [vmem:[%s555_s1] sm:$0xff]   ;;  %v408_v6 = vld [vmem:[%s556_s0 + $0x10] sm:$0xff]  }
   0x2   :  { %378 = vmatprep.subr.bf16.mxu0 %v402_v0  ;;  %398 = vmatprep.subr.bf16.mxu1 %v402_v0  ;;  %v404_v2 = vld [vmem:[%s556_s0] sm:$0xff]   ;;  %v406_v4 = vld [vmem:[%s556_s0 + $0x8] sm:$0xff]   ;;  %v409_v7 = vld [vmem:[%s556_s0 + $0x30] sm:$0xff]  }
   0x3   :  { %379 = vmatpush3.bf16.msra.mxu0 %v402_v0  ;;  %400 = vmatpush3.bf16.msra.mxu1 %v402_v0  ;;  %v405_v3 = vld [vmem:[%s556_s0 + $0x20] sm:$0xff]   ;;  %v407_v5 = vld [vmem:[%s556_s0 + $0x28] sm:$0xff]   ;;  %v410_v8 = vld [vmem:[%s556_s0 + $0x18] sm:$0xff]  }
   0x4   :  { %380 = vmatprep.subr.bf16.mxu0 %v403_v1  ;;  %399 = vmatprep.subr.bf16.mxu1 %v403_v1  ;;  %v411_v9 = vld [vmem:[%s556_s0 + $0x38] sm:$0xff]   ;;  %v473_v10 = vld [vmem:[%s557_s2] ss:$0 sm:$0xff] }
   0x5   :  { %382 = vmatprep.mubr.msk.bf16.mxu0 %vm94_vm0, %v404_v2  ;;  %390 = vmatprep.mubr.msk.bf16.mxu1 %vm94_vm0, %v405_v3 }
   0x7   :  { %381 = vmatpush3.bf16.msra.mxu0 %v403_v1  ;;  %401 = vmatpush3.bf16.msra.mxu1 %v403_v1 }
   0xa   :  { %383 = vmatmul.mubr.msk.bf16.vlgmr.msra.gmra.mxu0 %vm94_vm0, %v406_v4  ;;  %391 = vmatmul.mubr.msk.bf16.vlgmr.msra.gmra.mxu1 %vm94_vm0, %v407_v5 }
   0xb   :  { %386 = vmatprep.mubr.msk.bf16.mxu0 %vm94_vm0, %v408_v6  ;;  %394 = vmatprep.mubr.msk.bf16.mxu1 %vm94_vm0, %v409_v7 }
  0x12   :  { %387 = vmatmul.mubr.msk.bf16.gmra.mxu0 %vm94_vm0, %v410_v8  ;;  %395 = vmatmul.mubr.msk.bf16.gmra.mxu1 %vm94_vm0, %v411_v9 }
  0xca   :  { %v384_v11 = vpop.f32.mrf.mxu0  ;;  %v392_v12 = vpop.f32.mrf.mxu1 }
  0xcb   :  { %v162_v13 = vadd.f32 %v384_v11, %v473_v10  ;;  %v194_v14 = vadd.f32 %v392_v12, %v473_v10 }
  0xcc   :  { %v153_v15 = vpop.f32.mrf.mxu0  ;;  %v185_v16 = vpop.f32.mrf.mxu1 }
  0xcd   :  { %v218_v17 = vmax.f32 %v162_v13, 0.0  ;;  %v226_v18 = vmax.f32 %v194_v14, 0.0  ;;  %v154_v19 = vadd.f32 %v473_v10, %v153_v15  ;;  %v186_v20 = vadd.f32 %v473_v10, %v185_v16 }
  0xce   :  { %v385_v21 = vpop.f32.mrf.mxu0  ;;  %v393_v22 = vpop.f32.mrf.mxu1 }
  0xcf   :  { %v354_v23 = vpack.c.bf16 %v218_v17, %v218_v17  ;;  %v362_v24 = vpack.c.bf16 %v226_v18, %v226_v18  ;;  %v216_v25 = vmax.f32 %v154_v19, 0.0  ;;  %v224_v26 = vmax.f32 %v186_v20, 0.0 }
  0xd0   :  { %v165_v27 = vadd.f32 %v385_v21, %v473_v10  ;;  %v197_v28 = vadd.f32 %v393_v22, %v473_v10  ;;  %v156_v29 = vpop.f32.mrf.mxu0  ;;  %v188_v30 = vpop.f32.mrf.mxu1 }
  0xd1   :  { %299 = vst.msk [vmem:[%s558_s3 + $0x8] sm:$0xf] %vm296_vm1, %v354_v23  ;;  %307 = vst.msk [vmem:[%s558_s3 + $0x28] sm:$0xf] %vm296_vm1, %v362_v24  ;;  %v352_v31 = vpack.c.bf16 %v216_v25, %v216_v25  ;;  %v360_v32 = vpack.c.bf16 %v224_v26, %v224_v26  ;;  %v157_v33 = vadd.f32 %v473_v10, %v156_v29 }
  0xd2   :  { %v189_v34 = vadd.f32 %v473_v10, %v188_v30  ;;  %v219_v35 = vmax.f32 %v165_v27, 0.0  ;;  %v227_v36 = vmax.f32 %v197_v28, 0.0  ;;  %v388_v37 = vpop.f32.mrf.mxu0  ;;  %v396_v38 = vpop.f32.mrf.mxu1 }
  0xd3   :  { %297 = vst.msk [vmem:[%s558_s3] sm:$0xf] %vm296_vm1, %v352_v31  ;;  %305 = vst.msk [vmem:[%s558_s3 + $0x20] sm:$0xf] %vm296_vm1, %v360_v32  ;;  %v217_v39 = vmax.f32 %v157_v33, 0.0  ;;  %v178_v41 = vadd.f32 %v388_v37, %v473_v10  ;;  %v210_v42 = vadd.f32 %v396_v38, %v473_v10 }
  0xd4   :  { %v225_v40 = vmax.f32 %v189_v34, 0.0  ;;  %v355_v43 = vpack.c.bf16 %v219_v35, %v219_v35  ;;  %v363_v44 = vpack.c.bf16 %v227_v36, %v227_v36  ;;  %v169_v45 = vpop.f32.mrf.mxu0  ;;  %v201_v46 = vpop.f32.mrf.mxu1 }
  0xd5   :  { %v353_v47 = vpack.c.bf16 %v217_v39, %v217_v39  ;;  %v222_v49 = vmax.f32 %v178_v41, 0.0  ;;  %v230_v50 = vmax.f32 %v210_v42, 0.0  ;;  %v170_v51 = vadd.f32 %v473_v10, %v169_v45 }
  0xd6   :  { %v361_v48 = vpack.c.bf16 %v225_v40, %v225_v40  ;;  %300 = vst.msk [vmem:[%s558_s3 + $0xc] sm:$0xf] %vm296_vm1, %v355_v43  ;;  %308 = vst.msk [vmem:[%s558_s3 + $0x2c] sm:$0xf] %vm296_vm1, %v363_v44  ;;  %v202_v52 = vadd.f32 %v473_v10, %v201_v46  ;;  %v389_v53 = vpop.f32.mrf.mxu0  ;;  %v397_v54 = vpop.f32.mrf.mxu1 }
  0xd7   :  { %298 = vst.msk [vmem:[%s558_s3 + $0x4] sm:$0xf] %vm296_vm1, %v353_v47  ;;  %v358_v55 = vpack.c.bf16 %v222_v49, %v222_v49  ;;  %v366_v56 = vpack.c.bf16 %v230_v50, %v230_v50  ;;  %v181_v57 = vadd.f32 %v389_v53, %v473_v10  ;;  %v213_v58 = vadd.f32 %v397_v54, %v473_v10 }
  0xd8   :  { %306 = vst.msk [vmem:[%s558_s3 + $0x24] sm:$0xf] %vm296_vm1, %v361_v48  ;;  %v220_v59 = vmax.f32 %v170_v51, 0.0  ;;  %v228_v60 = vmax.f32 %v202_v52, 0.0  ;;  %v172_v61 = vpop.f32.mrf.mxu0  ;;  %v204_v62 = vpop.f32.mrf.mxu1 }
  0xd9   :  { %303 = vst.msk [vmem:[%s558_s3 + $0x18] sm:$0xf] %vm296_vm1, %v358_v55  ;;  %311 = vst.msk [vmem:[%s558_s3 + $0x38] sm:$0xf] %vm296_vm1, %v366_v56  ;;  %v223_v63 = vmax.f32 %v181_v57, 0.0  ;;  %v231_v0 = vmax.f32 %v213_v58, 0.0  ;;  %v173_v1 = vadd.f32 %v473_v10, %v172_v61  ;;  %v205_v2 = vadd.f32 %v473_v10, %v204_v62 }
  0xda   :  { %v356_v3 = vpack.c.bf16 %v220_v59, %v220_v59  ;;  %v364_v4 = vpack.c.bf16 %v228_v60, %v228_v60 }
  0xdb   :  { %v359_v5 = vpack.c.bf16 %v223_v63, %v223_v63  ;;  %v367_v6 = vpack.c.bf16 %v231_v0, %v231_v0  ;;  %v221_v7 = vmax.f32 %v173_v1, 0.0  ;;  %v229_v8 = vmax.f32 %v205_v2, 0.0 }
  0xdc   :  { %301 = vst.msk [vmem:[%s558_s3 + $0x10] sm:$0xf] %vm296_vm1, %v356_v3  ;;  %309 = vst.msk [vmem:[%s558_s3 + $0x30] sm:$0xf] %vm296_vm1, %v364_v4 }
  0xdd   :  { %304 = vst.msk [vmem:[%s558_s3 + $0x1c] sm:$0xf] %vm296_vm1, %v359_v5  ;;  %312 = vst.msk [vmem:[%s558_s3 + $0x3c] sm:$0xf] %vm296_vm1, %v367_v6  ;;  %v357_v9 = vpack.c.bf16 %v221_v7, %v221_v7  ;;  %v365_v10 = vpack.c.bf16 %v229_v8, %v229_v8 }
  0xdf   :  { %302 = vst.msk [vmem:[%s558_s3 + $0x14] sm:$0xf] %vm296_vm1, %v357_v9  ;;  %310 = vst.msk [vmem:[%s558_s3 + $0x34] sm:$0xf] %vm296_vm1, %v365_v10 }

// kernel: resnet_forward.23
= control target key start
LH: loop header
LB: loop body
LE: loop exit
PB: predicated region body
PF: predicated region fallthrough
CT: control target
= control target key end

     0   :  { %v523_v0 = vmov 0   ;;  %vm182_vm0 = vcmask 130048   ;;  %vm384_vm1 = vcmask 125952   ;;  %s712_s1 = inlined_call_operand.vmem [shape: bf16[144,16], index: 1, kind: input, shape index: {}]   ;;  %s713_s0 = inlined_call_operand.vmem [shape: bf16[128,144], index: 0, kind: input, shape index: {}]   ;;  %s714_s2 = inlined_call_operand.vmem [shape: f32[1,16], index: 2, kind: input, shape index: {}]   ;;  %s715_s3 = inlined_call_operand.vmem [shape: bf16[128,16], index: 3, kind: output, shape index: {}]  }
   0x1   :  { %207 = vmatprep.subr.bf16.mxu0 %v523_v0  ;;  %471 = vmatprep.subr.bf16.mxu1 %v523_v0  ;;  %v490_v1 = vld [vmem:[%s712_s1 + $0x38] sm:$0xff]   ;;  %v491_v2 = vld [vmem:[%s712_s1 + $0x30] sm:$0xff]   ;;  %v492_v3 = vld [vmem:[%s712_s1 + $0x28] sm:$0xff]  }
   0x2   :  { %208 = vmatpush1.bf16.msra.mxu0 %v490_v1  ;;  %480 = vmatpush1.bf16.msra.mxu1 %v490_v1  ;;  %v493_v4 = vld [vmem:[%s712_s1 + $0x20] sm:$0xff]   ;;  %v494_v7 = vld [vmem:[%s712_s1 + $0x18] sm:$0xff]   ;;  %v495_v8 = vld [vmem:[%s712_s1 + $0x10] sm:$0xff]  }
   0x3   :  { %209 = vmatprep.subr.bf16.mxu0 %v523_v0  ;;  %472 = vmatprep.subr.bf16.mxu1 %v523_v0  ;;  %v501_v5 = vld [vmem:[%s713_s0 + $0x4] ss:$8 sps:$4 sm:$0xff]   ;;  %v499_v12 = vld [vmem:[%s713_s0] ss:$8 sps:$4 sm:$0xff]   ;;  %v505_v14 = vld [vmem:[%s713_s0 + $0x14] ss:$8 sps:$4 sm:$0xff]  }
   0x4   :  { %v504_v6 = vld [vmem:[%s713_s0 + $0x44] ss:$8 sps:$4 sm:$0xff]   ;;  %431 = vmatprep.mubr.msk.bf16.mxu0 %vm182_vm0, %v501_v5  ;;  %v502_v13 = vld [vmem:[%s713_s0 + $0x40] ss:$8 sps:$4 sm:$0xff]   ;;  %v507_v15 = vld [vmem:[%s713_s0 + $0x54] ss:$8 sps:$4 sm:$0xff]  }
   0x5   :  { %435 = vmatprep.mubr.msk.bf16.mxu1 %vm182_vm0, %v504_v6  ;;  %v496_v9 = vld [vmem:[%s712_s1 + $0x8] sm:$0xff]   ;;  %v497_v10 = vld [vmem:[%s712_s1] sm:$0xff]   ;;  %v509_v16 = vld [vmem:[%s713_s0 + $0x10] ss:$8 sps:$4 sm:$0xff]  }
   0x6   :  { %210 = vmatpush1.bf16.msra.mxu0 %v491_v2  ;;  %481 = vmatpush1.bf16.msra.mxu1 %v491_v2  ;;  %v498_v11 = vld [vmem:[%s712_s1 + $0x40] sm:$0xff]   ;;  %v510_v17 = vld [vmem:[%s713_s0 + $0x50] ss:$8 sps:$4 sm:$0xff]   ;;  %v517_v22 = vld [vmem:[%s713_s0 + $0x34] ss:$8 sps:$4 sm:$0xff]  }
   0x7   :  { %211 = vmatprep.subr.bf16.mxu0 %v523_v0  ;;  %473 = vmatprep.subr.bf16.mxu1 %v523_v0  ;;  %v511_v18 = vld [vmem:[%s713_s0 + $0x24] ss:$8 sps:$4 sm:$0xff]   ;;  %v515_v20 = vld [vmem:[%s713_s0 + $0x20] ss:$8 sps:$4 sm:$0xff]   ;;  %v519_v23 = vld [vmem:[%s713_s0 + $0x74] ss:$8 sps:$4 sm:$0xff]  }
   0x8   :  { %v513_v19 = vld [vmem:[%s713_s0 + $0x64] ss:$8 sps:$4 sm:$0xff]   ;;  %v516_v21 = vld [vmem:[%s713_s0 + $0x60] ss:$8 sps:$4 sm:$0xff]   ;;  %v521_v24 = vld [vmem:[%s713_s0 + $0x30] ss:$8 sps:$4 sm:$0xff]  }
   0x9   :  { %v522_v25 = vld [vmem:[%s713_s0 + $0x70] ss:$8 sps:$4 sm:$0xff]   ;;  %v630_v26 = vld [vmem:[%s714_s2] ss:$0 sm:$0xff] }
   0xa   :  { %212 = vmatpush1.bf16.msra.mxu0 %v492_v3  ;;  %482 = vmatpush1.bf16.msra.mxu1 %v492_v3 }
   0xb   :  { %213 = vmatprep.subr.bf16.mxu0 %v523_v0  ;;  %474 = vmatprep.subr.bf16.mxu1 %v523_v0 }
   0xe   :  { %214 = vmatpush1.bf16.msra.mxu0 %v493_v4  ;;  %483 = vmatpush1.bf16.msra.mxu1 %v493_v4 }
   0xf   :  { %215 = vmatprep.subr.bf16.mxu0 %v523_v0  ;;  %475 = vmatprep.subr.bf16.mxu1 %v523_v0 }
  0x12   :  { %216 = vmatpush1.bf16.msra.mxu0 %v494_v7  ;;  %484 = vmatpush1.bf16.msra.mxu1 %v494_v7 }
  0x13   :  { %217 = vmatprep.subr.bf16.mxu0 %v523_v0  ;;  %476 = vmatprep.subr.bf16.mxu1 %v523_v0 }
  0x16   :  { %218 = vmatpush1.bf16.msra.mxu0 %v495_v8  ;;  %485 = vmatpush1.bf16.msra.mxu1 %v495_v8 }
  0x17   :  { %219 = vmatprep.subr.bf16.mxu0 %v523_v0  ;;  %477 = vmatprep.subr.bf16.mxu1 %v523_v0 }
  0x1a   :  { %220 = vmatpush1.bf16.msra.mxu0 %v496_v9  ;;  %486 = vmatpush1.bf16.msra.mxu1 %v496_v9 }
  0x1b   :  { %221 = vmatprep.subr.bf16.mxu0 %v523_v0  ;;  %478 = vmatprep.subr.bf16.mxu1 %v523_v0 }
  0x1e   :  { %222 = vmatpush1.bf16.msra.mxu0 %v497_v10  ;;  %487 = vmatpush1.bf16.msra.mxu1 %v497_v10 }
  0x1f   :  { %237 = vmatprep.subr.bf16.mxu0 %v523_v0  ;;  %479 = vmatprep.subr.bf16.mxu1 %v523_v0 }
  0x22   :  { %238 = vmatpush2.bf16.msra.mxu0 %v498_v11  ;;  %488 = vmatpush2.bf16.msra.mxu1 %v498_v11 }
  0x25   :  { %240 = vmatmul.mubr.bf16.vlgmr.msra.gmra.mxu0 %v499_v12  ;;  %272 = vmatmul.mubr.bf16.vlgmr.msra.gmra.mxu1 %v502_v13 }
  0x26   :  { %432 = vmatprep.mubr.msk.bf16.mxu0 %vm182_vm0, %v505_v14  ;;  %436 = vmatprep.mubr.msk.bf16.mxu1 %vm182_vm0, %v507_v15 }
  0x2d   :  { %248 = vmatmul.mubr.bf16.gmra.mxu0 %v509_v16  ;;  %280 = vmatmul.mubr.bf16.gmra.mxu1 %v510_v17 }
  0x2e   :  { %433 = vmatprep.mubr.msk.bf16.mxu0 %vm182_vm0, %v511_v18  ;;  %437 = vmatprep.mubr.msk.bf16.mxu1 %vm182_vm0, %v513_v19 }
  0x35   :  { %256 = vmatmul.mubr.bf16.gmra.mxu0 %v515_v20  ;;  %288 = vmatmul.mubr.bf16.gmra.mxu1 %v516_v21 }
  0x36   :  { %434 = vmatprep.mubr.msk.bf16.mxu0 %vm182_vm0, %v517_v22  ;;  %438 = vmatprep.mubr.msk.bf16.mxu1 %vm182_vm0, %v519_v23 }
  0x3d   :  { %264 = vmatmul.mubr.bf16.gmra.mxu0 %v521_v24  ;;  %296 = vmatmul.mubr.bf16.gmra.mxu1 %v522_v25 }
  0xe5   :  { %v241_v27 = vpop.f32.mrf.mxu0  ;;  %v273_v28 = vpop.f32.mrf.mxu1 }
  0xe6   :  { %v242_v29 = vadd.f32 %v630_v26, %v241_v27  ;;  %v274_v30 = vadd.f32 %v630_v26, %v273_v28 }
  0xe7   :  { %v243_v31 = vpop.f32.mrf.mxu0  ;;  %v275_v32 = vpop.f32.mrf.mxu1 }
  0xe8   :  { %v304_v33 = vmax.f32 %v242_v29, 0.0  ;;  %v312_v34 = vmax.f32 %v274_v30, 0.0 }
  0xe9   :  { %v244_v35 = vpop.f32.mrf.mxu0  ;;  %v276_v36 = vpop.f32.mrf.mxu1 }
  0xea   :  { %v455_v37 = vpack.c.bf16 %v304_v33, %v304_v33  ;;  %v463_v38 = vpack.c.bf16 %v312_v34, %v312_v34  ;;  %v245_v39 = vadd.f32 %v630_v26, %v244_v35  ;;  %v277_v40 = vadd.f32 %v630_v26, %v276_v36 }
  0xeb   :  { %v246_v41 = vpop.f32.mrf.mxu0  ;;  %v278_v42 = vpop.f32.mrf.mxu1 }
  0xec   :  { %385 = vst.msk [vmem:[%s715_s3] sm:$0xf] %vm384_vm1, %v455_v37  ;;  %393 = vst.msk [vmem:[%s715_s3 + $0x20] sm:$0xf] %vm384_vm1, %v463_v38  ;;  %v305_v43 = vmax.f32 %v245_v39, 0.0  ;;  %v313_v44 = vmax.f32 %v277_v40, 0.0 }
  0xed   :  { %v249_v45 = vpop.f32.mrf.mxu0  ;;  %v281_v46 = vpop.f32.mrf.mxu1 }
  0xee   :  { %v456_v47 = vpack.c.bf16 %v305_v43, %v305_v43  ;;  %v464_v48 = vpack.c.bf16 %v313_v44, %v313_v44  ;;  %v250_v49 = vadd.f32 %v630_v26, %v249_v45  ;;  %v282_v50 = vadd.f32 %v630_v26, %v281_v46 }
  0xef   :  { %v251_v51 = vpop.f32.mrf.mxu0  ;;  %v283_v52 = vpop.f32.mrf.mxu1 }
  0xf0   :  { %386 = vst.msk [vmem:[%s715_s3 + $0x4] sm:$0xf] %vm384_vm1, %v456_v47  ;;  %394 = vst.msk [vmem:[%s715_s3 + $0x24] sm:$0xf] %vm384_vm1, %v464_v48  ;;  %v306_v53 = vmax.f32 %v250_v49, 0.0  ;;  %v314_v54 = vmax.f32 %v282_v50, 0.0 }
  0xf1   :  { %v252_v55 = vpop.f32.mrf.mxu0  ;;  %v284_v56 = vpop.f32.mrf.mxu1 }
  0xf2   :  { %v457_v57 = vpack.c.bf16 %v306_v53, %v306_v53  ;;  %v465_v58 = vpack.c.bf16 %v314_v54, %v314_v54  ;;  %v253_v59 = vadd.f32 %v630_v26, %v252_v55  ;;  %v285_v60 = vadd.f32 %v630_v26, %v284_v56 }
  0xf3   :  { %v254_v61 = vpop.f32.mrf.mxu0  ;;  %v286_v62 = vpop.f32.mrf.mxu1 }
  0xf4   :  { %387 = vst.msk [vmem:[%s715_s3 + $0x8] sm:$0xf] %vm384_vm1, %v457_v57  ;;  %395 = vst.msk [vmem:[%s715_s3 + $0x28] sm:$0xf] %vm384_vm1, %v465_v58  ;;  %v307_v63 = vmax.f32 %v253_v59, 0.0  ;;  %v315_v0 = vmax.f32 %v285_v60, 0.0 }
  0xf5   :  { %v257_v1 = vpop.f32.mrf.mxu0  ;;  %v289_v2 = vpop.f32.mrf.mxu1 }
  0xf6   :  { %v458_v3 = vpack.c.bf16 %v307_v63, %v307_v63  ;;  %v466_v4 = vpack.c.bf16 %v315_v0, %v315_v0  ;;  %v258_v5 = vadd.f32 %v630_v26, %v257_v1  ;;  %v290_v6 = vadd.f32 %v630_v26, %v289_v2 }
  0xf7   :  { %v259_v7 = vpop.f32.mrf.mxu0  ;;  %v291_v8 = vpop.f32.mrf.mxu1 }
  0xf8   :  { %388 = vst.msk [vmem:[%s715_s3 + $0xc] sm:$0xf] %vm384_vm1, %v458_v3  ;;  %396 = vst.msk [vmem:[%s715_s3 + $0x2c] sm:$0xf] %vm384_vm1, %v466_v4  ;;  %v308_v9 = vmax.f32 %v258_v5, 0.0  ;;  %v316_v10 = vmax.f32 %v290_v6, 0.0 }
  0xf9   :  { %v260_v11 = vpop.f32.mrf.mxu0  ;;  %v292_v12 = vpop.f32.mrf.mxu1 }
  0xfa   :  { %v459_v13 = vpack.c.bf16 %v308_v9, %v308_v9  ;;  %v467_v14 = vpack.c.bf16 %v316_v10, %v316_v10  ;;  %v261_v15 = vadd.f32 %v630_v26, %v260_v11  ;;  %v293_v16 = vadd.f32 %v630_v26, %v292_v12 }
  0xfb   :  { %v262_v17 = vpop.f32.mrf.mxu0  ;;  %v294_v18 = vpop.f32.mrf.mxu1 }
  0xfc   :  { %389 = vst.msk [vmem:[%s715_s3 + $0x10] sm:$0xf] %vm384_vm1, %v459_v13  ;;  %397 = vst.msk [vmem:[%s715_s3 + $0x30] sm:$0xf] %vm384_vm1, %v467_v14  ;;  %v309_v19 = vmax.f32 %v261_v15, 0.0  ;;  %v317_v20 = vmax.f32 %v293_v16, 0.0 }
  0xfd   :  { %v265_v21 = vpop.f32.mrf.mxu0  ;;  %v297_v22 = vpop.f32.mrf.mxu1 }
  0xfe   :  { %v460_v23 = vpack.c.bf16 %v309_v19, %v309_v19  ;;  %v468_v24 = vpack.c.bf16 %v317_v20, %v317_v20  ;;  %v266_v25 = vadd.f32 %v630_v26, %v265_v21  ;;  %v298_v27 = vadd.f32 %v630_v26, %v297_v22 }
  0xff   :  { %v267_v28 = vpop.f32.mrf.mxu0  ;;  %v299_v29 = vpop.f32.mrf.mxu1 }
 0x100   :  { %390 = vst.msk [vmem:[%s715_s3 + $0x14] sm:$0xf] %vm384_vm1, %v460_v23  ;;  %398 = vst.msk [vmem:[%s715_s3 + $0x34] sm:$0xf] %vm384_vm1, %v468_v24  ;;  %v310_v30 = vmax.f32 %v266_v25, 0.0  ;;  %v318_v31 = vmax.f32 %v298_v27, 0.0 }
 0x101   :  { %v268_v32 = vpop.f32.mrf.mxu0  ;;  %v300_v33 = vpop.f32.mrf.mxu1 }
 0x102   :  { %v461_v34 = vpack.c.bf16 %v310_v30, %v310_v30  ;;  %v469_v35 = vpack.c.bf16 %v318_v31, %v318_v31  ;;  %v269_v36 = vadd.f32 %v630_v26, %v268_v32  ;;  %v301_v37 = vadd.f32 %v630_v26, %v300_v33 }
 0x103   :  { %v270_v38 = vpop.f32.mrf.mxu0  ;;  %v302_v39 = vpop.f32.mrf.mxu1 }
 0x104   :  { %391 = vst.msk [vmem:[%s715_s3 + $0x18] sm:$0xf] %vm384_vm1, %v461_v34  ;;  %399 = vst.msk [vmem:[%s715_s3 + $0x38] sm:$0xf] %vm384_vm1, %v469_v35  ;;  %v311_v40 = vmax.f32 %v269_v36, 0.0  ;;  %v319_v41 = vmax.f32 %v301_v37, 0.0 }
 0x106   :  { %v462_v42 = vpack.c.bf16 %v311_v40, %v311_v40  ;;  %v470_v43 = vpack.c.bf16 %v319_v41, %v319_v41 }
 0x108   :  { %392 = vst.msk [vmem:[%s715_s3 + $0x1c] sm:$0xf] %vm384_vm1, %v462_v42  ;;  %400 = vst.msk [vmem:[%s715_s3 + $0x3c] sm:$0xf] %vm384_vm1, %v470_v43 }

// kernel: resnet_forward.24
= control target key start
LH: loop header
LB: loop body
LE: loop exit
PB: predicated region body
PF: predicated region fallthrough
CT: control target
= control target key end

     0   :  { %vm94_vm0 = vcmask 261120   ;;  %vm280_vm1 = vcmask 519168   ;;  %s521_s1 = inlined_call_operand.vmem [shape: bf16[32,64], index: 1, kind: input, shape index: {}]   ;;  %s522_s0 = inlined_call_operand.vmem [shape: bf16[128,32], index: 0, kind: input, shape index: {}]   ;;  %s523_s2 = inlined_call_operand.vmem [shape: f32[1,64], index: 2, kind: input, shape index: {}]   ;;  %s524_s3 = inlined_call_operand.vmem [shape: bf16[128,64], index: 3, kind: output, shape index: {}]  }
   0x1   :  { %v386_v0 = vld [vmem:[%s521_s1 + $0x8] sm:$0xff]   ;;  %v387_v1 = vld [vmem:[%s521_s1] sm:$0xff]   ;;  %v392_v6 = vld [vmem:[%s522_s0 + $0x10] sm:$0xff]  }
   0x2   :  { %362 = vmatprep.subr.bf16.mxu0 %v386_v0  ;;  %382 = vmatprep.subr.bf16.mxu1 %v386_v0  ;;  %v388_v2 = vld [vmem:[%s522_s0] sm:$0xff]   ;;  %v390_v4 = vld [vmem:[%s522_s0 + $0x8] sm:$0xff]   ;;  %v393_v7 = vld [vmem:[%s522_s0 + $0x30] sm:$0xff]  }
   0x3   :  { %363 = vmatpush3.bf16.msra.mxu0 %v386_v0  ;;  %384 = vmatpush3.bf16.msra.mxu1 %v386_v0  ;;  %v389_v3 = vld [vmem:[%s522_s0 + $0x20] sm:$0xff]   ;;  %v391_v5 = vld [vmem:[%s522_s0 + $0x28] sm:$0xff]   ;;  %v394_v8 = vld [vmem:[%s522_s0 + $0x18] sm:$0xff]  }
   0x4   :  { %364 = vmatprep.subr.bf16.mxu0 %v387_v1  ;;  %383 = vmatprep.subr.bf16.mxu1 %v387_v1  ;;  %v395_v9 = vld [vmem:[%s522_s0 + $0x38] sm:$0xff]   ;;  %v301_v10 = vld [vmem:[%s523_s2] ss:$0 sm:$0xff] }
   0x5   :  { %366 = vmatprep.mubr.msk.bf16.mxu0 %vm94_vm0, %v388_v2  ;;  %374 = vmatprep.mubr.msk.bf16.mxu1 %vm94_vm0, %v389_v3 }
   0x7   :  { %365 = vmatpush3.bf16.msra.mxu0 %v387_v1  ;;  %385 = vmatpush3.bf16.msra.mxu1 %v387_v1 }
   0xa   :  { %367 = vmatmul.mubr.msk.bf16.vlgmr.msra.gmra.mxu0 %vm94_vm0, %v390_v4  ;;  %375 = vmatmul.mubr.msk.bf16.vlgmr.msra.gmra.mxu1 %vm94_vm0, %v391_v5 }
   0xb   :  { %370 = vmatprep.mubr.msk.bf16.mxu0 %vm94_vm0, %v392_v6  ;;  %378 = vmatprep.mubr.msk.bf16.mxu1 %vm94_vm0, %v393_v7 }
  0x12   :  { %371 = vmatmul.mubr.msk.bf16.gmra.mxu0 %vm94_vm0, %v394_v8  ;;  %379 = vmatmul.mubr.msk.bf16.gmra.mxu1 %vm94_vm0, %v395_v9 }
  0xca   :  { %v368_v11 = vpop.f32.mrf.mxu0  ;;  %v376_v12 = vpop.f32.mrf.mxu1 }
  0xcb   :  { %v162_v13 = vadd.f32 %v368_v11, %v301_v10  ;;  %v194_v14 = vadd.f32 %v376_v12, %v301_v10 }
  0xcc   :  { %v153_v15 = vpop.f32.mrf.mxu0  ;;  %v185_v16 = vpop.f32.mrf.mxu1 }
  0xcd   :  { %v338_v17 = vpack.c.bf16 %v162_v13, %v162_v13  ;;  %v346_v18 = vpack.c.bf16 %v194_v14, %v194_v14  ;;  %v154_v19 = vadd.f32 %v301_v10, %v153_v15  ;;  %v186_v20 = vadd.f32 %v301_v10, %v185_v16 }
  0xce   :  { %v369_v21 = vpop.f32.mrf.mxu0  ;;  %v377_v22 = vpop.f32.mrf.mxu1 }
  0xcf   :  { %283 = vst.msk [vmem:[%s524_s3 + $0x8] sm:$0xf] %vm280_vm1, %v338_v17  ;;  %291 = vst.msk [vmem:[%s524_s3 + $0x28] sm:$0xf] %vm280_vm1, %v346_v18  ;;  %v336_v23 = vpack.c.bf16 %v154_v19, %v154_v19  ;;  %v344_v24 = vpack.c.bf16 %v186_v20, %v186_v20  ;;  %v165_v25 = vadd.f32 %v369_v21, %v301_v10 }
  0xd0   :  { %v197_v26 = vadd.f32 %v377_v22, %v301_v10  ;;  %v156_v27 = vpop.f32.mrf.mxu0  ;;  %v188_v28 = vpop.f32.mrf.mxu1 }
  0xd1   :  { %281 = vst.msk [vmem:[%s524_s3] sm:$0xf] %vm280_vm1, %v336_v23  ;;  %289 = vst.msk [vmem:[%s524_s3 + $0x20] sm:$0xf] %vm280_vm1, %v344_v24  ;;  %v339_v29 = vpack.c.bf16 %v165_v25, %v165_v25  ;;  %v157_v31 = vadd.f32 %v301_v10, %v156_v27  ;;  %v189_v32 = vadd.f32 %v301_v10, %v188_v28 }
  0xd2   :  { %v347_v30 = vpack.c.bf16 %v197_v26, %v197_v26  ;;  %v372_v33 = vpop.f32.mrf.mxu0  ;;  %v380_v34 = vpop.f32.mrf.mxu1 }
  0xd3   :  { %284 = vst.msk [vmem:[%s524_s3 + $0xc] sm:$0xf] %vm280_vm1, %v339_v29  ;;  %v337_v35 = vpack.c.bf16 %v157_v31, %v157_v31  ;;  %v345_v36 = vpack.c.bf16 %v189_v32, %v189_v32  ;;  %v178_v37 = vadd.f32 %v372_v33, %v301_v10  ;;  %v210_v38 = vadd.f32 %v380_v34, %v301_v10 }
  0xd4   :  { %292 = vst.msk [vmem:[%s524_s3 + $0x2c] sm:$0xf] %vm280_vm1, %v347_v30  ;;  %v169_v39 = vpop.f32.mrf.mxu0  ;;  %v201_v40 = vpop.f32.mrf.mxu1 }
  0xd5   :  { %282 = vst.msk [vmem:[%s524_s3 + $0x4] sm:$0xf] %vm280_vm1, %v337_v35  ;;  %290 = vst.msk [vmem:[%s524_s3 + $0x24] sm:$0xf] %vm280_vm1, %v345_v36  ;;  %v342_v41 = vpack.c.bf16 %v178_v37, %v178_v37  ;;  %v350_v42 = vpack.c.bf16 %v210_v38, %v210_v38  ;;  %v170_v43 = vadd.f32 %v301_v10, %v169_v39 }
  0xd6   :  { %v202_v44 = vadd.f32 %v301_v10, %v201_v40  ;;  %v373_v45 = vpop.f32.mrf.mxu0  ;;  %v381_v46 = vpop.f32.mrf.mxu1 }
  0xd7   :  { %287 = vst.msk [vmem:[%s524_s3 + $0x18] sm:$0xf] %vm280_vm1, %v342_v41  ;;  %295 = vst.msk [vmem:[%s524_s3 + $0x38] sm:$0xf] %vm280_vm1, %v350_v42  ;;  %v340_v47 = vpack.c.bf16 %v170_v43, %v170_v43  ;;  %v181_v49 = vadd.f32 %v373_v45, %v301_v10  ;;  %v213_v50 = vadd.f32 %v381_v46, %v301_v10 }
  0xd8   :  { %v348_v48 = vpack.c.bf16 %v202_v44, %v202_v44  ;;  %v172_v51 = vpop.f32.mrf.mxu0  ;;  %v204_v52 = vpop.f32.mrf.mxu1 }
  0xd9   :  { %285 = vst.msk [vmem:[%s524_s3 + $0x10] sm:$0xf] %vm280_vm1, %v340_v47  ;;  %v343_v53 = vpack.c.bf16 %v181_v49, %v181_v49  ;;  %v351_v54 = vpack.c.bf16 %v213_v50, %v213_v50  ;;  %v173_v55 = vadd.f32 %v301_v10, %v172_v51  ;;  %v205_v56 = vadd.f32 %v301_v10, %v204_v52 }
  0xda   :  { %293 = vst.msk [vmem:[%s524_s3 + $0x30] sm:$0xf] %vm280_vm1, %v348_v48 }
  0xdb   :  { %288 = vst.msk [vmem:[%s524_s3 + $0x1c] sm:$0xf] %vm280_vm1, %v343_v53  ;;  %296 = vst.msk [vmem:[%s524_s3 + $0x3c] sm:$0xf] %vm280_vm1, %v351_v54  ;;  %v341_v57 = vpack.c.bf16 %v173_v55, %v173_v55  ;;  %v349_v58 = vpack.c.bf16 %v205_v56, %v205_v56 }
  0xdd   :  { %286 = vst.msk [vmem:[%s524_s3 + $0x14] sm:$0xf] %vm280_vm1, %v341_v57  ;;  %294 = vst.msk [vmem:[%s524_s3 + $0x34] sm:$0xf] %vm280_vm1, %v349_v58 }

// kernel: resnet_forward.25
= control target key start
LH: loop header
LB: loop body
LE: loop exit
PB: predicated region body
PF: predicated region fallthrough
CT: control target
= control target key end

     0   :  { %vm89_vm0 = vcmask 130048   ;;  %vm339_vm1 = vcmask 519168   ;;  %s688_s1 = inlined_call_operand.vmem [shape: bf16[16,64], index: 1, kind: input, shape index: {}]   ;;  %s689_s0 = inlined_call_operand.vmem [shape: bf16[128,16], index: 0, kind: input, shape index: {}]   ;;  %s690_s3 = inlined_call_operand.vmem [shape: bf16[128,64], index: 3, kind: input, shape index: {}]   ;;  %s691_s2 = inlined_call_operand.vmem [shape: f32[1,64], index: 2, kind: input, shape index: {}]   ;;  %s692_s4 = inlined_call_operand.vmem [shape: bf16[128,64], index: 4, kind: output, shape index: {}]  }
   0x1   :  { %v478_v0 = vld [vmem:[%s688_s1] sm:$0xff]   ;;  %v481_v3 = vld [vmem:[%s689_s0 + $0x8] sm:$0xff]   ;;  %v483_v5 = vld [vmem:[%s689_s0 + $0x10] sm:$0xff]  }
   0x2   :  { %v479_v1 = vld [vmem:[%s689_s0] sm:$0xff]   ;;  %458 = vmatprep.subr.bf16.mxu0 %v478_v0  ;;  %476 = vmatprep.subr.bf16.mxu1 %v478_v0  ;;  %v482_v4 = vld [vmem:[%s689_s0 + $0x28] sm:$0xff]   ;;  %v484_v6 = vld [vmem:[%s689_s0 + $0x30] sm:$0xff]  }
   0x3   :  { %v480_v2 = vld [vmem:[%s689_s0 + $0x20] sm:$0xff]   ;;  %459 = vmatpush3.bf16.msra.mxu0 %v478_v0  ;;  %477 = vmatpush3.bf16.msra.mxu1 %v478_v0  ;;  %v485_v7 = vld [vmem:[%s689_s0 + $0x18] sm:$0xff]   ;;  %v442_v9 = vld [vmem:[%s690_s3 + $0x8] sm:$0xff]  }
   0x4   :  { %460 = vmatprep.mubr.msk.bf16.mxu0 %vm89_vm0, %v479_v1  ;;  %468 = vmatprep.mubr.msk.bf16.mxu1 %vm89_vm0, %v480_v2  ;;  %v486_v8 = vld [vmem:[%s689_s0 + $0x38] sm:$0xff]   ;;  %v446_v10 = vld [vmem:[%s690_s3 + $0x28] sm:$0xff]   ;;  %v556_v11 = vld [vmem:[%s690_s3] sm:$0xff]   ;;  %v416_v14 = vunpack.c.l.bf16 %v442_v9  ;;  %v417_v22 = vunpack.c.h.bf16 %v442_v9 }
   0x5   :  { %v561_v12 = vld [vmem:[%s690_s3 + $0x20] sm:$0xff]   ;;  %v432_v15 = vunpack.c.l.bf16 %v446_v10  ;;  %v571_v16 = vld [vmem:[%s690_s3 + $0x18] sm:$0xff]   ;;  %v412_v20 = vunpack.c.l.bf16 %v556_v11  ;;  %v433_v25 = vunpack.c.h.bf16 %v446_v10  ;;  %v585_v26 = vld [vmem:[%s690_s3 + $0x10] sm:$0xff]   ;;  %v413_v30 = vunpack.c.h.bf16 %v556_v11 }
   0x6   :  { %461 = vmatmul.mubr.msk.bf16.vlgmr.msra.gmra.mxu0 %vm89_vm0, %v481_v3  ;;  %469 = vmatmul.mubr.msk.bf16.vlgmr.msra.gmra.mxu1 %vm89_vm0, %v482_v4  ;;  %v566_v13 = vld [vmem:[%s691_s2] ss:$0 sm:$0xff]  ;;  %v576_v17 = vld [vmem:[%s690_s3 + $0x38] sm:$0xff]   ;;  %v428_v21 = vunpack.c.l.bf16 %v561_v12  ;;  %v590_v27 = vld [vmem:[%s690_s3 + $0x30] sm:$0xff]   ;;  %v429_v31 = vunpack.c.h.bf16 %v561_v12  ;;  %v424_v32 = vunpack.c.l.bf16 %v571_v16  ;;  %v420_v40 = vunpack.c.l.bf16 %v585_v26 }
   0x7   :  { %464 = vmatprep.mubr.msk.bf16.mxu0 %vm89_vm0, %v483_v5  ;;  %472 = vmatprep.mubr.msk.bf16.mxu1 %vm89_vm0, %v484_v6  ;;  %v440_v33 = vunpack.c.l.bf16 %v576_v17  ;;  %v436_v41 = vunpack.c.l.bf16 %v590_v27  ;;  %v425_v42 = vunpack.c.h.bf16 %v571_v16  ;;  %v441_v43 = vunpack.c.h.bf16 %v576_v17 }
   0x8   :  { %v421_v52 = vunpack.c.h.bf16 %v585_v26  ;;  %v437_v53 = vunpack.c.h.bf16 %v590_v27 }
   0xe   :  { %465 = vmatmul.mubr.msk.bf16.gmra.mxu0 %vm89_vm0, %v485_v7  ;;  %473 = vmatmul.mubr.msk.bf16.gmra.mxu1 %vm89_vm0, %v486_v8 }
  0xc6   :  { %v462_v18 = vpop.f32.mrf.mxu0  ;;  %v470_v19 = vpop.f32.mrf.mxu1 }
  0xc7   :  { %v157_v23 = vadd.f32 %v462_v18, %v566_v13  ;;  %v189_v24 = vadd.f32 %v470_v19, %v566_v13 }
  0xc8   :  { %v148_v28 = vpop.f32.mrf.mxu0  ;;  %v180_v29 = vpop.f32.mrf.mxu1 }
  0xc9   :  { %v245_v34 = vadd.f32 %v416_v14, %v157_v23  ;;  %v253_v35 = vadd.f32 %v432_v15, %v189_v24  ;;  %v149_v36 = vadd.f32 %v566_v13, %v148_v28  ;;  %v181_v37 = vadd.f32 %v566_v13, %v180_v29 }
  0xca   :  { %v463_v38 = vpop.f32.mrf.mxu0  ;;  %v471_v39 = vpop.f32.mrf.mxu1 }
  0xcb   :  { %v261_v44 = vmax.f32 %v245_v34, 0.0  ;;  %v269_v45 = vmax.f32 %v253_v35, 0.0  ;;  %v243_v46 = vadd.f32 %v412_v20, %v149_v36  ;;  %v251_v47 = vadd.f32 %v428_v21, %v181_v37 }
  0xcc   :  { %v160_v48 = vadd.f32 %v463_v38, %v566_v13  ;;  %v192_v49 = vadd.f32 %v471_v39, %v566_v13  ;;  %v151_v50 = vpop.f32.mrf.mxu0  ;;  %v183_v51 = vpop.f32.mrf.mxu1 }
  0xcd   :  { %v396_v54 = vpack.c.bf16 %v261_v44, %v261_v44  ;;  %v404_v55 = vpack.c.bf16 %v269_v45, %v269_v45  ;;  %v259_v56 = vmax.f32 %v243_v46, 0.0  ;;  %v267_v57 = vmax.f32 %v251_v47, 0.0 }
  0xce   :  { %v246_v58 = vadd.f32 %v417_v22, %v160_v48  ;;  %v254_v59 = vadd.f32 %v433_v25, %v192_v49  ;;  %v152_v60 = vadd.f32 %v566_v13, %v151_v50  ;;  %v184_v61 = vadd.f32 %v566_v13, %v183_v51  ;;  %v466_v62 = vpop.f32.mrf.mxu0  ;;  %v474_v63 = vpop.f32.mrf.mxu1 }
  0xcf   :  { %342 = vst.msk [vmem:[%s692_s4 + $0x8] sm:$0xf] %vm339_vm1, %v396_v54  ;;  %350 = vst.msk [vmem:[%s692_s4 + $0x28] sm:$0xf] %vm339_vm1, %v404_v55  ;;  %v394_v0 = vpack.c.bf16 %v259_v56, %v259_v56  ;;  %v402_v1 = vpack.c.bf16 %v267_v57, %v267_v57  ;;  %v173_v2 = vadd.f32 %v466_v62, %v566_v13 }
  0xd0   :  { %v205_v3 = vadd.f32 %v474_v63, %v566_v13  ;;  %v262_v4 = vmax.f32 %v246_v58, 0.0  ;;  %v270_v5 = vmax.f32 %v254_v59, 0.0  ;;  %v244_v6 = vadd.f32 %v413_v30, %v152_v60  ;;  %v164_v8 = vpop.f32.mrf.mxu0  ;;  %v196_v9 = vpop.f32.mrf.mxu1 }
  0xd1   :  { %v252_v7 = vadd.f32 %v429_v31, %v184_v61  ;;  %340 = vst.msk [vmem:[%s692_s4] sm:$0xf] %vm339_vm1, %v394_v0  ;;  %348 = vst.msk [vmem:[%s692_s4 + $0x20] sm:$0xf] %vm339_vm1, %v402_v1  ;;  %v249_v10 = vadd.f32 %v424_v32, %v173_v2  ;;  %v165_v12 = vadd.f32 %v566_v13, %v164_v8 }
  0xd2   :  { %v257_v11 = vadd.f32 %v440_v33, %v205_v3  ;;  %v197_v14 = vadd.f32 %v566_v13, %v196_v9  ;;  %v397_v15 = vpack.c.bf16 %v262_v4, %v262_v4  ;;  %v405_v18 = vpack.c.bf16 %v270_v5, %v270_v5  ;;  %v467_v21 = vpop.f32.mrf.mxu0  ;;  %v475_v22 = vpop.f32.mrf.mxu1 }
  0xd3   :  { %v260_v19 = vmax.f32 %v244_v6, 0.0  ;;  %v268_v20 = vmax.f32 %v252_v7, 0.0  ;;  %v265_v23 = vmax.f32 %v249_v10, 0.0  ;;  %v247_v25 = vadd.f32 %v420_v40, %v165_v12 }
  0xd4   :  { %v273_v24 = vmax.f32 %v257_v11, 0.0  ;;  %v255_v28 = vadd.f32 %v436_v41, %v197_v14  ;;  %343 = vst.msk [vmem:[%s692_s4 + $0xc] sm:$0xf] %vm339_vm1, %v397_v15  ;;  %351 = vst.msk [vmem:[%s692_s4 + $0x2c] sm:$0xf] %vm339_vm1, %v405_v18  ;;  %v176_v31 = vadd.f32 %v467_v21, %v566_v13  ;;  %v208_v32 = vadd.f32 %v475_v22, %v566_v13  ;;  %v167_v33 = vpop.f32.mrf.mxu0  ;;  %v199_v34 = vpop.f32.mrf.mxu1 }
  0xd5   :  { %v395_v29 = vpack.c.bf16 %v260_v19, %v260_v19  ;;  %v403_v30 = vpack.c.bf16 %v268_v20, %v268_v20  ;;  %v400_v35 = vpack.c.bf16 %v265_v23, %v265_v23  ;;  %v263_v37 = vmax.f32 %v247_v25, 0.0 }
  0xd6   :  { %v408_v36 = vpack.c.bf16 %v273_v24, %v273_v24  ;;  %v271_v38 = vmax.f32 %v255_v28, 0.0  ;;  %v250_v39 = vadd.f32 %v425_v42, %v176_v31  ;;  %v258_v40 = vadd.f32 %v441_v43, %v208_v32 }
  0xd7   :  { %341 = vst.msk [vmem:[%s692_s4 + $0x4] sm:$0xf] %vm339_vm1, %v395_v29  ;;  %349 = vst.msk [vmem:[%s692_s4 + $0x24] sm:$0xf] %vm339_vm1, %v403_v30  ;;  %v168_v41 = vadd.f32 %v566_v13, %v167_v33  ;;  %v200_v44 = vadd.f32 %v566_v13, %v199_v34  ;;  %v398_v45 = vpack.c.bf16 %v263_v37, %v263_v37 }
  0xd8   :  { %346 = vst.msk [vmem:[%s692_s4 + $0x18] sm:$0xf] %vm339_vm1, %v400_v35  ;;  %354 = vst.msk [vmem:[%s692_s4 + $0x38] sm:$0xf] %vm339_vm1, %v408_v36  ;;  %v406_v16 = vpack.c.bf16 %v271_v38, %v271_v38  ;;  %v266_v42 = vmax.f32 %v250_v39, 0.0  ;;  %v274_v46 = vmax.f32 %v258_v40, 0.0 }
  0xd9   :  { %v248_v17 = vadd.f32 %v421_v52, %v168_v41  ;;  %v256_v13 = vadd.f32 %v437_v53, %v200_v44  ;;  %344 = vst.msk [vmem:[%s692_s4 + $0x10] sm:$0xf] %vm339_vm1, %v398_v45 }
  0xda   :  { %352 = vst.msk [vmem:[%s692_s4 + $0x30] sm:$0xf] %vm339_vm1, %v406_v16  ;;  %v401_v43 = vpack.c.bf16 %v266_v42, %v266_v42  ;;  %v409_v47 = vpack.c.bf16 %v274_v46, %v274_v46 }
  0xdb   :  { %v264_v48 = vmax.f32 %v248_v17, 0.0  ;;  %v272_v49 = vmax.f32 %v256_v13, 0.0 }
  0xdc   :  { %347 = vst.msk [vmem:[%s692_s4 + $0x1c] sm:$0xf] %vm339_vm1, %v401_v43  ;;  %355 = vst.msk [vmem:[%s692_s4 + $0x3c] sm:$0xf] %vm339_vm1, %v409_v47 }
  0xdd   :  { %v399_v26 = vpack.c.bf16 %v264_v48, %v264_v48  ;;  %v407_v27 = vpack.c.bf16 %v272_v49, %v272_v49 }
  0xdf   :  { %345 = vst.msk [vmem:[%s692_s4 + $0x14] sm:$0xf] %vm339_vm1, %v399_v26  ;;  %353 = vst.msk [vmem:[%s692_s4 + $0x34] sm:$0xf] %vm339_vm1, %v407_v27 }

// kernel: resnet_forward.26
= control target key start
LH: loop header
LB: loop body
LE: loop exit
PB: predicated region body
PF: predicated region fallthrough
CT: control target
= control target key end

     0   :  { %vm110_vm0 = vcmask 523264   ;;  %vm312_vm1 = vcmask 257024   ;;  %s591_s1 = inlined_call_operand.vmem [shape: bf16[64,32], index: 1, kind: input, shape index: {}]   ;;  %s592_s0 = inlined_call_operand.vmem [shape: bf16[128,64], index: 0, kind: input, shape index: {}]   ;;  %s593_s2 = inlined_call_operand.vmem [shape: f32[1,32], index: 2, kind: input, shape index: {}]   ;;  %s594_s3 = inlined_call_operand.vmem [shape: bf16[128,32], index: 3, kind: output, shape index: {}]  }
   0x1   :  { %v430_v0 = vld [vmem:[%s591_s1 + $0x18] sm:$0xff]   ;;  %v431_v1 = vld [vmem:[%s591_s1 + $0x10] sm:$0xff]   ;;  %v432_v2 = vld [vmem:[%s591_s1 + $0x8] sm:$0xff]  }
   0x2   :  { %398 = vmatprep.subr.bf16.mxu0 %v430_v0  ;;  %422 = vmatprep.subr.bf16.mxu1 %v430_v0  ;;  %v434_v3 = vld [vmem:[%s592_s0] sm:$0xff]   ;;  %v436_v6 = vld [vmem:[%s592_s0 + $0x8] sm:$0xff]   ;;  %v438_v8 = vld [vmem:[%s592_s0 + $0x10] sm:$0xff]  }
   0x3   :  { %399 = vmatpush3.bf16.msra.mxu0 %v430_v0  ;;  %426 = vmatpush3.bf16.msra.mxu1 %v430_v0  ;;  %v435_v4 = vld [vmem:[%s592_s0 + $0x20] sm:$0xff]   ;;  %v437_v7 = vld [vmem:[%s592_s0 + $0x28] sm:$0xff]   ;;  %v439_v9 = vld [vmem:[%s592_s0 + $0x30] sm:$0xff]  }
   0x4   :  { %400 = vmatprep.subr.bf16.mxu0 %v431_v1  ;;  %423 = vmatprep.subr.bf16.mxu1 %v431_v1  ;;  %v433_v5 = vld [vmem:[%s591_s1] sm:$0xff]   ;;  %v440_v10 = vld [vmem:[%s592_s0 + $0x18] sm:$0xff]  }
   0x5   :  { %406 = vmatprep.mubr.msk.bf16.mxu0 %vm110_vm0, %v434_v3  ;;  %414 = vmatprep.mubr.msk.bf16.mxu1 %vm110_vm0, %v435_v4  ;;  %v441_v11 = vld [vmem:[%s592_s0 + $0x38] sm:$0xff]   ;;  %v509_v12 = vld [vmem:[%s593_s2] ss:$0 sm:$0xff] }
   0x7   :  { %401 = vmatpush3.bf16.msra.mxu0 %v431_v1  ;;  %427 = vmatpush3.bf16.msra.mxu1 %v431_v1 }
   0x8   :  { %402 = vmatprep.subr.bf16.mxu0 %v432_v2  ;;  %424 = vmatprep.subr.bf16.mxu1 %v432_v2 }
   0xb   :  { %403 = vmatpush3.bf16.msra.mxu0 %v432_v2  ;;  %428 = vmatpush3.bf16.msra.mxu1 %v432_v2 }
   0xc   :  { %404 = vmatprep.subr.bf16.mxu0 %v433_v5  ;;  %425 = vmatprep.subr.bf16.mxu1 %v433_v5 }
   0xf   :  { %405 = vmatpush3.bf16.msra.mxu0 %v433_v5  ;;  %429 = vmatpush3.bf16.msra.mxu1 %v433_v5 }
  0x12   :  { %407 = vmatmul.mubr.msk.bf16.vlgmr.msra.gmra.mxu0 %vm110_vm0, %v436_v6  ;;  %415 = vmatmul.mubr.msk.bf16.vlgmr.msra.gmra.mxu1 %vm110_vm0, %v437_v7 }
  0x13   :  { %410 = vmatprep.mubr.msk.bf16.mxu0 %vm110_vm0, %v438_v8  ;;  %418 = vmatprep.mubr.msk.bf16.mxu1 %vm110_vm0, %v439_v9 }
  0x1a   :  { %411 = vmatmul.mubr.msk.bf16.gmra.mxu0 %vm110_vm0, %v440_v10  ;;  %419 = vmatmul.mubr.msk.bf16.gmra.mxu1 %vm110_vm0, %v441_v11 }
  0xd2   :  { %v408_v13 = vpop.f32.mrf.mxu0  ;;  %v416_v14 = vpop.f32.mrf.mxu1 }
  0xd3   :  { %v178_v15 = vadd.f32 %v408_v13, %v509_v12  ;;  %v210_v16 = vadd.f32 %v416_v14, %v509_v12 }
  0xd4   :  { %v169_v17 = vpop.f32.mrf.mxu0  ;;  %v201_v18 = vpop.f32.mrf.mxu1 }
  0xd5   :  { %v234_v19 = vmax.f32 %v178_v15, 0.0  ;;  %v242_v20 = vmax.f32 %v210_v16, 0.0  ;;  %v170_v21 = vadd.f32 %v509_v12, %v169_v17  ;;  %v202_v22 = vadd.f32 %v509_v12, %v201_v18 }
  0xd6   :  { %v409_v23 = vpop.f32.mrf.mxu0  ;;  %v417_v24 = vpop.f32.mrf.mxu1 }
  0xd7   :  { %v372_v25 = vpack.c.bf16 %v234_v19, %v234_v19  ;;  %v380_v26 = vpack.c.bf16 %v242_v20, %v242_v20  ;;  %v232_v27 = vmax.f32 %v170_v21, 0.0  ;;  %v240_v28 = vmax.f32 %v202_v22, 0.0 }
  0xd8   :  { %v181_v29 = vadd.f32 %v409_v23, %v509_v12  ;;  %v213_v30 = vadd.f32 %v417_v24, %v509_v12  ;;  %v172_v31 = vpop.f32.mrf.mxu0  ;;  %v204_v32 = vpop.f32.mrf.mxu1 }
  0xd9   :  { %315 = vst.msk [vmem:[%s594_s3 + $0x8] sm:$0xf] %vm312_vm1, %v372_v25  ;;  %323 = vst.msk [vmem:[%s594_s3 + $0x28] sm:$0xf] %vm312_vm1, %v380_v26  ;;  %v370_v33 = vpack.c.bf16 %v232_v27, %v232_v27  ;;  %v378_v34 = vpack.c.bf16 %v240_v28, %v240_v28  ;;  %v173_v35 = vadd.f32 %v509_v12, %v172_v31 }
  0xda   :  { %v205_v36 = vadd.f32 %v509_v12, %v204_v32  ;;  %v235_v37 = vmax.f32 %v181_v29, 0.0  ;;  %v243_v38 = vmax.f32 %v213_v30, 0.0  ;;  %v412_v39 = vpop.f32.mrf.mxu0  ;;  %v420_v40 = vpop.f32.mrf.mxu1 }
  0xdb   :  { %313 = vst.msk [vmem:[%s594_s3] sm:$0xf] %vm312_vm1, %v370_v33  ;;  %321 = vst.msk [vmem:[%s594_s3 + $0x20] sm:$0xf] %vm312_vm1, %v378_v34  ;;  %v233_v41 = vmax.f32 %v173_v35, 0.0  ;;  %v194_v43 = vadd.f32 %v412_v39, %v509_v12  ;;  %v226_v44 = vadd.f32 %v420_v40, %v509_v12 }
  0xdc   :  { %v241_v42 = vmax.f32 %v205_v36, 0.0  ;;  %v373_v45 = vpack.c.bf16 %v235_v37, %v235_v37  ;;  %v381_v46 = vpack.c.bf16 %v243_v38, %v243_v38  ;;  %v185_v47 = vpop.f32.mrf.mxu0  ;;  %v217_v48 = vpop.f32.mrf.mxu1 }
  0xdd   :  { %v371_v49 = vpack.c.bf16 %v233_v41, %v233_v41  ;;  %v238_v51 = vmax.f32 %v194_v43, 0.0  ;;  %v246_v52 = vmax.f32 %v226_v44, 0.0  ;;  %v186_v53 = vadd.f32 %v509_v12, %v185_v47 }
  0xde   :  { %v379_v50 = vpack.c.bf16 %v241_v42, %v241_v42  ;;  %316 = vst.msk [vmem:[%s594_s3 + $0xc] sm:$0xf] %vm312_vm1, %v373_v45  ;;  %324 = vst.msk [vmem:[%s594_s3 + $0x2c] sm:$0xf] %vm312_vm1, %v381_v46  ;;  %v218_v54 = vadd.f32 %v509_v12, %v217_v48  ;;  %v413_v55 = vpop.f32.mrf.mxu0  ;;  %v421_v56 = vpop.f32.mrf.mxu1 }
  0xdf   :  { %314 = vst.msk [vmem:[%s594_s3 + $0x4] sm:$0xf] %vm312_vm1, %v371_v49  ;;  %v376_v57 = vpack.c.bf16 %v238_v51, %v238_v51  ;;  %v384_v58 = vpack.c.bf16 %v246_v52, %v246_v52  ;;  %v197_v59 = vadd.f32 %v413_v55, %v509_v12  ;;  %v229_v60 = vadd.f32 %v421_v56, %v509_v12 }
  0xe0   :  { %322 = vst.msk [vmem:[%s594_s3 + $0x24] sm:$0xf] %vm312_vm1, %v379_v50  ;;  %v236_v61 = vmax.f32 %v186_v53, 0.0  ;;  %v244_v62 = vmax.f32 %v218_v54, 0.0  ;;  %v188_v63 = vpop.f32.mrf.mxu0  ;;  %v220_v0 = vpop.f32.mrf.mxu1 }
  0xe1   :  { %319 = vst.msk [vmem:[%s594_s3 + $0x18] sm:$0xf] %vm312_vm1, %v376_v57  ;;  %327 = vst.msk [vmem:[%s594_s3 + $0x38] sm:$0xf] %vm312_vm1, %v384_v58  ;;  %v239_v1 = vmax.f32 %v197_v59, 0.0  ;;  %v247_v2 = vmax.f32 %v229_v60, 0.0  ;;  %v189_v3 = vadd.f32 %v509_v12, %v188_v63  ;;  %v221_v4 = vadd.f32 %v509_v12, %v220_v0 }
  0xe2   :  { %v374_v5 = vpack.c.bf16 %v236_v61, %v236_v61  ;;  %v382_v6 = vpack.c.bf16 %v244_v62, %v244_v62 }
  0xe3   :  { %v377_v7 = vpack.c.bf16 %v239_v1, %v239_v1  ;;  %v385_v8 = vpack.c.bf16 %v247_v2, %v247_v2  ;;  %v237_v9 = vmax.f32 %v189_v3, 0.0  ;;  %v245_v10 = vmax.f32 %v221_v4, 0.0 }
  0xe4   :  { %317 = vst.msk [vmem:[%s594_s3 + $0x10] sm:$0xf] %vm312_vm1, %v374_v5  ;;  %325 = vst.msk [vmem:[%s594_s3 + $0x30] sm:$0xf] %vm312_vm1, %v382_v6 }
  0xe5   :  { %320 = vst.msk [vmem:[%s594_s3 + $0x1c] sm:$0xf] %vm312_vm1, %v377_v7  ;;  %328 = vst.msk [vmem:[%s594_s3 + $0x3c] sm:$0xf] %vm312_vm1, %v385_v8  ;;  %v375_v11 = vpack.c.bf16 %v237_v9, %v237_v9  ;;  %v383_v12 = vpack.c.bf16 %v245_v10, %v245_v10 }
  0xe7   :  { %318 = vst.msk [vmem:[%s594_s3 + $0x14] sm:$0xf] %vm312_vm1, %v375_v11  ;;  %326 = vst.msk [vmem:[%s594_s3 + $0x34] sm:$0xf] %vm312_vm1, %v383_v12 }

// kernel: resnet_forward.29
= control target key start
LH: loop header
LB: loop body
LE: loop exit
PB: predicated region body
PF: predicated region fallthrough
CT: control target
= control target key end

     0   :  { %vm55_vm0 = vcmask 261120   ;;  %s254_s1 = inlined_call_operand.vmem [shape: bf16[32,128], index: 1, kind: input, shape index: {}]   ;;  %s255_s0 = inlined_call_operand.vmem [shape: bf16[32,32], index: 0, kind: input, shape index: {}]   ;;  %s256_s2 = inlined_call_operand.vmem [shape: f32[1,128], index: 2, kind: input, shape index: {}]   ;;  %s257_s3 = inlined_call_operand.vmem [shape: bf16[32,128], index: 3, kind: input, shape index: {}]   ;;  %s258_s4 = inlined_call_operand.vmem [shape: bf16[32,128], index: 4, kind: output, shape index: {}]  }
   0x1   :  { %v198_v0 = vld [vmem:[%s254_s1 + $0x8] sm:$0xff]   ;;  %v199_v1 = vld [vmem:[%s254_s1] sm:$0xff]  }
   0x2   :  { %190 = vmatprep.subr.bf16.mxu0 %v198_v0  ;;  %v200_v2 = vld [vmem:[%s255_s0] sm:$0xff]   ;;  %v201_v3 = vld [vmem:[%s255_s0 + $0x8] sm:$0xff]  }
   0x3   :  { %191 = vmatpush3.bf16.msra.mxu0 %v198_v0  ;;  %194 = vmatprep.mubr.msk.bf16.mxu0 %vm55_vm0, %v200_v2  ;;  %v151_v4 = vld [vmem:[%s256_s2] ss:$0 sm:$0xff]  ;;  %v184_v5 = vld [vmem:[%s257_s3 + $0x8] sm:$0xff]  }
   0x4   :  { %192 = vmatprep.subr.bf16.mxu0 %v199_v1  ;;  %v167_v7 = vld [vmem:[%s257_s3] sm:$0xff]   ;;  %v172_v9 = vunpack.c.l.bf16 %v184_v5  ;;  %v173_v13 = vunpack.c.h.bf16 %v184_v5 }
   0x5   :  { %v168_v12 = vunpack.c.l.bf16 %v167_v7  ;;  %v169_v17 = vunpack.c.h.bf16 %v167_v7 }
   0x7   :  { %193 = vmatpush3.bf16.msra.mxu0 %v199_v1 }
   0xa   :  { %195 = vmatmul.mubr.msk.bf16.vlgmr.msra.gmra.mxu0 %vm55_vm0, %v201_v3 }
  0xca   :  { %v196_v6 = vpop.f32.mrf.mxu0 }
  0xcb   :  { %v105_v8 = vadd.f32 %v196_v6, %v151_v4 }
  0xcc   :  { %v96_v10 = vpop.f32.mrf.mxu0 }
  0xcd   :  { %v97_v11 = vadd.f32 %v151_v4, %v96_v10  ;;  %v121_v15 = vadd.f32 %v172_v9, %v105_v8 }
  0xce   :  { %v197_v14 = vpop.f32.mrf.mxu0 }
  0xcf   :  { %v108_v16 = vadd.f32 %v197_v14, %v151_v4  ;;  %v119_v19 = vadd.f32 %v168_v12, %v97_v11  ;;  %v125_v22 = vmax.f32 %v121_v15, 0.0 }
  0xd0   :  { %v99_v18 = vpop.f32.mrf.mxu0 }
  0xd1   :  { %v122_v20 = vadd.f32 %v173_v13, %v108_v16  ;;  %v100_v21 = vadd.f32 %v151_v4, %v99_v18  ;;  %v123_v25 = vmax.f32 %v119_v19, 0.0 }
  0xd3   :  { %v126_v23 = vmax.f32 %v122_v20, 0.0  ;;  %v120_v24 = vadd.f32 %v169_v17, %v100_v21 }
  0xd5   :  { %v182_v26 = vpack.c.bf16 %v126_v23, %v125_v22  ;;  %v124_v27 = vmax.f32 %v120_v24, 0.0 }
  0xd7   :  { %185 = vst [vmem:[%s258_s4 + $0x8] sm:$0xff] %v182_v26   ;;  %v177_v28 = vpack.c.bf16 %v124_v27, %v123_v25 }
  0xd9   :  { %178 = vst [vmem:[%s258_s4] sm:$0xff] %v177_v28  }

// kernel: resnet_forward.27
= control target key start
LH: loop header
LB: loop body
LE: loop exit
PB: predicated region body
PF: predicated region fallthrough
CT: control target
= control target key end

     0   :  { %vm204_vm0 = vcmask 261120   ;;  %vm329_vm1 = vcmask 257024   ;;  %s550_s1 = inlined_call_operand.vmem [shape: bf16[288,32], index: 1, kind: input, shape index: {}]   ;;  %s551_s0 = inlined_call_operand.vmem [shape: bf16[32,288], index: 0, kind: input, shape index: {}]   ;;  %s552_s2 = inlined_call_operand.vmem [shape: f32[1,32], index: 2, kind: input, shape index: {}]   ;;  %s553_s3 = inlined_call_operand.vmem [shape: bf16[32,32], index: 3, kind: output, shape index: {}]  }
   0x1   :  { %v413_v0 = vld [vmem:[%s550_s1 + $0x78] sm:$0xff]   ;;  %v415_v2 = vld [vmem:[%s550_s1 + $0x70] sm:$0xff]   ;;  %v417_v4 = vld [vmem:[%s550_s1 + $0x68] sm:$0xff]  }
   0x2   :  { %v414_v1 = vld [vmem:[%s550_s1 + $0x38] sm:$0xff]   ;;  %373 = vmatprep.subr.bf16.mxu0 %v413_v0  ;;  %v416_v3 = vld [vmem:[%s550_s1 + $0x30] sm:$0xff]   ;;  %v418_v5 = vld [vmem:[%s550_s1 + $0x28] sm:$0xff]  }
   0x3   :  { %374 = vmatpush3.bf16.msra.mxu0 %v414_v1  ;;  %v419_v6 = vld [vmem:[%s550_s1 + $0x60] sm:$0xff]   ;;  %v421_v8 = vld [vmem:[%s550_s1 + $0x58] sm:$0xff]   ;;  %v428_v10 = vld [vmem:[%s550_s1 + $0x88] sm:$0xff]  }
   0x4   :  { %375 = vmatprep.subr.bf16.mxu0 %v415_v2  ;;  %v420_v7 = vld [vmem:[%s550_s1 + $0x20] sm:$0xff]   ;;  %v422_v9 = vld [vmem:[%s550_s1 + $0x18] sm:$0xff]   ;;  %v423_v11 = vld [vmem:[%s550_s1 + $0x50] sm:$0xff]   ;;  %405 = vmatprep.subr.bf16.mxu1 %v428_v10 }
   0x5   :  { %v424_v12 = vld [vmem:[%s550_s1 + $0x10] sm:$0xff]   ;;  %v425_v13 = vld [vmem:[%s550_s1 + $0x48] sm:$0xff]   ;;  %406 = vmatpush3.bf16.msra.mxu1 %v428_v10  ;;  %v433_v15 = vld [vmem:[%s550_s1 + $0x80] sm:$0xff]  }
   0x6   :  { %v432_v14 = vld [vmem:[%s551_s0 + $0x4] ss:$12 sps:$4 sm:$0xff]   ;;  %v434_v16 = vld [vmem:[%s551_s0 + $0x8] ss:$12 sps:$4 sm:$0xff]   ;;  %407 = vmatprep.subr.bf16.mxu1 %v433_v15  ;;  %v435_v17 = vld [vmem:[%s551_s0 + $0x20] ss:$12 sps:$4 sm:$0xff]  }
   0x7   :  { %376 = vmatpush3.bf16.msra.mxu0 %v416_v3  ;;  %243 = vmatprep.mubr.bf16.mxu0 %v432_v14  ;;  %v426_v18 = vld [vmem:[%s550_s1 + $0x8] sm:$0xff]   ;;  %v427_v19 = vld [vmem:[%s550_s1 + $0x40] sm:$0xff]  }
   0x8   :  { %377 = vmatprep.subr.bf16.mxu0 %v417_v4  ;;  %409 = vmatprep.mubr.msk.bf16.mxu1 %vm204_vm0, %v434_v16  ;;  %v429_v20 = vld [vmem:[%s550_s1] sm:$0xff]   ;;  %v436_v22 = vld [vmem:[%s551_s0 + $0x1c] ss:$12 sps:$4 sm:$0xff]  }
   0x9   :  { %408 = vmatpush3.bf16.msra.mxu1 %v433_v15  ;;  %v430_v21 = vld [vmem:[%s551_s0] ss:$12 sps:$4 sm:$0xff]   ;;  %v438_v23 = vld [vmem:[%s551_s0 + $0x18] ss:$12 sps:$4 sm:$0xff]  }
   0xa   :  { %v338_v28 = vld [vmem:[%s552_s2] ss:$0 sm:$0xff] }
   0xb   :  { %378 = vmatpush3.bf16.msra.mxu0 %v418_v5 }
   0xc   :  { %379 = vmatprep.subr.bf16.mxu0 %v419_v6  ;;  %410 = vmatmul.mubr.msk.bf16.vlgmr.msra.gmra.mxu1 %vm204_vm0, %v435_v17 }
   0xf   :  { %380 = vmatpush3.bf16.msra.mxu0 %v420_v7 }
  0x10   :  { %381 = vmatprep.subr.bf16.mxu0 %v421_v8 }
  0x13   :  { %382 = vmatpush3.bf16.msra.mxu0 %v422_v9 }
  0x14   :  { %383 = vmatprep.subr.bf16.mxu0 %v423_v11 }
  0x17   :  { %384 = vmatpush3.bf16.msra.mxu0 %v424_v12 }
  0x18   :  { %385 = vmatprep.subr.bf16.mxu0 %v425_v13 }
  0x1b   :  { %386 = vmatpush3.bf16.msra.mxu0 %v426_v18 }
  0x1c   :  { %387 = vmatprep.subr.bf16.mxu0 %v427_v19 }
  0x1f   :  { %388 = vmatpush3.bf16.msra.mxu0 %v429_v20 }
  0x22   :  { %244 = vmatmul.mubr.bf16.vlgmr.msra.gmra.mxu0 %v430_v21 }
  0x23   :  { %251 = vmatprep.mubr.bf16.mxu0 %v436_v22 }
  0x2a   :  { %252 = vmatmul.mubr.bf16.gmra.mxu0 %v438_v23 }
  0xcc   :  { %v411_v24 = vpop.f32.mrf.mxu1 }
  0xce   :  { %v294_v26 = vpop.f32.mrf.mxu1 }
  0xd0   :  { %v412_v31 = vpop.f32.mrf.mxu1 }
  0xd2   :  { %v297_v37 = vpop.f32.mrf.mxu1 }
  0xe2   :  { %v389_v25 = vpop.f32.mrf.mxu0 }
  0xe4   :  { %v390_v27 = vpop.f32.mrf.mxu0 }
  0xe5   :  { %v391_v29 = vadd.f32 %v390_v27, %v389_v25 }
  0xe6   :  { %v392_v30 = vpop.f32.mrf.mxu0 }
  0xe7   :  { %v246_v32 = vadd.f32 %v391_v29, %v338_v28 }
  0xe8   :  { %v393_v33 = vpop.f32.mrf.mxu0 }
  0xe9   :  { %v394_v34 = vadd.f32 %v393_v33, %v392_v30  ;;  %v295_v35 = vadd.f32 %v294_v26, %v246_v32 }
  0xea   :  { %v395_v36 = vpop.f32.mrf.mxu0 }
  0xeb   :  { %v309_v38 = vmax.f32 %v295_v35, 0.0  ;;  %v249_v39 = vadd.f32 %v394_v34, %v338_v28 }
  0xec   :  { %v396_v40 = vpop.f32.mrf.mxu0 }
  0xed   :  { %v369_v41 = vpack.c.bf16 %v309_v38, %v309_v38  ;;  %v397_v42 = vadd.f32 %v396_v40, %v395_v36  ;;  %v298_v43 = vadd.f32 %v297_v37, %v249_v39 }
  0xee   :  { %v398_v44 = vpop.f32.mrf.mxu0 }
  0xef   :  { %330 = vst.msk [vmem:[%s553_s3] sm:$0xf] %vm329_vm1, %v369_v41  ;;  %v254_v45 = vadd.f32 %v397_v42, %v338_v28  ;;  %v310_v46 = vmax.f32 %v298_v43, 0.0 }
  0xf0   :  { %v399_v47 = vpop.f32.mrf.mxu0 }
  0xf1   :  { %v303_v48 = vadd.f32 %v411_v24, %v254_v45  ;;  %v370_v49 = vpack.c.bf16 %v310_v46, %v310_v46  ;;  %v400_v50 = vadd.f32 %v399_v47, %v398_v44 }
  0xf3   :  { %v311_v51 = vmax.f32 %v303_v48, 0.0  ;;  %331 = vst.msk [vmem:[%s553_s3 + $0x4] sm:$0xf] %vm329_vm1, %v370_v49  ;;  %v257_v52 = vadd.f32 %v400_v50, %v338_v28 }
  0xf5   :  { %v371_v53 = vpack.c.bf16 %v311_v51, %v311_v51  ;;  %v306_v54 = vadd.f32 %v412_v31, %v257_v52 }
  0xf7   :  { %332 = vst.msk [vmem:[%s553_s3 + $0x8] sm:$0xf] %vm329_vm1, %v371_v53  ;;  %v312_v55 = vmax.f32 %v306_v54, 0.0 }
  0xf9   :  { %v372_v56 = vpack.c.bf16 %v312_v55, %v312_v55 }
  0xfb   :  { %333 = vst.msk [vmem:[%s553_s3 + $0xc] sm:$0xf] %vm329_vm1, %v372_v56 }

// kernel: resnet_forward.28
= control target key start
LH: loop header
LB: loop body
LE: loop exit
PB: predicated region body
PF: predicated region fallthrough
CT: control target
= control target key end

     0   :  { %vm68_vm0 = vcmask 523264   ;;  %s247_s1 = inlined_call_operand.vmem [shape: bf16[64,128], index: 1, kind: input, shape index: {}]   ;;  %s248_s0 = inlined_call_operand.vmem [shape: bf16[32,64], index: 0, kind: input, shape index: {}]   ;;  %s249_s2 = inlined_call_operand.vmem [shape: f32[1,128], index: 2, kind: input, shape index: {}]   ;;  %s250_s3 = inlined_call_operand.vmem [shape: bf16[32,128], index: 3, kind: output, shape index: {}]  }
   0x1   :  { %v194_v0 = vld [vmem:[%s247_s1 + $0x18] sm:$0xff]   ;;  %v195_v1 = vld [vmem:[%s247_s1 + $0x10] sm:$0xff]   ;;  %v196_v2 = vld [vmem:[%s247_s1 + $0x8] sm:$0xff]  }
   0x2   :  { %182 = vmatprep.subr.bf16.mxu0 %v194_v0  ;;  %v198_v3 = vld [vmem:[%s248_s0] sm:$0xff]   ;;  %v199_v5 = vld [vmem:[%s248_s0 + $0x8] sm:$0xff]  }
   0x3   :  { %183 = vmatpush3.bf16.msra.mxu0 %v194_v0  ;;  %190 = vmatprep.mubr.msk.bf16.mxu0 %vm68_vm0, %v198_v3  ;;  %v197_v4 = vld [vmem:[%s247_s1] sm:$0xff]  }
   0x4   :  { %184 = vmatprep.subr.bf16.mxu0 %v195_v1  ;;  %v148_v7 = vld [vmem:[%s249_s2] ss:$0 sm:$0xff] }
   0x7   :  { %185 = vmatpush3.bf16.msra.mxu0 %v195_v1 }
   0x8   :  { %186 = vmatprep.subr.bf16.mxu0 %v196_v2 }
   0xb   :  { %187 = vmatpush3.bf16.msra.mxu0 %v196_v2 }
   0xc   :  { %188 = vmatprep.subr.bf16.mxu0 %v197_v4 }
   0xf   :  { %189 = vmatpush3.bf16.msra.mxu0 %v197_v4 }
  0x12   :  { %191 = vmatmul.mubr.msk.bf16.vlgmr.msra.gmra.mxu0 %vm68_vm0, %v199_v5 }
  0xd2   :  { %v192_v6 = vpop.f32.mrf.mxu0 }
  0xd3   :  { %v118_v10 = vadd.f32 %v192_v6, %v148_v7 }
  0xd4   :  { %v109_v8 = vpop.f32.mrf.mxu0 }
  0xd5   :  { %v110_v13 = vadd.f32 %v148_v7, %v109_v8 }
  0xd6   :  { %v193_v9 = vpop.f32.mrf.mxu0 }
  0xd7   :  { %v121_v11 = vadd.f32 %v193_v9, %v148_v7 }
  0xd8   :  { %v112_v12 = vpop.f32.mrf.mxu0 }
  0xd9   :  { %v173_v14 = vpack.c.bf16 %v121_v11, %v118_v10  ;;  %v113_v15 = vadd.f32 %v148_v7, %v112_v12 }
  0xdb   :  { %175 = vst [vmem:[%s250_s3 + $0x8] sm:$0xff] %v173_v14   ;;  %v168_v16 = vpack.c.bf16 %v113_v15, %v110_v13 }
  0xdd   :  { %169 = vst [vmem:[%s250_s3] sm:$0xff] %v168_v16  }

// kernel: resnet_forward.30
= control target key start
LH: loop header
LB: loop body
LE: loop exit
PB: predicated region body
PF: predicated region fallthrough
CT: control target
= control target key end

     0   :  { %vm171_vm0 = vcmask 257024   ;;  %s304_s1 = inlined_call_operand.vmem [shape: bf16[128,32], index: 1, kind: input, shape index: {}]   ;;  %s305_s0 = inlined_call_operand.vmem [shape: bf16[32,128], index: 0, kind: input, shape index: {}]   ;;  %s306_s2 = inlined_call_operand.vmem [shape: f32[1,32], index: 2, kind: input, shape index: {}]   ;;  %s307_s3 = inlined_call_operand.vmem [shape: bf16[32,32], index: 3, kind: output, shape index: {}]  }
   0x1   :  { %v229_v0 = vld [vmem:[%s304_s1 + $0x38] sm:$0xff]   ;;  %v230_v1 = vld [vmem:[%s304_s1 + $0x30] sm:$0xff]   ;;  %v231_v2 = vld [vmem:[%s304_s1 + $0x28] sm:$0xff]  }
   0x2   :  { %209 = vmatprep.subr.bf16.mxu0 %v229_v0  ;;  %v232_v3 = vld [vmem:[%s304_s1 + $0x20] sm:$0xff]   ;;  %v233_v5 = vld [vmem:[%s304_s1 + $0x18] sm:$0xff]   ;;  %v234_v6 = vld [vmem:[%s304_s1 + $0x10] sm:$0xff]  }
   0x3   :  { %210 = vmatpush3.bf16.msra.mxu0 %v229_v0  ;;  %v237_v4 = vld [vmem:[%s305_s0] sm:$0xff]   ;;  %v235_v7 = vld [vmem:[%s304_s1 + $0x8] sm:$0xff]  }
   0x4   :  { %211 = vmatprep.subr.bf16.mxu0 %v230_v1  ;;  %225 = vmatprep.mubr.bf16.mxu0 %v237_v4  ;;  %v236_v8 = vld [vmem:[%s304_s1] sm:$0xff]   ;;  %v238_v9 = vld [vmem:[%s305_s0 + $0x8] sm:$0xff]  }
   0x5   :  { %v180_v10 = vld [vmem:[%s306_s2] ss:$0 sm:$0xff] }
   0x7   :  { %212 = vmatpush3.bf16.msra.mxu0 %v230_v1 }
   0x8   :  { %213 = vmatprep.subr.bf16.mxu0 %v231_v2 }
   0xb   :  { %214 = vmatpush3.bf16.msra.mxu0 %v231_v2 }
   0xc   :  { %215 = vmatprep.subr.bf16.mxu0 %v232_v3 }
   0xf   :  { %216 = vmatpush3.bf16.msra.mxu0 %v232_v3 }
  0x10   :  { %217 = vmatprep.subr.bf16.mxu0 %v233_v5 }
  0x13   :  { %218 = vmatpush3.bf16.msra.mxu0 %v233_v5 }
  0x14   :  { %219 = vmatprep.subr.bf16.mxu0 %v234_v6 }
  0x17   :  { %220 = vmatpush3.bf16.msra.mxu0 %v234_v6 }
  0x18   :  { %221 = vmatprep.subr.bf16.mxu0 %v235_v7 }
  0x1b   :  { %222 = vmatpush3.bf16.msra.mxu0 %v235_v7 }
  0x1c   :  { %223 = vmatprep.subr.bf16.mxu0 %v236_v8 }
  0x1f   :  { %224 = vmatpush3.bf16.msra.mxu0 %v236_v8 }
  0x22   :  { %226 = vmatmul.mubr.bf16.vlgmr.msra.gmra.mxu0 %v238_v9 }
  0xe2   :  { %v227_v11 = vpop.f32.mrf.mxu0 }
  0xe3   :  { %v145_v12 = vadd.f32 %v227_v11, %v180_v10 }
  0xe4   :  { %v136_v13 = vpop.f32.mrf.mxu0 }
  0xe5   :  { %v153_v14 = vmax.f32 %v145_v12, 0.0  ;;  %v137_v15 = vadd.f32 %v180_v10, %v136_v13 }
  0xe6   :  { %v228_v16 = vpop.f32.mrf.mxu0 }
  0xe7   :  { %v197_v17 = vpack.c.bf16 %v153_v14, %v153_v14  ;;  %v151_v18 = vmax.f32 %v137_v15, 0.0  ;;  %v148_v19 = vadd.f32 %v228_v16, %v180_v10 }
  0xe8   :  { %v139_v20 = vpop.f32.mrf.mxu0 }
  0xe9   :  { %174 = vst.msk [vmem:[%s307_s3 + $0x8] sm:$0xf] %vm171_vm0, %v197_v17  ;;  %v195_v21 = vpack.c.bf16 %v151_v18, %v151_v18  ;;  %v154_v22 = vmax.f32 %v148_v19, 0.0  ;;  %v140_v23 = vadd.f32 %v180_v10, %v139_v20 }
  0xeb   :  { %172 = vst.msk [vmem:[%s307_s3] sm:$0xf] %vm171_vm0, %v195_v21  ;;  %v198_v24 = vpack.c.bf16 %v154_v22, %v154_v22  ;;  %v152_v25 = vmax.f32 %v140_v23, 0.0 }
  0xed   :  { %175 = vst.msk [vmem:[%s307_s3 + $0xc] sm:$0xf] %vm171_vm0, %v198_v24  ;;  %v196_v26 = vpack.c.bf16 %v152_v25, %v152_v25 }
  0xef   :  { %173 = vst.msk [vmem:[%s307_s3 + $0x4] sm:$0xf] %vm171_vm0, %v196_v26 }

// kernel: resnet_forward.33
= control target key start
LH: loop header
LB: loop body
LE: loop exit
PB: predicated region body
PF: predicated region fallthrough
CT: control target
= control target key end

     0   :  { %vm171_vm0 = vcmask 519168   ;;  %s304_s1 = inlined_call_operand.vmem [shape: bf16[128,64], index: 1, kind: input, shape index: {}]   ;;  %s305_s0 = inlined_call_operand.vmem [shape: bf16[32,128], index: 0, kind: input, shape index: {}]   ;;  %s306_s2 = inlined_call_operand.vmem [shape: f32[1,64], index: 2, kind: input, shape index: {}]   ;;  %s307_s3 = inlined_call_operand.vmem [shape: bf16[32,64], index: 3, kind: output, shape index: {}]  }
   0x1   :  { %v229_v0 = vld [vmem:[%s304_s1 + $0x38] sm:$0xff]   ;;  %v230_v1 = vld [vmem:[%s304_s1 + $0x30] sm:$0xff]   ;;  %v231_v2 = vld [vmem:[%s304_s1 + $0x28] sm:$0xff]  }
   0x2   :  { %209 = vmatprep.subr.bf16.mxu0 %v229_v0  ;;  %v232_v3 = vld [vmem:[%s304_s1 + $0x20] sm:$0xff]   ;;  %v233_v5 = vld [vmem:[%s304_s1 + $0x18] sm:$0xff]   ;;  %v234_v6 = vld [vmem:[%s304_s1 + $0x10] sm:$0xff]  }
   0x3   :  { %210 = vmatpush3.bf16.msra.mxu0 %v229_v0  ;;  %v237_v4 = vld [vmem:[%s305_s0] sm:$0xff]   ;;  %v235_v7 = vld [vmem:[%s304_s1 + $0x8] sm:$0xff]  }
   0x4   :  { %211 = vmatprep.subr.bf16.mxu0 %v230_v1  ;;  %225 = vmatprep.mubr.bf16.mxu0 %v237_v4  ;;  %v236_v8 = vld [vmem:[%s304_s1] sm:$0xff]   ;;  %v238_v9 = vld [vmem:[%s305_s0 + $0x8] sm:$0xff]  }
   0x5   :  { %v180_v10 = vld [vmem:[%s306_s2] ss:$0 sm:$0xff] }
   0x7   :  { %212 = vmatpush3.bf16.msra.mxu0 %v230_v1 }
   0x8   :  { %213 = vmatprep.subr.bf16.mxu0 %v231_v2 }
   0xb   :  { %214 = vmatpush3.bf16.msra.mxu0 %v231_v2 }
   0xc   :  { %215 = vmatprep.subr.bf16.mxu0 %v232_v3 }
   0xf   :  { %216 = vmatpush3.bf16.msra.mxu0 %v232_v3 }
  0x10   :  { %217 = vmatprep.subr.bf16.mxu0 %v233_v5 }
  0x13   :  { %218 = vmatpush3.bf16.msra.mxu0 %v233_v5 }
  0x14   :  { %219 = vmatprep.subr.bf16.mxu0 %v234_v6 }
  0x17   :  { %220 = vmatpush3.bf16.msra.mxu0 %v234_v6 }
  0x18   :  { %221 = vmatprep.subr.bf16.mxu0 %v235_v7 }
  0x1b   :  { %222 = vmatpush3.bf16.msra.mxu0 %v235_v7 }
  0x1c   :  { %223 = vmatprep.subr.bf16.mxu0 %v236_v8 }
  0x1f   :  { %224 = vmatpush3.bf16.msra.mxu0 %v236_v8 }
  0x22   :  { %226 = vmatmul.mubr.bf16.vlgmr.msra.gmra.mxu0 %v238_v9 }
  0xe2   :  { %v227_v11 = vpop.f32.mrf.mxu0 }
  0xe3   :  { %v145_v12 = vadd.f32 %v227_v11, %v180_v10 }
  0xe4   :  { %v136_v13 = vpop.f32.mrf.mxu0 }
  0xe5   :  { %v153_v14 = vmax.f32 %v145_v12, 0.0  ;;  %v137_v15 = vadd.f32 %v180_v10, %v136_v13 }
  0xe6   :  { %v228_v16 = vpop.f32.mrf.mxu0 }
  0xe7   :  { %v197_v17 = vpack.c.bf16 %v153_v14, %v153_v14  ;;  %v151_v18 = vmax.f32 %v137_v15, 0.0  ;;  %v148_v19 = vadd.f32 %v228_v16, %v180_v10 }
  0xe8   :  { %v139_v20 = vpop.f32.mrf.mxu0 }
  0xe9   :  { %174 = vst.msk [vmem:[%s307_s3 + $0x8] sm:$0xf] %vm171_vm0, %v197_v17  ;;  %v195_v21 = vpack.c.bf16 %v151_v18, %v151_v18  ;;  %v154_v22 = vmax.f32 %v148_v19, 0.0  ;;  %v140_v23 = vadd.f32 %v180_v10, %v139_v20 }
  0xeb   :  { %172 = vst.msk [vmem:[%s307_s3] sm:$0xf] %vm171_vm0, %v195_v21  ;;  %v198_v24 = vpack.c.bf16 %v154_v22, %v154_v22  ;;  %v152_v25 = vmax.f32 %v140_v23, 0.0 }
  0xed   :  { %175 = vst.msk [vmem:[%s307_s3 + $0xc] sm:$0xf] %vm171_vm0, %v198_v24  ;;  %v196_v26 = vpack.c.bf16 %v152_v25, %v152_v25 }
  0xef   :  { %173 = vst.msk [vmem:[%s307_s3 + $0x4] sm:$0xf] %vm171_vm0, %v196_v26 }

// kernel: resnet_forward.35
= control target key start
LH: loop header
LB: loop body
LE: loop exit
PB: predicated region body
PF: predicated region fallthrough
CT: control target
= control target key end

     0   :  { %v221_v1 = vmov 0   ;;  %v34_v18 = vlaneseq  ;;  %s299_s1 = inlined_call_operand.vmem [shape: bf16[128,256], index: 1, kind: input, shape index: {}]   ;;  %s300_s0 = inlined_call_operand.vmem [shape: bf16[8,128], index: 0, kind: input, shape index: {}]   ;;  %s301_s2 = inlined_call_operand.vmem [shape: f32[1,256], index: 2, kind: input, shape index: {}]   ;;  %s302_s3 = inlined_call_operand.vmem [shape: bf16[8,256], index: 3, kind: output, shape index: {}]  }
   0x1   :  { %v197_v0 = vld [vmem:[%s299_s1 + $0x74] ss:$8 sps:$4 sm:$0xff]   ;;  %156 = vmatprep.mubr.bf16.mxu0 %v221_v1  ;;  %v199_v2 = vld [vmem:[%s299_s1 + $0x70] ss:$8 sps:$4 sm:$0xff]   ;;  %v200_v3 = vld [vmem:[%s299_s1 + $0x64] ss:$8 sps:$4 sm:$0xff]  }
   0x2   :  { %124 = vmatprep.subr.bf16.mxu0 %v197_v0  ;;  %v202_v4 = vld [vmem:[%s299_s1 + $0x60] ss:$8 sps:$4 sm:$0xff]   ;;  %v203_v5 = vld [vmem:[%s299_s1 + $0x54] ss:$8 sps:$4 sm:$0xff]   ;;  %v205_v6 = vld [vmem:[%s299_s1 + $0x50] ss:$8 sps:$4 sm:$0xff]  }
   0x3   :  { %125 = vmatpush1.bf16.msra.mxu0 %v199_v2  ;;  %v206_v7 = vld [vmem:[%s299_s1 + $0x44] ss:$8 sps:$4 sm:$0xff]   ;;  %v208_v8 = vld [vmem:[%s299_s1 + $0x40] ss:$8 sps:$4 sm:$0xff]   ;;  %v209_v9 = vld [vmem:[%s299_s1 + $0x34] ss:$8 sps:$4 sm:$0xff]  }
   0x4   :  { %126 = vmatprep.subr.bf16.mxu0 %v200_v3  ;;  %v211_v10 = vld [vmem:[%s299_s1 + $0x30] ss:$8 sps:$4 sm:$0xff]   ;;  %v212_v11 = vld [vmem:[%s299_s1 + $0x24] ss:$8 sps:$4 sm:$0xff]   ;;  %v214_v12 = vld [vmem:[%s299_s1 + $0x20] ss:$8 sps:$4 sm:$0xff]  }
   0x5   :  { %v215_v13 = vld [vmem:[%s299_s1 + $0x14] ss:$8 sps:$4 sm:$0xff]   ;;  %v217_v14 = vld [vmem:[%s299_s1 + $0x10] ss:$8 sps:$4 sm:$0xff]   ;;  %v218_v15 = vld [vmem:[%s299_s1 + $0x4] ss:$8 sps:$4 sm:$0xff]  }
   0x6   :  { %v220_v16 = vld [vmem:[%s299_s1] ss:$8 sps:$4 sm:$0xff]   ;;  %v35_v19 = vshrl.u32 %v34_v18, 7 }
   0x7   :  { %127 = vmatpush1.bf16.msra.mxu0 %v202_v4  ;;  %v15_v17 = vld [vmem:[%s300_s0] sm:$0xf] }
   0x8   :  { %128 = vmatprep.subr.bf16.mxu0 %v203_v5  ;;  %v36_v20 = vsub.s32 0, %v35_v19  ;;  %v40_v21 = vsub.s32 1, %v35_v19  ;;  %v32_v22 = vld [vmem:[%s301_s2] sm:$0x3] }
   0xa   :  { %v37_v23 = vrot.slane %v32_v22, %v36_v20  ;;  %v41_v24 = vrot.slane %v32_v22, %v40_v21 }
   0xb   :  { %129 = vmatpush1.bf16.msra.mxu0 %v205_v6 }
   0xc   :  { %130 = vmatprep.subr.bf16.mxu0 %v206_v7 }
   0xf   :  { %131 = vmatpush1.bf16.msra.mxu0 %v208_v8 }
  0x10   :  { %132 = vmatprep.subr.bf16.mxu0 %v209_v9 }
  0x13   :  { %133 = vmatpush1.bf16.msra.mxu0 %v211_v10 }
  0x14   :  { %134 = vmatprep.subr.bf16.mxu0 %v212_v11 }
  0x17   :  { %135 = vmatpush1.bf16.msra.mxu0 %v214_v12 }
  0x18   :  { %136 = vmatprep.subr.bf16.mxu0 %v215_v13 }
  0x1b   :  { %137 = vmatpush1.bf16.msra.mxu0 %v217_v14 }
  0x1c   :  { %138 = vmatprep.subr.bf16.mxu0 %v218_v15 }
  0x1f   :  { %139 = vmatpush1.bf16.msra.mxu0 %v220_v16 }
  0x22   :  { %157 = vmatmul.mubr.bf16.vlgmr.msra.gmra.mxu0 %v15_v17 }
  0xe2   :  { %v158_v25 = vpop.f32.mrf.mxu0 }
  0xe3   :  { %v159_v27 = vadd.f32 %v158_v25, %v37_v23 }
  0xe4   :  { %v160_v26 = vpop.f32.mrf.mxu0 }
  0xe5   :  { %v161_v28 = vadd.f32 %v160_v26, %v41_v24 }
  0xe6   :  { %v162_v29 = vpop.f32.mrf.mxu0 }
  0xe7   :  { %v195_v30 = vpack.c.bf16 %v161_v28, %v159_v27 }
  0xe8   :  { %v163_v31 = vpop.f32.mrf.mxu0 }
  0xe9   :  { %173 = vst [vmem:[%s302_s3] sm:$0xff] %v195_v30 }

// kernel: resnet_forward.34
= control target key start
LH: loop header
LB: loop body
LE: loop exit
PB: predicated region body
PF: predicated region fallthrough
CT: control target
= control target key end

     0   :  { %v609_v35 = vmov 0.0   ;;  %vm610_vm0 = vmmov 0   ;;  %vm330_vm1 = vcmask 523264   ;;  %vm456_vm2 = vcmask 519168   ;;  %s754_s1 = inlined_call_operand.vmem [shape: bf16[576,64], index: 1, kind: input, shape index: {}]   ;;  %s755_s0 = inlined_call_operand.vmem [shape: bf16[8,576], index: 0, kind: input, shape index: {}]   ;;  %s756_s2 = inlined_call_operand.vmem [shape: f32[1,64], index: 2, kind: input, shape index: {}]   ;;  %s757_s3 = inlined_call_operand.vmem [shape: bf16[8,64], index: 3, kind: output, shape index: {}]  }
   0x1   :  { %v568_v0 = vld [vmem:[%s754_s1 + $0x78] sm:$0xff]   ;;  %v572_v4 = vld [vmem:[%s754_s1 + $0x70] sm:$0xff]   ;;  %v576_v8 = vld [vmem:[%s754_s1 + $0x68] sm:$0xff]  }
   0x2   :  { %v569_v1 = vld [vmem:[%s754_s1 + $0x38] sm:$0xff]   ;;  %505 = vmatprep.subr.bf16.mxu0 %v568_v0  ;;  %v573_v5 = vld [vmem:[%s754_s1 + $0x30] sm:$0xff]   ;;  %v577_v9 = vld [vmem:[%s754_s1 + $0x28] sm:$0xff]  }
   0x3   :  { %v570_v2 = vld [vmem:[%s754_s1 + $0xf8] sm:$0xff]   ;;  %506 = vmatpush3.bf16.msra.mxu0 %v569_v1  ;;  %v574_v6 = vld [vmem:[%s754_s1 + $0xf0] sm:$0xff]   ;;  %v578_v10 = vld [vmem:[%s754_s1 + $0xe8] sm:$0xff]  }
   0x4   :  { %v571_v3 = vld [vmem:[%s754_s1 + $0xb8] sm:$0xff]   ;;  %527 = vmatprep.subr.bf16.mxu1 %v570_v2  ;;  %507 = vmatprep.subr.bf16.mxu0 %v572_v4  ;;  %v575_v7 = vld [vmem:[%s754_s1 + $0xb0] sm:$0xff]   ;;  %v579_v11 = vld [vmem:[%s754_s1 + $0xa8] sm:$0xff]  }
   0x5   :  { %528 = vmatpush3.bf16.msra.mxu1 %v571_v3  ;;  %v580_v12 = vld [vmem:[%s754_s1 + $0x60] sm:$0xff]   ;;  %v584_v16 = vld [vmem:[%s754_s1 + $0x58] sm:$0xff]   ;;  %v588_v20 = vld [vmem:[%s754_s1 + $0x50] sm:$0xff]  }
   0x6   :  { %529 = vmatprep.subr.bf16.mxu1 %v574_v6  ;;  %v581_v13 = vld [vmem:[%s754_s1 + $0x20] sm:$0xff]   ;;  %v585_v17 = vld [vmem:[%s754_s1 + $0x18] sm:$0xff]   ;;  %v589_v21 = vld [vmem:[%s754_s1 + $0x10] sm:$0xff]  }
   0x7   :  { %508 = vmatpush3.bf16.msra.mxu0 %v573_v5  ;;  %v582_v14 = vld [vmem:[%s754_s1 + $0xe0] sm:$0xff]   ;;  %v586_v18 = vld [vmem:[%s754_s1 + $0xd8] sm:$0xff]   ;;  %v590_v22 = vld [vmem:[%s754_s1 + $0xd0] sm:$0xff]  }
   0x8   :  { %509 = vmatprep.subr.bf16.mxu0 %v576_v8  ;;  %v583_v15 = vld [vmem:[%s754_s1 + $0xa0] sm:$0xff]   ;;  %v587_v19 = vld [vmem:[%s754_s1 + $0x98] sm:$0xff]   ;;  %v591_v23 = vld [vmem:[%s754_s1 + $0x90] sm:$0xff]  }
   0x9   :  { %530 = vmatpush3.bf16.msra.mxu1 %v575_v7  ;;  %v592_v24 = vld [vmem:[%s754_s1 + $0x48] sm:$0xff]   ;;  %v596_v28 = vld [vmem:[%s754_s1 + $0x40] sm:$0xff]   ;;  %v605_v39 = vld [vmem:[%s754_s1 + $0x118] sm:$0xff]  }
   0xa   :  { %531 = vmatprep.subr.bf16.mxu1 %v578_v10  ;;  %v593_v25 = vld [vmem:[%s754_s1 + $0x8] sm:$0xff]   ;;  %v597_v29 = vld [vmem:[%s754_s1] sm:$0xff]   ;;  %v606_v40 = vld [vmem:[%s754_s1 + $0x110] sm:$0xff]  }
   0xb   :  { %510 = vmatpush3.bf16.msra.mxu0 %v577_v9  ;;  %v594_v26 = vld [vmem:[%s754_s1 + $0xc8] sm:$0xff]   ;;  %v598_v30 = vld [vmem:[%s754_s1 + $0xc0] sm:$0xff]   ;;  %v601_v43 = vld [vmem:[%s755_s0 + $0x10] ss:$0 sps:$4 sm:$0xff]  }
   0xc   :  { %511 = vmatprep.subr.bf16.mxu0 %v580_v12  ;;  %v595_v27 = vld [vmem:[%s754_s1 + $0x88] sm:$0xff]   ;;  %v15_v31 = vld [vmem:[%s755_s0] sm:$0xff] }
   0xd   :  { %532 = vmatpush3.bf16.msra.mxu1 %v579_v11  ;;  %v463_v32 = vcombine.low %v15_v31, %v15_v31  ;;  %v464_v33 = vcombine.high %v15_v31, %v15_v31  ;;  %v602_v34 = vld [vmem:[%s754_s1 + $0x80] sm:$0xff]   ;;  %v16_v36 = vld [vmem:[%s755_s0 + $0x8] sm:$0xff] }
   0xe   :  { %533 = vmatprep.subr.bf16.mxu1 %v582_v14  ;;  %v465_v37 = vcombine.low %v16_v36, %v16_v36  ;;  %v466_v38 = vcombine.high %v16_v36, %v16_v36  ;;  %v607_v41 = vld [vmem:[%s754_s1 + $0x108] sm:$0xff]   ;;  %v608_v42 = vld [vmem:[%s754_s1 + $0x100] sm:$0xff]  }
   0xf   :  { %512 = vmatpush3.bf16.msra.mxu0 %v581_v13  ;;  %366 = vmatprep.mubr.bf16.mxu0 %v464_v33  ;;  %v462_v52 = vld [vmem:[%s756_s2] ss:$0 sm:$0xff] }
  0x10   :  { %513 = vmatprep.subr.bf16.mxu0 %v584_v16  ;;  %406 = vmatprep.mubr.bf16.mxu1 %v466_v38 }
  0x11   :  { %534 = vmatpush3.bf16.msra.mxu1 %v583_v15 }
  0x12   :  { %535 = vmatprep.subr.bf16.mxu1 %v586_v18 }
  0x13   :  { %514 = vmatpush3.bf16.msra.mxu0 %v585_v17 }
  0x14   :  { %515 = vmatprep.subr.bf16.mxu0 %v588_v20 }
  0x15   :  { %536 = vmatpush3.bf16.msra.mxu1 %v587_v19 }
  0x16   :  { %537 = vmatprep.subr.bf16.mxu1 %v590_v22 }
  0x17   :  { %516 = vmatpush3.bf16.msra.mxu0 %v589_v21 }
  0x18   :  { %517 = vmatprep.subr.bf16.mxu0 %v592_v24 }
  0x19   :  { %538 = vmatpush3.bf16.msra.mxu1 %v591_v23 }
  0x1a   :  { %539 = vmatprep.subr.bf16.mxu1 %v594_v26 }
  0x1b   :  { %518 = vmatpush3.bf16.msra.mxu0 %v593_v25 }
  0x1c   :  { %519 = vmatprep.subr.bf16.mxu0 %v596_v28 }
  0x1d   :  { %540 = vmatpush3.bf16.msra.mxu1 %v595_v27 }
  0x1e   :  { %541 = vmatprep.subr.bf16.mxu1 %v598_v30 }
  0x1f   :  { %520 = vmatpush3.bf16.msra.mxu0 %v597_v29 }
  0x20   :  { %554 = vmatprep.subr.bf16.mxu0 %v609_v35 }
  0x21   :  { %542 = vmatpush3.bf16.msra.mxu1 %v602_v34 }
  0x22   :  { %367 = vmatmul.mubr.bf16.vlgmr.msra.gmra.mxu0 %v463_v32 }
  0x23   :  { %555 = vmatpush3.bf16.msra.mxu0 %v605_v39  ;;  %562 = vmatprep.mubr.msk.bf16.mxu0 %vm610_vm0, %v609_v35 }
  0x24   :  { %407 = vmatmul.mubr.bf16.vlgmr.msra.gmra.mxu1 %v465_v37  ;;  %556 = vmatprep.subr.bf16.mxu0 %v609_v35 }
  0x27   :  { %557 = vmatpush3.bf16.msra.mxu0 %v606_v40 }
  0x28   :  { %558 = vmatprep.subr.bf16.mxu0 %v609_v35 }
  0x2b   :  { %559 = vmatpush3.bf16.msra.mxu0 %v607_v41 }
  0x2c   :  { %560 = vmatprep.subr.bf16.mxu0 %v609_v35 }
  0x2f   :  { %561 = vmatpush3.bf16.msra.mxu0 %v608_v42 }
  0x32   :  { %563 = vmatmul.mubr.msk.bf16.vlgmr.msra.gmra.mxu0 %vm330_vm1, %v601_v43 }
  0xe2   :  { %v521_v44 = vpop.f32.mrf.mxu0 }
  0xe4   :  { %v522_v45 = vpop.f32.mrf.mxu0  ;;  %v543_v46 = vpop.f32.mrf.mxu1 }
  0xe5   :  { %v523_v51 = vadd.f32 %v522_v45, %v521_v44 }
  0xe6   :  { %v524_v47 = vpop.f32.mrf.mxu0  ;;  %v544_v48 = vpop.f32.mrf.mxu1 }
  0xe7   :  { %v369_v54 = vadd.f32 %v523_v51, %v462_v52  ;;  %v545_v55 = vadd.f32 %v544_v48, %v543_v46 }
  0xe8   :  { %v525_v49 = vpop.f32.mrf.mxu0  ;;  %v546_v50 = vpop.f32.mrf.mxu1 }
  0xe9   :  { %v409_v56 = vadd.f32 %v545_v55, %v369_v54 }
  0xea   :  { %v547_v53 = vpop.f32.mrf.mxu1 }
  0xf2   :  { %v448_v57 = vpop.f32.mrf.mxu0 }
  0xf3   :  { %v449_v58 = vadd.f32 %v448_v57, %v409_v56 }
  0xf4   :  { %v564_v59 = vpop.f32.mrf.mxu0 }
  0xf5   :  { %v454_v60 = vmax.f32 %v449_v58, 0.0 }
  0xf6   :  { %v451_v61 = vpop.f32.mrf.mxu0 }
  0xf7   :  { %v455_v62 = vpack.c.bf16 %v454_v60, %v454_v60 }
  0xf8   :  { %v565_v63 = vpop.f32.mrf.mxu0 }
  0xf9   :  { %457 = vst.msk [vmem:[%s757_s3] sm:$0xf] %vm456_vm2, %v455_v62 }

// kernel: resnet_forward.37
= control target key start
LH: loop header
LB: loop body
LE: loop exit
PB: predicated region body
PF: predicated region fallthrough
CT: control target
= control target key end

     0   :  { %s341_s1 = inlined_call_operand.vmem [shape: bf16[256,128], index: 1, kind: input, shape index: {}]   ;;  %s342_s0 = inlined_call_operand.vmem [shape: bf16[8,256], index: 0, kind: input, shape index: {}]   ;;  %s343_s2 = inlined_call_operand.vmem [shape: f32[1,128], index: 2, kind: input, shape index: {}]   ;;  %s344_s3 = inlined_call_operand.vmem [shape: bf16[8,128], index: 3, kind: output, shape index: {}]  }
   0x1   :  { %v246_v0 = vld [vmem:[%s341_s1 + $0x78] sm:$0xff]   ;;  %v248_v2 = vld [vmem:[%s341_s1 + $0x70] sm:$0xff]   ;;  %v250_v4 = vld [vmem:[%s341_s1 + $0x68] sm:$0xff]  }
   0x2   :  { %v247_v1 = vld [vmem:[%s341_s1 + $0x38] sm:$0xff]   ;;  %224 = vmatprep.subr.bf16.mxu0 %v246_v0  ;;  %v249_v3 = vld [vmem:[%s341_s1 + $0x30] sm:$0xff]   ;;  %v251_v5 = vld [vmem:[%s341_s1 + $0x28] sm:$0xff]  }
   0x3   :  { %225 = vmatpush3.bf16.msra.mxu0 %v247_v1  ;;  %v252_v6 = vld [vmem:[%s341_s1 + $0x60] sm:$0xff]   ;;  %v254_v8 = vld [vmem:[%s341_s1 + $0x58] sm:$0xff]   ;;  %v256_v10 = vld [vmem:[%s341_s1 + $0x50] sm:$0xff]  }
   0x4   :  { %226 = vmatprep.subr.bf16.mxu0 %v248_v2  ;;  %v253_v7 = vld [vmem:[%s341_s1 + $0x20] sm:$0xff]   ;;  %v255_v9 = vld [vmem:[%s341_s1 + $0x18] sm:$0xff]   ;;  %v257_v13 = vld [vmem:[%s341_s1 + $0x10] sm:$0xff]  }
   0x5   :  { %v15_v11 = vld [vmem:[%s342_s0] sm:$0xff]  ;;  %v258_v14 = vld [vmem:[%s341_s1 + $0x48] sm:$0xff]  }
   0x6   :  { %v207_v12 = vcombine.high %v15_v11, %v15_v11  ;;  %v259_v15 = vld [vmem:[%s341_s1 + $0x8] sm:$0xff]   ;;  %v260_v16 = vld [vmem:[%s341_s1 + $0x40] sm:$0xff]   ;;  %v206_v18 = vcombine.low %v15_v11, %v15_v11 }
   0x7   :  { %227 = vmatpush3.bf16.msra.mxu0 %v249_v3  ;;  %v261_v17 = vld [vmem:[%s341_s1] sm:$0xff]  }
   0x8   :  { %228 = vmatprep.subr.bf16.mxu0 %v250_v4  ;;  %190 = vmatprep.mubr.bf16.mxu0 %v207_v12  ;;  %v205_v20 = vld [vmem:[%s343_s2] ss:$0 sm:$0xff] }
   0xb   :  { %229 = vmatpush3.bf16.msra.mxu0 %v251_v5 }
   0xc   :  { %230 = vmatprep.subr.bf16.mxu0 %v252_v6 }
   0xf   :  { %231 = vmatpush3.bf16.msra.mxu0 %v253_v7 }
  0x10   :  { %232 = vmatprep.subr.bf16.mxu0 %v254_v8 }
  0x13   :  { %233 = vmatpush3.bf16.msra.mxu0 %v255_v9 }
  0x14   :  { %234 = vmatprep.subr.bf16.mxu0 %v256_v10 }
  0x17   :  { %235 = vmatpush3.bf16.msra.mxu0 %v257_v13 }
  0x18   :  { %236 = vmatprep.subr.bf16.mxu0 %v258_v14 }
  0x1b   :  { %237 = vmatpush3.bf16.msra.mxu0 %v259_v15 }
  0x1c   :  { %238 = vmatprep.subr.bf16.mxu0 %v260_v16 }
  0x1f   :  { %239 = vmatpush3.bf16.msra.mxu0 %v261_v17 }
  0x22   :  { %191 = vmatmul.mubr.bf16.vlgmr.msra.gmra.mxu0 %v206_v18 }
  0xe2   :  { %v240_v19 = vpop.f32.mrf.mxu0 }
  0xe4   :  { %v241_v21 = vpop.f32.mrf.mxu0 }
  0xe5   :  { %v242_v22 = vadd.f32 %v241_v21, %v240_v19 }
  0xe6   :  { %v243_v23 = vpop.f32.mrf.mxu0 }
  0xe7   :  { %v193_v24 = vadd.f32 %v242_v22, %v205_v20 }
  0xe8   :  { %v244_v25 = vpop.f32.mrf.mxu0 }
  0xe9   :  { %v198_v26 = vmax.f32 %v193_v24, 0.0 }
  0xeb   :  { %v199_v27 = vpack.c.bf16 %v198_v26, %v198_v26 }
  0xed   :  { %200 = vst [vmem:[%s344_s3] sm:$0xf] %v199_v27 }

// kernel: resnet_forward.36
= control target key start
LH: loop header
LB: loop body
LE: loop exit
PB: predicated region body
PF: predicated region fallthrough
CT: control target
= control target key end

     0   :  { %v168_v1 = vmov 0   ;;  %vm79_vm0 = vcmask 523264   ;;  %v29_v10 = vlaneseq  ;;  %s230_s1 = inlined_call_operand.vmem [shape: bf16[64,256], index: 1, kind: input, shape index: {}]   ;;  %s231_s0 = inlined_call_operand.vmem [shape: bf16[8,64], index: 0, kind: input, shape index: {}]   ;;  %s232_s2 = inlined_call_operand.vmem [shape: f32[1,256], index: 2, kind: input, shape index: {}]   ;;  %s233_s3 = inlined_call_operand.vmem [shape: bf16[8,256], index: 3, kind: input, shape index: {}]   ;;  %s234_s4 = inlined_call_operand.vmem [shape: bf16[8,256], index: 4, kind: output, shape index: {}]  }
   0x1   :  { %v156_v0 = vld [vmem:[%s230_s1 + $0x34] ss:$8 sps:$4 sm:$0xff]   ;;  %115 = vmatprep.mubr.bf16.mxu0 %v168_v1  ;;  %v158_v2 = vld [vmem:[%s230_s1 + $0x30] ss:$8 sps:$4 sm:$0xff]   ;;  %v159_v3 = vld [vmem:[%s230_s1 + $0x24] ss:$8 sps:$4 sm:$0xff]  }
   0x2   :  { %91 = vmatprep.subr.bf16.mxu0 %v156_v0  ;;  %v161_v4 = vld [vmem:[%s230_s1 + $0x20] ss:$8 sps:$4 sm:$0xff]   ;;  %v162_v5 = vld [vmem:[%s230_s1 + $0x14] ss:$8 sps:$4 sm:$0xff]   ;;  %v164_v6 = vld [vmem:[%s230_s1 + $0x10] ss:$8 sps:$4 sm:$0xff]  }
   0x3   :  { %92 = vmatpush1.bf16.msra.mxu0 %v158_v2  ;;  %v165_v7 = vld [vmem:[%s230_s1 + $0x4] ss:$8 sps:$4 sm:$0xff]   ;;  %v167_v8 = vld [vmem:[%s230_s1] ss:$8 sps:$4 sm:$0xff]   ;;  %v30_v11 = vshrl.u32 %v29_v10, 7 }
   0x4   :  { %93 = vmatprep.subr.bf16.mxu0 %v159_v3  ;;  %v18_v9 = vld [vmem:[%s231_s0] sm:$0xf] }
   0x5   :  { %v31_v12 = vsub.s32 0, %v30_v11  ;;  %v27_v13 = vld [vmem:[%s232_s2] sm:$0x3]  ;;  %v35_v14 = vsub.s32 1, %v30_v11 }
   0x6   :  { %v124_v15 = vld [vmem:[%s233_s3] sm:$0xff] }
   0x7   :  { %94 = vmatpush1.bf16.msra.mxu0 %v161_v4  ;;  %v32_v16 = vrot.slane %v27_v13, %v31_v12  ;;  %v125_v17 = vunpack.c.l.bf16 %v124_v15  ;;  %v36_v18 = vrot.slane %v27_v13, %v35_v14  ;;  %v126_v21 = vunpack.c.h.bf16 %v124_v15 }
   0x8   :  { %95 = vmatprep.subr.bf16.mxu0 %v162_v5 }
   0xb   :  { %96 = vmatpush1.bf16.msra.mxu0 %v164_v6 }
   0xc   :  { %97 = vmatprep.subr.bf16.mxu0 %v165_v7 }
   0xf   :  { %98 = vmatpush1.bf16.msra.mxu0 %v167_v8 }
  0x12   :  { %152 = vmatmul.mubr.msk.bf16.vlgmr.msra.gmra.mxu0 %vm79_vm0, %v18_v9 }
  0xd2   :  { %v117_v19 = vpop.f32.mrf.mxu0 }
  0xd3   :  { %v118_v20 = vadd.f32 %v117_v19, %v32_v16 }
  0xd4   :  { %v119_v22 = vpop.f32.mrf.mxu0 }
  0xd5   :  { %v127_v23 = vadd.f32 %v125_v17, %v118_v20  ;;  %v120_v24 = vadd.f32 %v119_v22, %v36_v18 }
  0xd6   :  { %v121_v25 = vpop.f32.mrf.mxu0 }
  0xd7   :  { %v128_v26 = vadd.f32 %v126_v21, %v120_v24  ;;  %v129_v28 = vmax.f32 %v127_v23, 0.0 }
  0xd8   :  { %v122_v27 = vpop.f32.mrf.mxu0 }
  0xd9   :  { %v130_v29 = vmax.f32 %v128_v26, 0.0 }
  0xdb   :  { %v154_v30 = vpack.c.bf16 %v130_v29, %v129_v28 }
  0xdd   :  { %139 = vst [vmem:[%s234_s4] sm:$0xff] %v154_v30 }

// kernel: resnet_forward.40
= control target key start
LH: loop header
LB: loop body
LE: loop exit
PB: predicated region body
PF: predicated region fallthrough
CT: control target
= control target key end

     0   :  { %v471_v1 = vmov 0   ;;  %v53_v34 = vlaneseq  ;;  %v472_v35 = vmov 1983009808   ;;  %v473_v52 = vmov 1966171168   ;;  %s607_s1 = inlined_call_operand.vmem [shape: bf16[128,512], index: 1, kind: input, shape index: {}]   ;;  %s608_s0 = inlined_call_operand.vmem [shape: bf16[2,128], index: 0, kind: input, shape index: {}]   ;;  %s609_s3 = inlined_call_operand.vmem [shape: bf16[2,512], index: 3, kind: input, shape index: {}]   ;;  %s610_s2 = inlined_call_operand.vmem [shape: f32[1,512], index: 2, kind: input, shape index: {}]   ;;  %s611_s4 = inlined_call_operand.vmem [shape: bf16[2,512], index: 4, kind: output, shape index: {}]  }
   0x1   :  { %v423_v0 = vld [vmem:[%s607_s1 + $0xe4] ss:$16 sps:$4 sm:$0xff]   ;;  %265 = vmatprep.mubr.bf16.mxu0 %v471_v1  ;;  %306 = vmatprep.mubr.bf16.mxu1 %v471_v1  ;;  %v425_v2 = vld [vmem:[%s607_s1 + $0xec] ss:$16 sps:$4 sm:$0xff]   ;;  %v427_v3 = vld [vmem:[%s607_s1 + $0xe0] ss:$16 sps:$4 sm:$0xff]   ;;  %v320_v36 = vunpack.c.l.s4 %v472_v35  ;;  %v358_v53 = vunpack.c.l.s4 %v473_v52 }
   0x2   :  { %233 = vmatprep.subr.bf16.mxu0 %v423_v0  ;;  %v428_v4 = vld [vmem:[%s607_s1 + $0xe8] ss:$16 sps:$4 sm:$0xff]   ;;  %274 = vmatprep.subr.bf16.mxu1 %v425_v2  ;;  %v429_v5 = vld [vmem:[%s607_s1 + $0xc4] ss:$16 sps:$4 sm:$0xff]   ;;  %v431_v6 = vld [vmem:[%s607_s1 + $0xcc] ss:$16 sps:$4 sm:$0xff]  }
   0x3   :  { %234 = vmatpush1.bf16.msra.mxu0 %v427_v3  ;;  %275 = vmatpush1.bf16.msra.mxu1 %v428_v4  ;;  %v433_v7 = vld [vmem:[%s607_s1 + $0xc0] ss:$16 sps:$4 sm:$0xff]   ;;  %v434_v8 = vld [vmem:[%s607_s1 + $0xc8] ss:$16 sps:$4 sm:$0xff]   ;;  %v435_v9 = vld [vmem:[%s607_s1 + $0xa4] ss:$16 sps:$4 sm:$0xff]   ;;  %v321_v40 = vunpack.c.0.s8 %v320_v36  ;;  %v359_v63 = vunpack.c.0.s8 %v358_v53 }
   0x4   :  { %235 = vmatprep.subr.bf16.mxu0 %v429_v5  ;;  %276 = vmatprep.subr.bf16.mxu1 %v431_v6  ;;  %v437_v10 = vld [vmem:[%s607_s1 + $0xac] ss:$16 sps:$4 sm:$0xff]   ;;  %v439_v11 = vld [vmem:[%s607_s1 + $0xa0] ss:$16 sps:$4 sm:$0xff]   ;;  %v440_v12 = vld [vmem:[%s607_s1 + $0xa8] ss:$16 sps:$4 sm:$0xff]  }
   0x5   :  { %v441_v13 = vld [vmem:[%s607_s1 + $0x84] ss:$16 sps:$4 sm:$0xff]   ;;  %v443_v14 = vld [vmem:[%s607_s1 + $0x8c] ss:$16 sps:$4 sm:$0xff]   ;;  %v445_v15 = vld [vmem:[%s607_s1 + $0x80] ss:$16 sps:$4 sm:$0xff]  }
   0x6   :  { %v446_v16 = vld [vmem:[%s607_s1 + $0x88] ss:$16 sps:$4 sm:$0xff]   ;;  %v447_v17 = vld [vmem:[%s607_s1 + $0x64] ss:$16 sps:$4 sm:$0xff]   ;;  %v449_v18 = vld [vmem:[%s607_s1 + $0x6c] ss:$16 sps:$4 sm:$0xff]  }
   0x7   :  { %236 = vmatpush1.bf16.msra.mxu0 %v433_v7  ;;  %277 = vmatpush1.bf16.msra.mxu1 %v434_v8  ;;  %v451_v19 = vld [vmem:[%s607_s1 + $0x60] ss:$16 sps:$4 sm:$0xff]   ;;  %v452_v20 = vld [vmem:[%s607_s1 + $0x68] ss:$16 sps:$4 sm:$0xff]   ;;  %v453_v21 = vld [vmem:[%s607_s1 + $0x44] ss:$16 sps:$4 sm:$0xff]  }
   0x8   :  { %237 = vmatprep.subr.bf16.mxu0 %v435_v9  ;;  %278 = vmatprep.subr.bf16.mxu1 %v437_v10  ;;  %v455_v22 = vld [vmem:[%s607_s1 + $0x4c] ss:$16 sps:$4 sm:$0xff]   ;;  %v457_v23 = vld [vmem:[%s607_s1 + $0x40] ss:$16 sps:$4 sm:$0xff]   ;;  %v458_v24 = vld [vmem:[%s607_s1 + $0x48] ss:$16 sps:$4 sm:$0xff]  }
   0x9   :  { %v459_v25 = vld [vmem:[%s607_s1 + $0x24] ss:$16 sps:$4 sm:$0xff]   ;;  %v461_v26 = vld [vmem:[%s607_s1 + $0x2c] ss:$16 sps:$4 sm:$0xff]   ;;  %v463_v27 = vld [vmem:[%s607_s1 + $0x20] ss:$16 sps:$4 sm:$0xff]  }
   0xa   :  { %v464_v28 = vld [vmem:[%s607_s1 + $0x28] ss:$16 sps:$4 sm:$0xff]   ;;  %v465_v29 = vld [vmem:[%s607_s1 + $0x4] ss:$16 sps:$4 sm:$0xff]   ;;  %v467_v30 = vld [vmem:[%s607_s1 + $0xc] ss:$16 sps:$4 sm:$0xff]  }
   0xb   :  { %238 = vmatpush1.bf16.msra.mxu0 %v439_v11  ;;  %279 = vmatpush1.bf16.msra.mxu1 %v440_v12  ;;  %v469_v31 = vld [vmem:[%s607_s1] ss:$16 sps:$4 sm:$0xff]   ;;  %v470_v32 = vld [vmem:[%s607_s1 + $0x8] ss:$16 sps:$4 sm:$0xff]   ;;  %v54_v38 = vshrl.u32 %v53_v34, 7 }
   0xc   :  { %239 = vmatprep.subr.bf16.mxu0 %v441_v13  ;;  %280 = vmatprep.subr.bf16.mxu1 %v443_v14  ;;  %v18_v33 = vld [vmem:[%s608_s0] sm:$0x1] }
   0xd   :  { %v315_v37 = vld [vmem:[%s609_s3] sm:$0xf]  ;;  %v55_v41 = vsub.s32 0, %v54_v38  ;;  %v324_v42 = vsub.s32 %v321_v40, %v54_v38  ;;  %v63_v43 = vsub.s32 2, %v54_v38  ;;  %v59_v46 = vsub.s32 1, %v54_v38 }
   0xe   :  { %v316_v39 = vunpack.c.l.bf16 %v315_v37  ;;  %v51_v45 = vld [vmem:[%s610_s2] sm:$0xf]  ;;  %v67_v47 = vsub.s32 3, %v54_v38  ;;  %v362_v9 = vsub.s32 %v359_v63, %v54_v38 }
   0xf   :  { %240 = vmatpush1.bf16.msra.mxu0 %v445_v15  ;;  %281 = vmatpush1.bf16.msra.mxu1 %v446_v16  ;;  %v56_v48 = vrot.slane %v51_v45, %v55_v41  ;;  %v64_v50 = vrot.slane %v51_v45, %v63_v43  ;;  %v60_v54 = vrot.slane %v51_v45, %v59_v46 }
  0x10   :  { %241 = vmatprep.subr.bf16.mxu0 %v447_v17  ;;  %282 = vmatprep.subr.bf16.mxu1 %v449_v18  ;;  %v318_v44 = vcombine.high %v316_v39, %v316_v39  ;;  %v325_v49 = vrot.slane %v316_v39, %v324_v42  ;;  %v68_v55 = vrot.slane %v51_v45, %v67_v47 }
  0x12   :  { %v332_v51 = vrot.slane %v318_v44, %v324_v42  ;;  %v333_v60 = vcombine.high %v325_v49, %v325_v49 }
  0x13   :  { %242 = vmatpush1.bf16.msra.mxu0 %v451_v19  ;;  %283 = vmatpush1.bf16.msra.mxu1 %v452_v20 }
  0x14   :  { %243 = vmatprep.subr.bf16.mxu0 %v453_v21  ;;  %284 = vmatprep.subr.bf16.mxu1 %v455_v22  ;;  %v334_v61 = vcombine.high %v332_v51, %v332_v51 }
  0x17   :  { %244 = vmatpush1.bf16.msra.mxu0 %v457_v23  ;;  %285 = vmatpush1.bf16.msra.mxu1 %v458_v24 }
  0x18   :  { %245 = vmatprep.subr.bf16.mxu0 %v459_v25  ;;  %286 = vmatprep.subr.bf16.mxu1 %v461_v26 }
  0x1b   :  { %246 = vmatpush1.bf16.msra.mxu0 %v463_v27  ;;  %287 = vmatpush1.bf16.msra.mxu1 %v464_v28 }
  0x1c   :  { %247 = vmatprep.subr.bf16.mxu0 %v465_v29  ;;  %288 = vmatprep.subr.bf16.mxu1 %v467_v30 }
  0x1f   :  { %248 = vmatpush1.bf16.msra.mxu0 %v469_v31  ;;  %289 = vmatpush1.bf16.msra.mxu1 %v470_v32 }
  0x22   :  { %266 = vmatmul.mubr.bf16.vlgmr.msra.gmra.mxu0 %v18_v33  ;;  %307 = vmatmul.mubr.bf16.vlgmr.msra.gmra.mxu1 %v18_v33 }
  0xe2   :  { %v267_v56 = vpop.f32.mrf.mxu0  ;;  %v308_v57 = vpop.f32.mrf.mxu1 }
  0xe3   :  { %v268_v58 = vadd.f32 %v267_v56, %v56_v48  ;;  %v309_v59 = vadd.f32 %v308_v57, %v64_v50 }
  0xe4   :  { %v269_v62 = vpop.f32.mrf.mxu0  ;;  %v310_v0 = vpop.f32.mrf.mxu1 }
  0xe5   :  { %v339_v1 = vadd.f32 %v325_v49, %v268_v58  ;;  %v341_v2 = vadd.f32 %v332_v51, %v309_v59  ;;  %v270_v3 = vadd.f32 %v269_v62, %v60_v54  ;;  %v311_v4 = vadd.f32 %v310_v0, %v68_v55 }
  0xe6   :  { %v271_v5 = vpop.f32.mrf.mxu0  ;;  %v312_v6 = vpop.f32.mrf.mxu1 }
  0xe7   :  { %v340_v7 = vadd.f32 %v333_v60, %v270_v3  ;;  %v342_v8 = vadd.f32 %v334_v61, %v311_v4  ;;  %v343_v12 = vmax.f32 %v339_v1, 0.0  ;;  %v345_v13 = vmax.f32 %v341_v2, 0.0 }
  0xe8   :  { %v272_v10 = vpop.f32.mrf.mxu0  ;;  %v313_v11 = vpop.f32.mrf.mxu1 }
  0xe9   :  { %v344_v14 = vmax.f32 %v340_v7, 0.0  ;;  %v346_v15 = vmax.f32 %v342_v8, 0.0 }
  0xeb   :  { %v417_v16 = vpack.c.bf16 %v344_v14, %v343_v12  ;;  %v418_v17 = vpack.c.bf16 %v346_v15, %v345_v13 }
  0xed   :  { %v363_v18 = vrot.slane %v417_v16, %v362_v9  ;;  %v370_v19 = vrot.slane %v418_v17, %v362_v9 }
  0xef   :  { %v371_v20 = vcombine.low %v363_v18, %v370_v19 }
  0xf1   :  { %419 = vst.sshfl [vmem:[%s611_s4] sm:$0x55 pattern:$0x73625140] %v371_v20 }

// kernel: resnet_forward.39
= control target key start
LH: loop header
LB: loop body
LE: loop exit
PB: predicated region body
PF: predicated region fallthrough
CT: control target
= control target key end

     0   :  { %v81_v38 = vlaneseq  ;;  %v731_v39 = vmov 1966171168   ;;  %s966_s1 = inlined_call_operand.vmem [shape: bf16[256,512], index: 1, kind: input, shape index: {}]   ;;  %s967_s0 = inlined_call_operand.vmem [shape: bf16[2,256], index: 0, kind: input, shape index: {}]   ;;  %s968_s2 = inlined_call_operand.vmem [shape: f32[1,512], index: 2, kind: input, shape index: {}]   ;;  %s969_s3 = inlined_call_operand.vmem [shape: bf16[2,512], index: 3, kind: output, shape index: {}]  }
   0x1   :  { %v635_v0 = vld [vmem:[%s966_s1 + $0xe4] ss:$16 sps:$4 sm:$0xff]   ;;  %v637_v1 = vld [vmem:[%s966_s1 + $0xec] ss:$16 sps:$4 sm:$0xff]   ;;  %v639_v2 = vld [vmem:[%s966_s1 + $0xe0] ss:$16 sps:$4 sm:$0xff]   ;;  %v111_v40 = vunpack.c.l.s4 %v731_v39 }
   0x2   :  { %446 = vmatprep.subr.bf16.mxu0 %v635_v0  ;;  %v640_v3 = vld [vmem:[%s966_s1 + $0xe8] ss:$16 sps:$4 sm:$0xff]   ;;  %487 = vmatprep.subr.bf16.mxu1 %v637_v1  ;;  %v641_v4 = vld [vmem:[%s966_s1 + $0xc4] ss:$16 sps:$4 sm:$0xff]   ;;  %v643_v5 = vld [vmem:[%s966_s1 + $0xcc] ss:$16 sps:$4 sm:$0xff]  }
   0x3   :  { %447 = vmatpush1.bf16.msra.mxu0 %v639_v2  ;;  %488 = vmatpush1.bf16.msra.mxu1 %v640_v3  ;;  %v645_v6 = vld [vmem:[%s966_s1 + $0xc0] ss:$16 sps:$4 sm:$0xff]   ;;  %v646_v7 = vld [vmem:[%s966_s1 + $0xc8] ss:$16 sps:$4 sm:$0xff]   ;;  %v647_v8 = vld [vmem:[%s966_s1 + $0xa4] ss:$16 sps:$4 sm:$0xff]   ;;  %v112_v46 = vunpack.c.0.s8 %v111_v40 }
   0x4   :  { %448 = vmatprep.subr.bf16.mxu0 %v641_v4  ;;  %489 = vmatprep.subr.bf16.mxu1 %v643_v5  ;;  %v649_v9 = vld [vmem:[%s966_s1 + $0xac] ss:$16 sps:$4 sm:$0xff]   ;;  %v651_v10 = vld [vmem:[%s966_s1 + $0xa0] ss:$16 sps:$4 sm:$0xff]   ;;  %v652_v11 = vld [vmem:[%s966_s1 + $0xa8] ss:$16 sps:$4 sm:$0xff]  }
   0x5   :  { %v653_v12 = vld [vmem:[%s966_s1 + $0x84] ss:$16 sps:$4 sm:$0xff]   ;;  %v655_v13 = vld [vmem:[%s966_s1 + $0x8c] ss:$16 sps:$4 sm:$0xff]   ;;  %v657_v14 = vld [vmem:[%s966_s1 + $0x80] ss:$16 sps:$4 sm:$0xff]  }
   0x6   :  { %v658_v15 = vld [vmem:[%s966_s1 + $0x88] ss:$16 sps:$4 sm:$0xff]   ;;  %v659_v16 = vld [vmem:[%s966_s1 + $0x64] ss:$16 sps:$4 sm:$0xff]   ;;  %v661_v17 = vld [vmem:[%s966_s1 + $0x6c] ss:$16 sps:$4 sm:$0xff]  }
   0x7   :  { %449 = vmatpush1.bf16.msra.mxu0 %v645_v6  ;;  %490 = vmatpush1.bf16.msra.mxu1 %v646_v7  ;;  %v663_v18 = vld [vmem:[%s966_s1 + $0x60] ss:$16 sps:$4 sm:$0xff]   ;;  %v664_v19 = vld [vmem:[%s966_s1 + $0x68] ss:$16 sps:$4 sm:$0xff]   ;;  %v665_v20 = vld [vmem:[%s966_s1 + $0x44] ss:$16 sps:$4 sm:$0xff]  }
   0x8   :  { %450 = vmatprep.subr.bf16.mxu0 %v647_v8  ;;  %491 = vmatprep.subr.bf16.mxu1 %v649_v9  ;;  %v667_v21 = vld [vmem:[%s966_s1 + $0x4c] ss:$16 sps:$4 sm:$0xff]   ;;  %v669_v22 = vld [vmem:[%s966_s1 + $0x40] ss:$16 sps:$4 sm:$0xff]   ;;  %v670_v23 = vld [vmem:[%s966_s1 + $0x48] ss:$16 sps:$4 sm:$0xff]  }
   0x9   :  { %v671_v24 = vld [vmem:[%s966_s1 + $0x24] ss:$16 sps:$4 sm:$0xff]   ;;  %v673_v25 = vld [vmem:[%s966_s1 + $0x2c] ss:$16 sps:$4 sm:$0xff]   ;;  %v675_v26 = vld [vmem:[%s966_s1 + $0x20] ss:$16 sps:$4 sm:$0xff]  }
   0xa   :  { %v676_v27 = vld [vmem:[%s966_s1 + $0x28] ss:$16 sps:$4 sm:$0xff]   ;;  %v677_v28 = vld [vmem:[%s966_s1 + $0x4] ss:$16 sps:$4 sm:$0xff]   ;;  %v679_v29 = vld [vmem:[%s966_s1 + $0xc] ss:$16 sps:$4 sm:$0xff]  }
   0xb   :  { %451 = vmatpush1.bf16.msra.mxu0 %v651_v10  ;;  %492 = vmatpush1.bf16.msra.mxu1 %v652_v11  ;;  %v681_v30 = vld [vmem:[%s966_s1] ss:$16 sps:$4 sm:$0xff]   ;;  %v682_v31 = vld [vmem:[%s966_s1 + $0x8] ss:$16 sps:$4 sm:$0xff]   ;;  %v683_v32 = vld [vmem:[%s966_s1 + $0x1e4] ss:$16 sps:$4 sm:$0xff]  }
   0xc   :  { %452 = vmatprep.subr.bf16.mxu0 %v653_v12  ;;  %493 = vmatprep.subr.bf16.mxu1 %v655_v13  ;;  %v685_v33 = vld [vmem:[%s966_s1 + $0x1ec] ss:$16 sps:$4 sm:$0xff]   ;;  %v687_v34 = vld [vmem:[%s966_s1 + $0x1e0] ss:$16 sps:$4 sm:$0xff]   ;;  %v688_v35 = vld [vmem:[%s966_s1 + $0x1e8] ss:$16 sps:$4 sm:$0xff]  }
   0xd   :  { %v689_v36 = vld [vmem:[%s966_s1 + $0x1c4] ss:$16 sps:$4 sm:$0xff]   ;;  %v691_v37 = vld [vmem:[%s966_s1 + $0x1cc] ss:$16 sps:$4 sm:$0xff]   ;;  %v693_v41 = vld [vmem:[%s966_s1 + $0x1c0] ss:$16 sps:$4 sm:$0xff]  }
   0xe   :  { %v694_v42 = vld [vmem:[%s966_s1 + $0x1c8] ss:$16 sps:$4 sm:$0xff]   ;;  %v695_v43 = vld [vmem:[%s966_s1 + $0x1a4] ss:$16 sps:$4 sm:$0xff]   ;;  %v697_v44 = vld [vmem:[%s966_s1 + $0x1ac] ss:$16 sps:$4 sm:$0xff]  }
   0xf   :  { %453 = vmatpush1.bf16.msra.mxu0 %v657_v14  ;;  %494 = vmatpush1.bf16.msra.mxu1 %v658_v15  ;;  %v878_v45 = vshrl.u32 %v81_v38, 7  ;;  %v699_v47 = vld [vmem:[%s966_s1 + $0x1a0] ss:$16 sps:$4 sm:$0xff]   ;;  %v700_v48 = vld [vmem:[%s966_s1 + $0x1a8] ss:$16 sps:$4 sm:$0xff]  }
  0x10   :  { %454 = vmatprep.subr.bf16.mxu0 %v659_v16  ;;  %495 = vmatprep.subr.bf16.mxu1 %v661_v17  ;;  %v701_v49 = vld [vmem:[%s966_s1 + $0x184] ss:$16 sps:$4 sm:$0xff]   ;;  %v703_v50 = vld [vmem:[%s966_s1 + $0x18c] ss:$16 sps:$4 sm:$0xff]   ;;  %v705_v53 = vld [vmem:[%s966_s1 + $0x180] ss:$16 sps:$4 sm:$0xff]  }
  0x11   :  { %v893_v51 = vsub.s32 %v112_v46, %v878_v45  ;;  %v566_v52 = vld.sshfl [vmem:[%s967_s0] sm:$0x11 pattern:$0x75316420]  ;;  %v706_v54 = vld [vmem:[%s966_s1 + $0x188] ss:$16 sps:$4 sm:$0xff]  }
  0x12   :  { %v109_v55 = vcombine.high %v566_v52, %v566_v52  ;;  %v707_v56 = vld [vmem:[%s966_s1 + $0x164] ss:$16 sps:$4 sm:$0xff]   ;;  %v709_v57 = vld [vmem:[%s966_s1 + $0x16c] ss:$16 sps:$4 sm:$0xff]   ;;  %v711_v59 = vld [vmem:[%s966_s1 + $0x160] ss:$16 sps:$4 sm:$0xff]  }
  0x13   :  { %455 = vmatpush1.bf16.msra.mxu0 %v663_v18  ;;  %496 = vmatpush1.bf16.msra.mxu1 %v664_v19  ;;  %v712_v60 = vld [vmem:[%s966_s1 + $0x168] ss:$16 sps:$4 sm:$0xff]   ;;  %v713_v61 = vld [vmem:[%s966_s1 + $0x144] ss:$16 sps:$4 sm:$0xff]   ;;  %v715_v62 = vld [vmem:[%s966_s1 + $0x14c] ss:$16 sps:$4 sm:$0xff]   ;;  %v116_v9 = vrot.slane %v566_v52, %v893_v51 }
  0x14   :  { %456 = vmatprep.subr.bf16.mxu0 %v665_v20  ;;  %497 = vmatprep.subr.bf16.mxu1 %v667_v21  ;;  %v123_v58 = vrot.slane %v109_v55, %v893_v51  ;;  %v717_v63 = vld [vmem:[%s966_s1 + $0x140] ss:$16 sps:$4 sm:$0xff]   ;;  %v718_v0 = vld [vmem:[%s966_s1 + $0x148] ss:$16 sps:$4 sm:$0xff]   ;;  %v719_v1 = vld [vmem:[%s966_s1 + $0x124] ss:$16 sps:$4 sm:$0xff]  }
  0x15   :  { %v721_v2 = vld [vmem:[%s966_s1 + $0x12c] ss:$16 sps:$4 sm:$0xff]   ;;  %v723_v3 = vld [vmem:[%s966_s1 + $0x120] ss:$16 sps:$4 sm:$0xff]   ;;  %v724_v4 = vld [vmem:[%s966_s1 + $0x128] ss:$16 sps:$4 sm:$0xff]  }
  0x16   :  { %478 = vmatprep.mubr.bf16.mxu0 %v123_v58  ;;  %519 = vmatprep.mubr.bf16.mxu1 %v123_v58  ;;  %v725_v5 = vld [vmem:[%s966_s1 + $0x104] ss:$16 sps:$4 sm:$0xff]   ;;  %v727_v6 = vld [vmem:[%s966_s1 + $0x10c] ss:$16 sps:$4 sm:$0xff]   ;;  %v729_v7 = vld [vmem:[%s966_s1 + $0x100] ss:$16 sps:$4 sm:$0xff]  }
  0x17   :  { %457 = vmatpush1.bf16.msra.mxu0 %v669_v22  ;;  %498 = vmatpush1.bf16.msra.mxu1 %v670_v23  ;;  %v730_v8 = vld [vmem:[%s966_s1 + $0x108] ss:$16 sps:$4 sm:$0xff]   ;;  %v83_v10 = vsub.s32 0, %v878_v45  ;;  %v91_v11 = vsub.s32 2, %v878_v45  ;;  %v87_v12 = vsub.s32 1, %v878_v45  ;;  %v95_v13 = vsub.s32 3, %v878_v45 }
  0x18   :  { %458 = vmatprep.subr.bf16.mxu0 %v671_v24  ;;  %499 = vmatprep.subr.bf16.mxu1 %v673_v25  ;;  %v79_v14 = vld [vmem:[%s968_s2] sm:$0xf] }
  0x19   :  { %v84_v15 = vrot.slane %v79_v14, %v83_v10  ;;  %v92_v16 = vrot.slane %v79_v14, %v91_v11  ;;  %v88_v17 = vrot.slane %v79_v14, %v87_v12  ;;  %v96_v18 = vrot.slane %v79_v14, %v95_v13 }
  0x1b   :  { %459 = vmatpush1.bf16.msra.mxu0 %v675_v26  ;;  %500 = vmatpush1.bf16.msra.mxu1 %v676_v27 }
  0x1c   :  { %460 = vmatprep.subr.bf16.mxu0 %v677_v28  ;;  %501 = vmatprep.subr.bf16.mxu1 %v679_v29 }
  0x1f   :  { %461 = vmatpush1.bf16.msra.mxu0 %v681_v30  ;;  %502 = vmatpush1.bf16.msra.mxu1 %v682_v31 }
  0x20   :  { %462 = vmatprep.subr.bf16.mxu0 %v683_v32  ;;  %503 = vmatprep.subr.bf16.mxu1 %v685_v33 }
  0x23   :  { %463 = vmatpush2.bf16.msra.mxu0 %v687_v34  ;;  %504 = vmatpush2.bf16.msra.mxu1 %v688_v35 }
  0x24   :  { %464 = vmatprep.subr.bf16.mxu0 %v689_v36  ;;  %505 = vmatprep.subr.bf16.mxu1 %v691_v37 }
  0x27   :  { %465 = vmatpush2.bf16.msra.mxu0 %v693_v41  ;;  %506 = vmatpush2.bf16.msra.mxu1 %v694_v42 }
  0x28   :  { %466 = vmatprep.subr.bf16.mxu0 %v695_v43  ;;  %507 = vmatprep.subr.bf16.mxu1 %v697_v44 }
  0x2b   :  { %467 = vmatpush2.bf16.msra.mxu0 %v699_v47  ;;  %508 = vmatpush2.bf16.msra.mxu1 %v700_v48 }
  0x2c   :  { %468 = vmatprep.subr.bf16.mxu0 %v701_v49  ;;  %509 = vmatprep.subr.bf16.mxu1 %v703_v50 }
  0x2f   :  { %469 = vmatpush2.bf16.msra.mxu0 %v705_v53  ;;  %510 = vmatpush2.bf16.msra.mxu1 %v706_v54 }
  0x30   :  { %470 = vmatprep.subr.bf16.mxu0 %v707_v56  ;;  %511 = vmatprep.subr.bf16.mxu1 %v709_v57 }
  0x33   :  { %471 = vmatpush2.bf16.msra.mxu0 %v711_v59  ;;  %512 = vmatpush2.bf16.msra.mxu1 %v712_v60 }
  0x34   :  { %472 = vmatprep.subr.bf16.mxu0 %v713_v61  ;;  %513 = vmatprep.subr.bf16.mxu1 %v715_v62 }
  0x37   :  { %473 = vmatpush2.bf16.msra.mxu0 %v717_v63  ;;  %514 = vmatpush2.bf16.msra.mxu1 %v718_v0 }
  0x38   :  { %474 = vmatprep.subr.bf16.mxu0 %v719_v1  ;;  %515 = vmatprep.subr.bf16.mxu1 %v721_v2 }
  0x3b   :  { %475 = vmatpush2.bf16.msra.mxu0 %v723_v3  ;;  %516 = vmatpush2.bf16.msra.mxu1 %v724_v4 }
  0x3c   :  { %476 = vmatprep.subr.bf16.mxu0 %v725_v5  ;;  %517 = vmatprep.subr.bf16.mxu1 %v727_v6 }
  0x3f   :  { %477 = vmatpush2.bf16.msra.mxu0 %v729_v7  ;;  %518 = vmatpush2.bf16.msra.mxu1 %v730_v8 }
  0x42   :  { %479 = vmatmul.mubr.bf16.vlgmr.msra.gmra.mxu0 %v116_v9  ;;  %520 = vmatmul.mubr.bf16.vlgmr.msra.gmra.mxu1 %v116_v9 }
 0x102   :  { %v480_v19 = vpop.f32.mrf.mxu0  ;;  %v521_v20 = vpop.f32.mrf.mxu1 }
 0x103   :  { %v481_v23 = vadd.f32 %v480_v19, %v84_v15  ;;  %v522_v24 = vadd.f32 %v521_v20, %v92_v16 }
 0x104   :  { %v482_v21 = vpop.f32.mrf.mxu0  ;;  %v523_v22 = vpop.f32.mrf.mxu1 }
 0x105   :  { %v483_v25 = vadd.f32 %v482_v21, %v88_v17  ;;  %v524_v26 = vadd.f32 %v523_v22, %v96_v18 }
 0x106   :  { %v484_v27 = vpop.f32.mrf.mxu0  ;;  %v525_v28 = vpop.f32.mrf.mxu1 }
 0x107   :  { %v631_v29 = vpack.c.bf16 %v483_v25, %v481_v23  ;;  %v632_v30 = vpack.c.bf16 %v524_v26, %v522_v24 }
 0x108   :  { %v485_v31 = vpop.f32.mrf.mxu0  ;;  %v526_v32 = vpop.f32.mrf.mxu1 }
 0x109   :  { %v544_v33 = vrot.slane %v631_v29, %v893_v51  ;;  %v551_v34 = vrot.slane %v632_v30, %v893_v51 }
 0x10b   :  { %v552_v35 = vcombine.low %v544_v33, %v551_v34 }
 0x10d   :  { %633 = vst.sshfl [vmem:[%s969_s3] sm:$0x55 pattern:$0x73625140] %v552_v35 }

// kernel: resnet_forward.38
= control target key start
LH: loop header
LB: loop body
LE: loop exit
PB: predicated region body
PF: predicated region fallthrough
CT: control target
= control target key end

     0   :  { %v1148_v21 = vmov 1966171168   ;;  %v174_v23 = vlaneseq  ;;  %vm1150_vm0 = vmmov 0   ;;  %s1413_s1 = inlined_call_operand.vmem [shape: bf16[1152,128], index: 1, kind: input, shape index: {}]   ;;  %s1414_s0 = inlined_call_operand.vmem [shape: bf16[2,1152], index: 0, kind: input, shape index: {}]   ;;  %s1415_s2 = inlined_call_operand.vmem [shape: f32[1,128], index: 2, kind: input, shape index: {}]   ;;  %s1416_s3 = inlined_call_operand.vmem [shape: bf16[2,128], index: 3, kind: output, shape index: {}]  }
   0x1   :  { %v1075_v0 = vld [vmem:[%s1413_s1 + $0x78] sm:$0xff]   ;;  %v1079_v4 = vld [vmem:[%s1413_s1 + $0x70] sm:$0xff]   ;;  %v1083_v8 = vld [vmem:[%s1413_s1 + $0x68] sm:$0xff]   ;;  %v172_v22 = vunpack.c.l.s4 %v1148_v21 }
   0x2   :  { %v1076_v1 = vld [vmem:[%s1413_s1 + $0x38] sm:$0xff]   ;;  %955 = vmatprep.subr.bf16.mxu0 %v1075_v0  ;;  %v1080_v5 = vld [vmem:[%s1413_s1 + $0x30] sm:$0xff]   ;;  %v1084_v9 = vld [vmem:[%s1413_s1 + $0x28] sm:$0xff]   ;;  %v175_v29 = vshrl.u32 %v174_v23, 7 }
   0x3   :  { %v1077_v2 = vld [vmem:[%s1413_s1 + $0xf8] sm:$0xff]   ;;  %956 = vmatpush3.bf16.msra.mxu0 %v1076_v1  ;;  %v1081_v6 = vld [vmem:[%s1413_s1 + $0xf0] sm:$0xff]   ;;  %v1085_v10 = vld [vmem:[%s1413_s1 + $0xe8] sm:$0xff]   ;;  %v173_v28 = vunpack.c.0.s8 %v172_v22 }
   0x4   :  { %v1078_v3 = vld [vmem:[%s1413_s1 + $0xb8] sm:$0xff]   ;;  %977 = vmatprep.subr.bf16.mxu1 %v1077_v2  ;;  %957 = vmatprep.subr.bf16.mxu0 %v1079_v4  ;;  %v1082_v7 = vld [vmem:[%s1413_s1 + $0xb0] sm:$0xff]   ;;  %v1086_v11 = vld [vmem:[%s1413_s1 + $0xa8] sm:$0xff]  }
   0x5   :  { %978 = vmatpush3.bf16.msra.mxu1 %v1078_v3  ;;  %v1087_v12 = vld [vmem:[%s1413_s1 + $0x60] sm:$0xff]   ;;  %v1091_v16 = vld [vmem:[%s1413_s1 + $0x58] sm:$0xff]   ;;  %v1095_v20 = vld [vmem:[%s1413_s1 + $0x50] sm:$0xff]   ;;  %v1258_v34 = vsub.s32 %v173_v28, %v175_v29 }
   0x6   :  { %979 = vmatprep.subr.bf16.mxu1 %v1081_v6  ;;  %v1088_v13 = vld [vmem:[%s1413_s1 + $0x20] sm:$0xff]   ;;  %v1092_v17 = vld [vmem:[%s1413_s1 + $0x18] sm:$0xff]   ;;  %v1096_v24 = vld [vmem:[%s1413_s1 + $0x10] sm:$0xff]  }
   0x7   :  { %958 = vmatpush3.bf16.msra.mxu0 %v1080_v5  ;;  %v1089_v14 = vld [vmem:[%s1413_s1 + $0xe0] sm:$0xff]   ;;  %v1093_v18 = vld [vmem:[%s1413_s1 + $0xd8] sm:$0xff]   ;;  %v1097_v25 = vld [vmem:[%s1413_s1 + $0xd0] sm:$0xff]  }
   0x8   :  { %959 = vmatprep.subr.bf16.mxu0 %v1083_v8  ;;  %v1090_v15 = vld [vmem:[%s1413_s1 + $0xa0] sm:$0xff]   ;;  %v1094_v19 = vld [vmem:[%s1413_s1 + $0x98] sm:$0xff]   ;;  %v1098_v26 = vld [vmem:[%s1413_s1 + $0x90] sm:$0xff]  }
   0x9   :  { %980 = vmatpush3.bf16.msra.mxu1 %v1082_v7  ;;  %v1099_v27 = vld [vmem:[%s1413_s1 + $0x48] sm:$0xff]   ;;  %v1103_v33 = vld [vmem:[%s1413_s1 + $0x40] sm:$0xff]   ;;  %v1108_v41 = vld [vmem:[%s1413_s1 + $0x178] sm:$0xff]  }
   0xa   :  { %981 = vmatprep.subr.bf16.mxu1 %v1085_v10  ;;  %v1100_v30 = vld [vmem:[%s1413_s1 + $0x8] sm:$0xff]   ;;  %v1104_v35 = vld [vmem:[%s1413_s1] sm:$0xff]   ;;  %v1110_v45 = vld [vmem:[%s1413_s1 + $0x1f8] sm:$0xff]  }
   0xb   :  { %960 = vmatpush3.bf16.msra.mxu0 %v1084_v9  ;;  %v1101_v31 = vld [vmem:[%s1413_s1 + $0xc8] sm:$0xff]   ;;  %v1105_v36 = vld [vmem:[%s1413_s1 + $0xc0] sm:$0xff]   ;;  %v1109_v47 = vld [vmem:[%s1413_s1 + $0x138] sm:$0xff]  }
   0xc   :  { %961 = vmatprep.subr.bf16.mxu0 %v1087_v12  ;;  %v1102_v32 = vld [vmem:[%s1413_s1 + $0x88] sm:$0xff]   ;;  %v15_v37 = vld [vmem:[%s1414_s0] sm:$0xff]  ;;  %v1112_v50 = vld [vmem:[%s1413_s1 + $0x170] sm:$0xff]  }
   0xd   :  { %982 = vmatpush3.bf16.msra.mxu1 %v1086_v11  ;;  %v170_v38 = vcombine.high %v15_v37, %v15_v37  ;;  %v177_v39 = vrot.slane %v15_v37, %v1258_v34  ;;  %v1107_v40 = vld [vmem:[%s1413_s1 + $0x80] sm:$0xff]   ;;  %v1111_v52 = vld [vmem:[%s1413_s1 + $0x1b8] sm:$0xff]   ;;  %v1114_v54 = vld [vmem:[%s1413_s1 + $0x1f0] sm:$0xff]  }
   0xe   :  { %983 = vmatprep.subr.bf16.mxu1 %v1089_v14  ;;  %v1113_v55 = vld [vmem:[%s1413_s1 + $0x130] sm:$0xff]   ;;  %v1116_v57 = vld [vmem:[%s1413_s1 + $0x168] sm:$0xff]   ;;  %v1120_v61 = vld [vmem:[%s1413_s1 + $0x160] sm:$0xff]  }
   0xf   :  { %962 = vmatpush3.bf16.msra.mxu0 %v1088_v13  ;;  %v185_v42 = vcombine.high %v177_v39, %v177_v39  ;;  %v193_v43 = vrot.slane %v177_v39, %v1258_v34  ;;  %v1278_v44 = vrot.slane %v170_v38, %v1258_v34  ;;  %v1115_v58 = vld [vmem:[%s1413_s1 + $0x1b0] sm:$0xff]   ;;  %v1118_v59 = vld [vmem:[%s1413_s1 + $0x1e8] sm:$0xff]   ;;  %v1122_v63 = vld [vmem:[%s1413_s1 + $0x1e0] sm:$0xff]  }
  0x10   :  { %963 = vmatprep.subr.bf16.mxu0 %v1091_v16  ;;  %v1117_v60 = vld [vmem:[%s1413_s1 + $0x128] sm:$0xff]   ;;  %v1121_v0 = vld [vmem:[%s1413_s1 + $0x120] sm:$0xff]   ;;  %v1124_v1 = vld [vmem:[%s1413_s1 + $0x158] sm:$0xff]  }
  0x11   :  { %984 = vmatpush3.bf16.msra.mxu1 %v1090_v15  ;;  %v207_v46 = vrot.slane %v185_v42, %v1258_v34  ;;  %v186_v48 = vcombine.high %v1278_v44, %v1278_v44  ;;  %v215_v49 = vcombine.high %v193_v43, %v193_v43  ;;  %v1119_v62 = vld [vmem:[%s1413_s1 + $0x1a8] sm:$0xff]   ;;  %v1123_v2 = vld [vmem:[%s1413_s1 + $0x1a0] sm:$0xff]   ;;  %v1126_v3 = vld [vmem:[%s1413_s1 + $0x1d8] sm:$0xff]  }
  0x12   :  { %985 = vmatprep.subr.bf16.mxu1 %v1093_v18  ;;  %v1125_v4 = vld [vmem:[%s1413_s1 + $0x118] sm:$0xff]   ;;  %v1128_v5 = vld [vmem:[%s1413_s1 + $0x150] sm:$0xff]   ;;  %v1132_v9 = vld [vmem:[%s1413_s1 + $0x148] sm:$0xff]  }
  0x13   :  { %964 = vmatpush3.bf16.msra.mxu0 %v1092_v17  ;;  %706 = vmatprep.mubr.bf16.mxu0 %v207_v46  ;;  %v217_v51 = vcombine.high %v207_v46, %v207_v46  ;;  %v214_v53 = vrot.slane %v186_v48, %v1258_v34  ;;  %v1127_v6 = vld [vmem:[%s1413_s1 + $0x198] sm:$0xff]   ;;  %v1130_v7 = vld [vmem:[%s1413_s1 + $0x1d0] sm:$0xff]   ;;  %v1134_v11 = vld [vmem:[%s1413_s1 + $0x1c8] sm:$0xff]   ;;  %v200_v17 = vrot.slane %v1278_v44, %v1258_v34 }
  0x14   :  { %965 = vmatprep.subr.bf16.mxu0 %v1095_v20  ;;  %v1129_v8 = vld [vmem:[%s1413_s1 + $0x110] sm:$0xff]   ;;  %v1133_v12 = vld [vmem:[%s1413_s1 + $0x108] sm:$0xff]   ;;  %v1136_v13 = vld [vmem:[%s1413_s1 + $0x140] sm:$0xff]   ;;  %v1149_v20 = vmov 0.0  }
  0x15   :  { %986 = vmatpush3.bf16.msra.mxu1 %v1094_v19  ;;  %746 = vmatprep.mubr.bf16.mxu1 %v217_v51  ;;  %v218_v56 = vcombine.high %v214_v53, %v214_v53  ;;  %v1131_v10 = vld [vmem:[%s1413_s1 + $0x190] sm:$0xff]   ;;  %v1135_v14 = vld [vmem:[%s1413_s1 + $0x188] sm:$0xff]   ;;  %v1138_v15 = vld [vmem:[%s1413_s1 + $0x1c0] sm:$0xff]   ;;  %v216_v21 = vcombine.high %v200_v17, %v200_v17 }
  0x16   :  { %987 = vmatprep.subr.bf16.mxu1 %v1097_v25  ;;  %v1137_v16 = vld [vmem:[%s1413_s1 + $0x100] sm:$0xff]   ;;  %v1140_v19 = vld [vmem:[%s1413_s1 + $0x238] sm:$0xff]   ;;  %v1141_v22 = vld [vmem:[%s1413_s1 + $0x230] sm:$0xff]  }
  0x17   :  { %966 = vmatpush3.bf16.msra.mxu0 %v1096_v24  ;;  %v1139_v18 = vld [vmem:[%s1413_s1 + $0x180] sm:$0xff]   ;;  %v882_v23 = vld.sshfl [vmem:[%s1414_s0 + $0x8] sm:$0x1 pattern:$0x75316420]  ;;  %v1145_v28 = vld [vmem:[%s1413_s1 + $0x210] sm:$0xff]  }
  0x18   :  { %967 = vmatprep.subr.bf16.mxu0 %v1099_v27  ;;  %v232_v24 = vrot.slane %v882_v23, %v1258_v34  ;;  %v1142_v25 = vld [vmem:[%s1413_s1 + $0x228] sm:$0xff]   ;;  %v1144_v27 = vld [vmem:[%s1413_s1 + $0x218] sm:$0xff]   ;;  %v881_v48 = vld [vmem:[%s1415_s2] ss:$0 sm:$0xff] }
  0x19   :  { %988 = vmatpush3.bf16.msra.mxu1 %v1098_v26  ;;  %v1143_v26 = vld [vmem:[%s1413_s1 + $0x220] sm:$0xff]   ;;  %v1146_v29 = vld [vmem:[%s1413_s1 + $0x208] sm:$0xff]  }
  0x1a   :  { %989 = vmatprep.subr.bf16.mxu1 %v1101_v31 }
  0x1b   :  { %968 = vmatpush3.bf16.msra.mxu0 %v1100_v30  ;;  %v1147_v30 = vld [vmem:[%s1413_s1 + $0x200] sm:$0xff]  }
  0x1c   :  { %969 = vmatprep.subr.bf16.mxu0 %v1103_v33 }
  0x1d   :  { %990 = vmatpush3.bf16.msra.mxu1 %v1102_v32 }
  0x1e   :  { %991 = vmatprep.subr.bf16.mxu1 %v1105_v36 }
  0x1f   :  { %970 = vmatpush3.bf16.msra.mxu0 %v1104_v35 }
  0x20   :  { %999 = vmatprep.subr.bf16.mxu0 %v1108_v41 }
  0x21   :  { %992 = vmatpush3.bf16.msra.mxu1 %v1107_v40 }
  0x22   :  { %1021 = vmatprep.subr.bf16.mxu1 %v1110_v45  ;;  %707 = vmatmul.mubr.bf16.vlgmr.msra.gmra.mxu0 %v193_v43 }
  0x23   :  { %1000 = vmatpush3.bf16.msra.mxu0 %v1109_v47  ;;  %786 = vmatprep.mubr.bf16.mxu0 %v214_v53 }
  0x24   :  { %747 = vmatmul.mubr.bf16.vlgmr.msra.gmra.mxu1 %v215_v49  ;;  %1001 = vmatprep.subr.bf16.mxu0 %v1112_v50 }
  0x25   :  { %1022 = vmatpush3.bf16.msra.mxu1 %v1111_v52  ;;  %826 = vmatprep.mubr.bf16.mxu1 %v218_v56 }
  0x26   :  { %1023 = vmatprep.subr.bf16.mxu1 %v1114_v54 }
  0x27   :  { %1002 = vmatpush3.bf16.msra.mxu0 %v1113_v55 }
  0x28   :  { %1003 = vmatprep.subr.bf16.mxu0 %v1116_v57 }
  0x29   :  { %1024 = vmatpush3.bf16.msra.mxu1 %v1115_v58 }
  0x2a   :  { %1025 = vmatprep.subr.bf16.mxu1 %v1118_v59 }
  0x2b   :  { %1004 = vmatpush3.bf16.msra.mxu0 %v1117_v60 }
  0x2c   :  { %1005 = vmatprep.subr.bf16.mxu0 %v1120_v61 }
  0x2d   :  { %1026 = vmatpush3.bf16.msra.mxu1 %v1119_v62 }
  0x2e   :  { %1027 = vmatprep.subr.bf16.mxu1 %v1122_v63 }
  0x2f   :  { %1006 = vmatpush3.bf16.msra.mxu0 %v1121_v0 }
  0x30   :  { %1007 = vmatprep.subr.bf16.mxu0 %v1124_v1 }
  0x31   :  { %1028 = vmatpush3.bf16.msra.mxu1 %v1123_v2 }
  0x32   :  { %1029 = vmatprep.subr.bf16.mxu1 %v1126_v3 }
  0x33   :  { %1008 = vmatpush3.bf16.msra.mxu0 %v1125_v4 }
  0x34   :  { %1009 = vmatprep.subr.bf16.mxu0 %v1128_v5 }
  0x35   :  { %1030 = vmatpush3.bf16.msra.mxu1 %v1127_v6 }
  0x36   :  { %1031 = vmatprep.subr.bf16.mxu1 %v1130_v7 }
  0x37   :  { %1010 = vmatpush3.bf16.msra.mxu0 %v1129_v8 }
  0x38   :  { %1011 = vmatprep.subr.bf16.mxu0 %v1132_v9 }
  0x39   :  { %1032 = vmatpush3.bf16.msra.mxu1 %v1131_v10 }
  0x3a   :  { %1033 = vmatprep.subr.bf16.mxu1 %v1134_v11 }
  0x3b   :  { %1012 = vmatpush3.bf16.msra.mxu0 %v1133_v12 }
  0x3c   :  { %1013 = vmatprep.subr.bf16.mxu0 %v1136_v13 }
  0x3d   :  { %1034 = vmatpush3.bf16.msra.mxu1 %v1135_v14 }
  0x3e   :  { %1035 = vmatprep.subr.bf16.mxu1 %v1138_v15 }
  0x3f   :  { %1014 = vmatpush3.bf16.msra.mxu0 %v1137_v16 }
  0x40   :  { %1052 = vmatprep.subr.bf16.mxu0 %v1149_v20 }
  0x41   :  { %1036 = vmatpush3.bf16.msra.mxu1 %v1139_v18 }
  0x42   :  { %787 = vmatmul.mubr.bf16.vlgmr.msra.gmra.mxu0 %v200_v17 }
  0x43   :  { %1053 = vmatpush3.bf16.msra.mxu0 %v1140_v19  ;;  %1068 = vmatprep.mubr.msk.bf16.mxu0 %vm1150_vm0, %v1149_v20 }
  0x44   :  { %827 = vmatmul.mubr.bf16.vlgmr.msra.gmra.mxu1 %v216_v21  ;;  %1054 = vmatprep.subr.bf16.mxu0 %v1149_v20 }
  0x47   :  { %1055 = vmatpush3.bf16.msra.mxu0 %v1141_v22 }
  0x48   :  { %1056 = vmatprep.subr.bf16.mxu0 %v1149_v20 }
  0x4b   :  { %1057 = vmatpush3.bf16.msra.mxu0 %v1142_v25 }
  0x4c   :  { %1058 = vmatprep.subr.bf16.mxu0 %v1149_v20 }
  0x4f   :  { %1059 = vmatpush3.bf16.msra.mxu0 %v1143_v26 }
  0x50   :  { %1060 = vmatprep.subr.bf16.mxu0 %v1149_v20 }
  0x53   :  { %1061 = vmatpush3.bf16.msra.mxu0 %v1144_v27 }
  0x54   :  { %1062 = vmatprep.subr.bf16.mxu0 %v1149_v20 }
  0x57   :  { %1063 = vmatpush3.bf16.msra.mxu0 %v1145_v28 }
  0x58   :  { %1064 = vmatprep.subr.bf16.mxu0 %v1149_v20 }
  0x5b   :  { %1065 = vmatpush3.bf16.msra.mxu0 %v1146_v29 }
  0x5c   :  { %1066 = vmatprep.subr.bf16.mxu0 %v1149_v20 }
  0x5f   :  { %1067 = vmatpush3.bf16.msra.mxu0 %v1147_v30 }
  0x62   :  { %1069 = vmatmul.mubr.bf16.vlgmr.msra.gmra.mxu0 %v232_v24 }
  0xe2   :  { %v971_v31 = vpop.f32.mrf.mxu0 }
  0xe4   :  { %v972_v32 = vpop.f32.mrf.mxu0  ;;  %v993_v33 = vpop.f32.mrf.mxu1 }
  0xe5   :  { %v973_v47 = vadd.f32 %v972_v32, %v971_v31 }
  0xe6   :  { %v974_v34 = vpop.f32.mrf.mxu0  ;;  %v994_v35 = vpop.f32.mrf.mxu1 }
  0xe7   :  { %v709_v49 = vadd.f32 %v973_v47, %v881_v48  ;;  %v995_v50 = vadd.f32 %v994_v35, %v993_v33 }
  0xe8   :  { %v975_v36 = vpop.f32.mrf.mxu0  ;;  %v996_v37 = vpop.f32.mrf.mxu1 }
  0xe9   :  { %v749_v52 = vadd.f32 %v995_v50, %v709_v49 }
  0xea   :  { %v997_v38 = vpop.f32.mrf.mxu1 }
 0x102   :  { %v1015_v39 = vpop.f32.mrf.mxu0 }
 0x104   :  { %v1016_v40 = vpop.f32.mrf.mxu0  ;;  %v1037_v41 = vpop.f32.mrf.mxu1 }
 0x105   :  { %v1017_v51 = vadd.f32 %v1016_v40, %v1015_v39 }
 0x106   :  { %v1018_v42 = vpop.f32.mrf.mxu0  ;;  %v1038_v43 = vpop.f32.mrf.mxu1 }
 0x107   :  { %v789_v53 = vadd.f32 %v1017_v51, %v749_v52  ;;  %v1039_v54 = vadd.f32 %v1038_v43, %v1037_v41 }
 0x108   :  { %v1019_v44 = vpop.f32.mrf.mxu0  ;;  %v1040_v45 = vpop.f32.mrf.mxu1 }
 0x109   :  { %v829_v55 = vadd.f32 %v1039_v54, %v789_v53 }
 0x10a   :  { %v1041_v46 = vpop.f32.mrf.mxu1 }
 0x122   :  { %v868_v56 = vpop.f32.mrf.mxu0 }
 0x123   :  { %v869_v57 = vadd.f32 %v868_v56, %v829_v55 }
 0x124   :  { %v1070_v58 = vpop.f32.mrf.mxu0 }
 0x125   :  { %v874_v59 = vmax.f32 %v869_v57, 0.0 }
 0x126   :  { %v871_v60 = vpop.f32.mrf.mxu0 }
 0x127   :  { %v875_v61 = vpack.c.bf16 %v874_v59, %v874_v59 }
 0x128   :  { %v1071_v62 = vpop.f32.mrf.mxu0 }
 0x129   :  { %876 = vst [vmem:[%s1416_s3] sm:$0x1] %v875_v61 }

// kernel: resnet_forward.41
= control target key start
LH: loop header
LB: loop body
LE: loop exit
PB: predicated region body
PF: predicated region fallthrough
CT: control target
= control target key end

     0   :  { %v30_v22 = vlaneseq  ;;  %v766_v41 = vmov 0.0   ;;  %vm166_vm0 = vcmask 1041409   ;;  %s944_s0 = inlined_call_operand.vmem [shape: bf16[2,1,512], index: 0, kind: input, shape index: {}]   ;;  %s945_s1 = inlined_call_operand.vmem [shape: bf16[512,128], index: 1, kind: input, shape index: {}]   ;;  %s946_s2 = inlined_call_operand.vmem [shape: f32[1,128], index: 2, kind: input, shape index: {}]   ;;  %s947_s3 = inlined_call_operand.vmem [shape: bf16[128,128], index: 3, kind: input, shape index: {}]   ;;  %s948_s4 = inlined_call_operand.vmem [shape: f32[1,128], index: 4, kind: input, shape index: {}]   ;;  %s949_s5 = inlined_call_operand.hbm [shape: f32[2,128], index: 5, kind: output, shape index: {}]  }
   0x1   :  { %v704_v0 = vld [vmem:[%s945_s1 + $0x78] sm:$0xff]   ;;  %v708_v4 = vld [vmem:[%s945_s1 + $0x70] sm:$0xff]   ;;  %v712_v8 = vld [vmem:[%s945_s1 + $0x68] sm:$0xff]  }
   0x2   :  { %v705_v1 = vld [vmem:[%s945_s1 + $0xf8] sm:$0xff]   ;;  %628 = vmatprep.subr.bf16.mxu0 %v704_v0  ;;  %v709_v5 = vld [vmem:[%s945_s1 + $0xf0] sm:$0xff]   ;;  %v713_v9 = vld [vmem:[%s945_s1 + $0xe8] sm:$0xff]   ;;  %v31_v27 = vshrl.u32 %v30_v22, 7 }
   0x3   :  { %v706_v2 = vld [vmem:[%s945_s1 + $0x38] sm:$0xff]   ;;  %650 = vmatprep.subr.bf16.mxu1 %v705_v1  ;;  %v710_v6 = vld [vmem:[%s945_s1 + $0x30] sm:$0xff]   ;;  %v714_v10 = vld [vmem:[%s945_s1 + $0x28] sm:$0xff]  }
   0x4   :  { %v707_v3 = vld [vmem:[%s945_s1 + $0xb8] sm:$0xff]   ;;  %629 = vmatpush3.bf16.msra.mxu0 %v706_v2  ;;  %v711_v7 = vld [vmem:[%s945_s1 + $0xb0] sm:$0xff]   ;;  %v715_v11 = vld [vmem:[%s945_s1 + $0xa8] sm:$0xff]   ;;  %v36_v32 = vsub.s32 2, %v31_v27  ;;  %v44_v34 = vsub.s32 6, %v31_v27  ;;  %v32_v36 = vsub.s32 0, %v31_v27 }
   0x5   :  { %651 = vmatpush3.bf16.msra.mxu1 %v707_v3  ;;  %630 = vmatprep.subr.bf16.mxu0 %v708_v4  ;;  %v716_v12 = vld [vmem:[%s945_s1 + $0x60] sm:$0xff]   ;;  %v720_v16 = vld [vmem:[%s945_s1 + $0x58] sm:$0xff]   ;;  %v724_v20 = vld [vmem:[%s945_s1 + $0x50] sm:$0xff]   ;;  %v40_v38 = vsub.s32 4, %v31_v27 }
   0x6   :  { %652 = vmatprep.subr.bf16.mxu1 %v709_v5  ;;  %v717_v13 = vld [vmem:[%s945_s1 + $0xe0] sm:$0xff]   ;;  %v721_v17 = vld [vmem:[%s945_s1 + $0xd8] sm:$0xff]   ;;  %v725_v21 = vld [vmem:[%s945_s1 + $0xd0] sm:$0xff]  }
   0x7   :  { %v718_v14 = vld [vmem:[%s945_s1 + $0x20] sm:$0xff]   ;;  %v722_v18 = vld [vmem:[%s945_s1 + $0x18] sm:$0xff]   ;;  %v726_v23 = vld [vmem:[%s945_s1 + $0x10] sm:$0xff]  }
   0x8   :  { %631 = vmatpush3.bf16.msra.mxu0 %v710_v6  ;;  %v719_v15 = vld [vmem:[%s945_s1 + $0xa0] sm:$0xff]   ;;  %v723_v19 = vld [vmem:[%s945_s1 + $0x98] sm:$0xff]   ;;  %v727_v24 = vld [vmem:[%s945_s1 + $0x90] sm:$0xff]  }
   0x9   :  { %653 = vmatpush3.bf16.msra.mxu1 %v711_v7  ;;  %632 = vmatprep.subr.bf16.mxu0 %v712_v8  ;;  %v728_v25 = vld [vmem:[%s945_s1 + $0x48] sm:$0xff]   ;;  %v732_v30 = vld [vmem:[%s945_s1 + $0x40] sm:$0xff]  }
   0xa   :  { %654 = vmatprep.subr.bf16.mxu1 %v713_v9  ;;  %v729_v26 = vld [vmem:[%s945_s1 + $0xc8] sm:$0xff]   ;;  %v733_v31 = vld [vmem:[%s945_s1 + $0xc0] sm:$0xff]  }
   0xb   :  { %v730_v28 = vld [vmem:[%s945_s1 + $0x8] sm:$0xff]   ;;  %v734_v33 = vld [vmem:[%s945_s1] sm:$0xff]  }
   0xc   :  { %633 = vmatpush3.bf16.msra.mxu0 %v714_v10  ;;  %v731_v29 = vld [vmem:[%s945_s1 + $0x88] sm:$0xff]   ;;  %v735_v35 = vld [vmem:[%s945_s1 + $0x80] sm:$0xff]  }
   0xd   :  { %655 = vmatpush3.bf16.msra.mxu1 %v715_v11  ;;  %634 = vmatprep.subr.bf16.mxu0 %v716_v12  ;;  %v625_v37 = vld [vmem:[%s944_s0] sm:$0xff]  }
   0xe   :  { %656 = vmatprep.subr.bf16.mxu1 %v717_v13  ;;  %v626_v39 = vunpack.c.l.bf16 %v625_v37  ;;  %v627_v40 = vunpack.c.h.bf16 %v625_v37 }
  0x10   :  { %635 = vmatpush3.bf16.msra.mxu0 %v718_v14  ;;  %v37_v42 = vrot.slane %v626_v39, %v36_v32  ;;  %v53_v43 = vrot.slane %v627_v40, %v36_v32  ;;  %v45_v44 = vrot.slane %v626_v39, %v44_v34  ;;  %v61_v45 = vrot.slane %v627_v40, %v44_v34 }
  0x11   :  { %657 = vmatpush3.bf16.msra.mxu1 %v719_v15  ;;  %636 = vmatprep.subr.bf16.mxu0 %v720_v16  ;;  %v33_v46 = vrot.slane %v626_v39, %v32_v36  ;;  %v49_v47 = vrot.slane %v627_v40, %v32_v36  ;;  %v41_v48 = vrot.slane %v626_v39, %v40_v38 }
  0x12   :  { %658 = vmatprep.subr.bf16.mxu1 %v721_v17  ;;  %v57_v49 = vrot.slane %v627_v40, %v40_v38  ;;  %v71_v50 = vpack.c.bf16 %v37_v42, %v37_v42  ;;  %v75_v51 = vpack.c.bf16 %v53_v43, %v53_v43  ;;  %v73_v52 = vpack.c.bf16 %v45_v44, %v45_v44 }
  0x13   :  { %v77_v53 = vpack.c.bf16 %v61_v45, %v61_v45  ;;  %v70_v54 = vpack.c.bf16 %v33_v46, %v33_v46  ;;  %v74_v55 = vpack.c.bf16 %v49_v47, %v49_v47  ;;  %v72_v56 = vpack.c.bf16 %v41_v48, %v41_v48 }
  0x14   :  { %637 = vmatpush3.bf16.msra.mxu0 %v722_v18  ;;  %v76_v57 = vpack.c.bf16 %v57_v49, %v57_v49  ;;  %v158_v58 = vunpack.c.l.b16 %v71_v50  ;;  %v162_v59 = vunpack.c.l.b16 %v75_v51  ;;  %v160_v60 = vunpack.c.l.b16 %v73_v52 }
  0x15   :  { %659 = vmatpush3.bf16.msra.mxu1 %v723_v19  ;;  %638 = vmatprep.subr.bf16.mxu0 %v724_v20  ;;  %v164_v61 = vunpack.c.l.b16 %v77_v53 }
  0x16   :  { %660 = vmatprep.subr.bf16.mxu1 %v725_v21 }
  0x18   :  { %639 = vmatpush3.bf16.msra.mxu0 %v726_v23 }
  0x19   :  { %661 = vmatpush3.bf16.msra.mxu1 %v727_v24  ;;  %640 = vmatprep.subr.bf16.mxu0 %v728_v25 }
  0x1a   :  { %662 = vmatprep.subr.bf16.mxu1 %v729_v26 }
  0x1c   :  { %641 = vmatpush3.bf16.msra.mxu0 %v730_v28 }
  0x1d   :  { %663 = vmatpush3.bf16.msra.mxu1 %v731_v29  ;;  %642 = vmatprep.subr.bf16.mxu0 %v732_v30 }
  0x1e   :  { %664 = vmatprep.subr.bf16.mxu1 %v733_v31 }
  0x20   :  { %643 = vmatpush3.bf16.msra.mxu0 %v734_v33 }
  0x21   :  { %665 = vmatpush3.bf16.msra.mxu1 %v735_v35  ;;  %681 = vmatprep.subr.bf16.mxu0 %v766_v41 }
  0x22   :  { %10 = vsyncpa [#allocation3], 0  ;;  %v157_v62 = vunpack.c.l.b16 %v70_v54  ;;  %v161_v63 = vunpack.c.l.b16 %v74_v55  ;;  %v159_v0 = vunpack.c.l.b16 %v72_v56  ;;  %v163_v1 = vunpack.c.l.b16 %v76_v57  ;;  %v736_v12 = vld [vmem:[%s947_s3 + $0x38] sm:$0xff]   ;;  %v737_v15 = vld [vmem:[%s947_s3 + $0x30] sm:$0xff]   ;;  %s768_s26 = smov [#allocation2]  }
  0x23   :  { %v168_v2 = vrot.slane %v162_v59, 7  ;;  %v172_v3 = vrot.slane %v164_v61, 7  ;;  %v738_v16 = vld [vmem:[%s947_s3 + $0x28] sm:$0xff]   ;;  %v739_v17 = vld [vmem:[%s947_s3 + $0x20] sm:$0xff]   ;;  %v740_v18 = vld [vmem:[%s947_s3 + $0x18] sm:$0xff]   ;;  %vm767_vm1 = vmmov 0  }
  0x24   :  { %v165_v4 = vrot.slane %v161_v63, 7  ;;  %v170_v5 = vrot.slane %v163_v1, 7  ;;  %v741_v19 = vld [vmem:[%s947_s3 + $0x10] sm:$0xff]   ;;  %v742_v20 = vld [vmem:[%s947_s3 + $0x8] sm:$0xff]   ;;  %v743_v21 = vld [vmem:[%s947_s3] sm:$0xff]   ;;  %s574_s27 = sshll.u32 %s768_s26, 4  ;;  %s575_s27 = int_to_ptr.vmem [resolvable:$true] %s574_s27 }
  0x25   :  { %v169_v6 = vsel %vm166_vm0, %v168_v2, %v158_v58  ;;  %v173_v7 = vsel %vm166_vm0, %v172_v3, %v160_v60  ;;  %v582_v24 = vld [vmem:[%s946_s2] ss:$0 sm:$0xff]  ;;  %s744_s2 = scalar_lea.vmem %s575_s27, 32  ;;  %p749_p1 = scmp.lt.s32.totalorder %s575_s27, %s575_s27 }
  0x26   :  { %v175_v8 = vpack.c.b16 %v169_v6, %v169_v6  ;;  %v177_v9 = vpack.c.b16 %v173_v7, %v173_v7  ;;  %v167_v10 = vsel %vm166_vm0, %v165_v4, %v157_v62  ;;  %v171_v11 = vsel %vm166_vm0, %v170_v5, %v159_v0  ;;  %v615_v37 = vld [vmem:[%s948_s4] ss:$0 sm:$0xff]  ;;  %p745_p0 = scmp.ne.s32.totalorder %s575_s27, %s744_s2  ;;  %p750_p2 = scmp.lt.s32.totalorder %s744_s2, %s744_s2 }
  0x27   :  { %v174_v13 = vpack.c.b16 %v167_v10, %v167_v10  ;;  %v176_v14 = vpack.c.b16 %v171_v11, %v171_v11 }
  0x28   :  { %406 = vmatprep.mubr.bf16.mxu0 %v175_v8  ;;  %446 = vmatprep.mubr.bf16.mxu1 %v177_v9  ;;  %p751_p3 = por %p750_p2, %p749_p1 }
  0x29   :  { %407 = vmatmul.mubr.bf16.vlgmr.msra.gmra.mxu0 %v174_v13  ;;  %447 = vmatmul.mubr.bf16.vlgmr.msra.gmra.mxu1 %v176_v14 }
  0x2a   :  { %682 = vmatpush3.bf16.msra.mxu0 %v736_v12  ;;  %697 = vmatprep.mubr.msk.bf16.mxu0 %vm767_vm1, %v766_v41  ;;  %p752_p4 = pnand %p751_p3, %p745_p0 }
  0x2b   :  { %683 = vmatprep.subr.bf16.mxu0 %v766_v41 }
  0x2e   :  { %684 = vmatpush3.bf16.msra.mxu0 %v737_v15 }
  0x2f   :  { %685 = vmatprep.subr.bf16.mxu0 %v766_v41 }
  0x32   :  { %686 = vmatpush3.bf16.msra.mxu0 %v738_v16 }
  0x33   :  { %687 = vmatprep.subr.bf16.mxu0 %v766_v41 }
  0x36   :  { %688 = vmatpush3.bf16.msra.mxu0 %v739_v17 }
  0x37   :  { %689 = vmatprep.subr.bf16.mxu0 %v766_v41 }
  0x3a   :  { %690 = vmatpush3.bf16.msra.mxu0 %v740_v18 }
  0x3b   :  { %691 = vmatprep.subr.bf16.mxu0 %v766_v41 }
  0x3e   :  { %692 = vmatpush3.bf16.msra.mxu0 %v741_v19 }
  0x3f   :  { %693 = vmatprep.subr.bf16.mxu0 %v766_v41 }
  0x42   :  { %694 = vmatpush3.bf16.msra.mxu0 %v742_v20 }
  0x43   :  { %695 = vmatprep.subr.bf16.mxu0 %v766_v41 }
  0x46   :  { %696 = vmatpush3.bf16.msra.mxu0 %v743_v21 }
  0xe9   :  { %v644_v22 = vpop.f32.mrf.mxu0  ;;  %v666_v23 = vpop.f32.mrf.mxu1 }
  0xeb   :  { %v645_v25 = vpop.f32.mrf.mxu0  ;;  %v667_v26 = vpop.f32.mrf.mxu1 }
  0xec   :  { %v646_v27 = vadd.f32 %v645_v25, %v644_v22  ;;  %v668_v31 = vadd.f32 %v667_v26, %v666_v23 }
  0xed   :  { %v647_v28 = vpop.f32.mrf.mxu0  ;;  %v669_v29 = vpop.f32.mrf.mxu1 }
  0xee   :  { %v409_v30 = vadd.f32 %v646_v27, %v582_v24 }
  0xef   :  { %v648_v32 = vpop.f32.mrf.mxu0  ;;  %v670_v33 = vpop.f32.mrf.mxu1 }
  0xf0   :  { %v449_v34 = vadd.f32 %v668_v31, %v409_v30 }
  0xf2   :  { %v454_v35 = vmax.f32 %v449_v34, 0.0 }
  0xf4   :  { %v455_v36 = vpack.c.bf16 %v454_v35, %v454_v35 }
  0xf6   :  { %698 = vmatmul.mubr.bf16.vlgmr.msra.gmra.mxu0 %v455_v36 }
 0x1b6   :  { %v561_v38 = vpop.f32.mrf.mxu0 }
 0x1b7   :  { %v562_v39 = vadd.f32 %v615_v37, %v561_v38 }
 0x1b8   :  { %v699_v40 = vpop.f32.mrf.mxu0 }
 0x1b9   :  { %567 = vst [vmem:[#allocation2] sm:$0x3] %v562_v39 }
 0x1ba   :  { %v564_v41 = vpop.f32.mrf.mxu0 }
 0x1bb   :  { %755 = shalt.err (!%p752_p4)
}
 0x1bc   :  { %577 = dma.vmem_to_hbm [thread:$0]  %s575_s27, 32, %s949_s5, [#allocation3]   ;;  %v700_v42 = vpop.f32.mrf.mxu0 }
 0x1bd   :  { %764 = dma.done.wait [#allocation3], 32  }
 0x1be   :  { %765 = vsyncadd [#allocation3], 4294967264 }
 0x1bf   :  { %581 = vsyncpa [#allocation3], 1 }

</bundles_post_ra>
